<compile_context>
chip_gen: v7x
topology: tpu7x:2x2x1
jax: 0.10.0
libtpu: 0.0.40
codegen_flags: <defaults>
</compile_context>

<pallas_src>
import functools

import jax
import jax.numpy as jnp
from jax.experimental import pallas as pl
from jax.experimental.pallas import tpu as pltpu


def _sigmoid_f32(z):
    return 1.0 / (1.0 + jnp.exp(-z))


def _spatial_attention_kernel(x_ref, w_ref, o_ref, *, k_size):
    # x_ref : (TN, C, H, W)   VMEM, one block of batch elements
    # w_ref : (2 * K * K,)    SMEM, conv weight flattened [in_ch, kh, kw]
    # o_ref : (TN, C, H, W)   VMEM
    TN, C, H, W = x_ref.shape
    K = k_size
    P = K // 2

    # Load the block once; reuse it for the reductions and the final scale.
    x = x_ref[...]

    # Per-pixel channel mean (f32 accumulation) and channel max.  C is a major
    # (untiled) axis, so these reductions are cheap vreg adds/maxes.
    mean_map = jnp.sum(x, axis=1, dtype=jnp.float32) * jnp.float32(1.0 / C)
    max_map = jnp.max(x, axis=1).astype(jnp.float32)          # (TN, H, W)

    # Zero padding built as values (concatenate) -> conv's zero padding.
    zrow = jnp.zeros((TN, P, W), jnp.float32)
    zcol = jnp.zeros((TN, H + 2 * P, P), jnp.float32)

    # KxK conv (cross-correlation, no bias) as a static shift-and-accumulate:
    #   acc[b,h,w] = sum_{c,ki,kj} w[c,ki,kj] * pad[c][b, h+ki, w+kj]
    acc = jnp.zeros((TN, H, W), jnp.float32)
    for c, m in enumerate((mean_map, max_map)):
        mh = jnp.concatenate([zrow, m, zrow], axis=1)         # (TN, H+2P, W)
        pmap = jnp.concatenate([zcol, mh, zcol], axis=2)      # (TN, H+2P, W+2P)
        for ki in range(K):
            rows = pmap[:, ki:ki + H, :]                      # (TN, H, W+2P)
            for kj in range(K):
                wv = w_ref[c * K * K + ki * K + kj]           # SMEM scalar
                acc = acc + wv * rows[:, :, kj:kj + W]

    # Sigmoid gate in f32; keep the big elementwise multiply in the input dtype.
    gate = _sigmoid_f32(acc).astype(x.dtype)                  # (TN, H, W)
    o_ref[...] = x * gate[:, None, :, :]


def spatial_attention(x_nchw, weight, *, kernel_size=7, block_batch=None):
    """x_nchw: (N, C, H, W); weight: (1, 2, K, K) conv weight (no bias)."""
    N, C, H, W = x_nchw.shape
    assert kernel_size in (3, 7), "kernel size must be 3 or 7"
    assert weight.shape == (1, 2, kernel_size, kernel_size)

    # Conv weight flattened c-major -> cheap SMEM scalar reads inside the kernel.
    w_flat = weight.reshape(-1).astype(jnp.float32)           # (2*K*K,)

    # Fuse several batch elements per grid step: amortize per-step overhead
    # while staying well inside VMEM (leave room for double buffering).
    per_elem_bytes = C * H * W * x_nchw.dtype.itemsize
    if block_batch is None:
        budget = 4 * 1024 * 1024
        tn = 1
        for cand in range(1, N + 1):
            if N % cand == 0 and cand * per_elem_bytes <= budget:
                tn = cand
    else:
        tn = block_batch
    assert N % tn == 0, "block_batch must divide N"
    grid = (N // tn,)

    out = pl.pallas_call(
        functools.partial(_spatial_attention_kernel, k_size=kernel_size),
        out_shape=jax.ShapeDtypeStruct((N, C, H, W), x_nchw.dtype),
        grid_spec=pltpu.PrefetchScalarGridSpec(
            num_scalar_prefetch=0,
            grid=grid,
            in_specs=[
                pl.BlockSpec((tn, C, H, W), lambda n: (n, 0, 0, 0)),   # x block
                pl.BlockSpec(memory_space=pltpu.MemorySpace.SMEM),     # weights
            ],
            out_specs=pl.BlockSpec((tn, C, H, W), lambda n: (n, 0, 0, 0)),
        ),
        compiler_params=pltpu.CompilerParams(
            dimension_semantics=("parallel",),   # batch-parallel -> both TCs on v7x
        ),
    )(x_nchw, w_flat)
    return out


def _reference(x, weight):
    # Pure-JAX reference mirroring the PyTorch module.
    mean_map = jnp.mean(x, axis=1, keepdims=True)             # (N, 1, H, W)
    max_map = jnp.max(x, axis=1, keepdims=True)               # (N, 1, H, W)
    cat = jnp.concatenate([mean_map, max_map], axis=1)        # (N, 2, H, W)
    P = weight.shape[-1] // 2
    y = jax.lax.conv_general_dilated(
        cat, weight,
        window_strides=(1, 1),
        padding=((P, P), (P, P)),
        dimension_numbers=("NCHW", "OIHW", "NCHW"),
        precision=jax.lax.Precision.HIGHEST,
    )                                                         # (N, 1, H, W)
    return x * _sigmoid_f32(y)


if __name__ == "__main__":
    # Small shapes consistent with the module: batch=2, channels=4, spatial=16x16.
    N, C, H, W = 2, 4, 16, 16
    K = 7

    key = jax.random.PRNGKey(0)
    kx, kw = jax.random.split(key, 2)

    x = jax.random.normal(kx, (N, C, H, W), dtype=jnp.float32)
    # Deterministic "Conv2d(2, 1, 7, padding=3, bias=False)" weight (synthetic init).
    fan_in = 2 * K * K
    bound = 1.0 / (fan_in ** 0.5)
    weight = jax.random.uniform(kw, (1, 2, K, K), minval=-bound, maxval=bound,
                                dtype=jnp.float32)

    out = spatial_attention(x, weight, kernel_size=K)
    out = jax.block_until_ready(out)

    ref = _reference(x, weight)
    assert out.shape == (N, C, H, W)
    assert jnp.allclose(out, ref, atol=1e-5, rtol=1e-5), "mismatch vs reference"

    print("KERNEL_OK")
</pallas_src>

<mosaic_0001>
module attributes {stable_mosaic.version = 11 : i64} {
  func.func @_spatial_attention_kernel(%arg0: i32, %arg1: memref<2x4x16x16xf32, #tpu.memory_space<vmem>>, %arg2: memref<98xf32, #tpu.memory_space<smem>>, %arg3: memref<2x4x16x16xf32, #tpu.memory_space<vmem>>) attributes {dimension_semantics = [#tpu.dimension_semantics<parallel>], iteration_bounds = array<i64: 1>, scalar_prefetch = 0 : i64, scratch_operands = 0 : i64, tpu.core_type = #tpu.core_type<tc>, window_params = [{transform_indices = @transform_0, window_bounds = array<i64: 2, 4, 16, 16>}, {transform_indices = @transform_1, window_bounds = array<i64: 98>}, {transform_indices = @transform_2, window_bounds = array<i64: 2, 4, 16, 16>}]} {
    %c0 = arith.constant 0 : index
    %c0_0 = arith.constant 0 : index
    %c0_1 = arith.constant 0 : index
    %c0_2 = arith.constant 0 : index
    %0 = vector.load %arg1[%c0, %c0_0, %c0_1, %c0_2] : memref<2x4x16x16xf32, #tpu.memory_space<vmem>>, vector<2x4x16x16xf32>
    %cst = arith.constant dense<0.000000e+00> : vector<2x16x16xf32>
    %1 = vector.multi_reduction <add>, %0, %cst [1] : vector<2x4x16x16xf32> to vector<2x16x16xf32>
    %cst_3 = arith.constant 2.500000e-01 : f32
    %2 = vector.broadcast %cst_3 : f32 to vector<2x16x16xf32>
    %3 = arith.mulf %1, %2 : vector<2x16x16xf32>
    %cst_4 = arith.constant dense<0xFF800000> : vector<2x16x16xf32>
    %4 = vector.multi_reduction <maximumf>, %0, %cst_4 [1] : vector<2x4x16x16xf32> to vector<2x16x16xf32>
    %cst_5 = arith.constant 0.000000e+00 : f32
    %5 = vector.broadcast %cst_5 : f32 to vector<2x3x16xf32>
    %cst_6 = arith.constant 0.000000e+00 : f32
    %6 = vector.broadcast %cst_6 : f32 to vector<2x22x3xf32>
    %cst_7 = arith.constant 0.000000e+00 : f32
    %7 = vector.broadcast %cst_7 : f32 to vector<2x16x16xf32>
    %8 = tpu.concatenate %5, %3, %5 in 1 : vector<2x3x16xf32>, vector<2x16x16xf32>, vector<2x3x16xf32> -> vector<2x22x16xf32>
    %9 = tpu.concatenate %6, %8, %6 in 2 : vector<2x22x3xf32>, vector<2x22x16xf32>, vector<2x22x3xf32> -> vector<2x22x22xf32>
    %10 = vector.extract_strided_slice %9 {offsets = [0, 0, 0], sizes = [2, 16, 22], strides = [1, 1, 1]} : vector<2x22x22xf32> to vector<2x16x22xf32>
    %c0_8 = arith.constant 0 : index
    %11 = memref.load %arg2[%c0_8] : memref<98xf32, #tpu.memory_space<smem>>
    %12 = vector.extract_strided_slice %10 {offsets = [0, 0, 0], sizes = [2, 16, 16], strides = [1, 1, 1]} : vector<2x16x22xf32> to vector<2x16x16xf32>
    %13 = vector.broadcast %11 : f32 to vector<2x16x16xf32>
    %14 = arith.mulf %13, %12 : vector<2x16x16xf32>
    %15 = arith.addf %7, %14 : vector<2x16x16xf32>
    %c1 = arith.constant 1 : index
    %16 = memref.load %arg2[%c1] : memref<98xf32, #tpu.memory_space<smem>>
    %17 = vector.extract_strided_slice %10 {offsets = [0, 0, 1], sizes = [2, 16, 16], strides = [1, 1, 1]} : vector<2x16x22xf32> to vector<2x16x16xf32>
    %18 = vector.broadcast %16 : f32 to vector<2x16x16xf32>
    %19 = arith.mulf %18, %17 : vector<2x16x16xf32>
    %20 = arith.addf %15, %19 : vector<2x16x16xf32>
    %c2 = arith.constant 2 : index
    %21 = memref.load %arg2[%c2] : memref<98xf32, #tpu.memory_space<smem>>
    %22 = vector.extract_strided_slice %10 {offsets = [0, 0, 2], sizes = [2, 16, 16], strides = [1, 1, 1]} : vector<2x16x22xf32> to vector<2x16x16xf32>
    %23 = vector.broadcast %21 : f32 to vector<2x16x16xf32>
    %24 = arith.mulf %23, %22 : vector<2x16x16xf32>
    %25 = arith.addf %20, %24 : vector<2x16x16xf32>
    %c3 = arith.constant 3 : index
    %26 = memref.load %arg2[%c3] : memref<98xf32, #tpu.memory_space<smem>>
    %27 = vector.extract_strided_slice %10 {offsets = [0, 0, 3], sizes = [2, 16, 16], strides = [1, 1, 1]} : vector<2x16x22xf32> to vector<2x16x16xf32>
    %28 = vector.broadcast %26 : f32 to vector<2x16x16xf32>
    %29 = arith.mulf %28, %27 : vector<2x16x16xf32>
    %30 = arith.addf %25, %29 : vector<2x16x16xf32>
    %c4 = arith.constant 4 : index
    %31 = memref.load %arg2[%c4] : memref<98xf32, #tpu.memory_space<smem>>
    %32 = vector.extract_strided_slice %10 {offsets = [0, 0, 4], sizes = [2, 16, 16], strides = [1, 1, 1]} : vector<2x16x22xf32> to vector<2x16x16xf32>
    %33 = vector.broadcast %31 : f32 to vector<2x16x16xf32>
    %34 = arith.mulf %33, %32 : vector<2x16x16xf32>
    %35 = arith.addf %30, %34 : vector<2x16x16xf32>
    %c5 = arith.constant 5 : index
    %36 = memref.load %arg2[%c5] : memref<98xf32, #tpu.memory_space<smem>>
    %37 = vector.extract_strided_slice %10 {offsets = [0, 0, 5], sizes = [2, 16, 16], strides = [1, 1, 1]} : vector<2x16x22xf32> to vector<2x16x16xf32>
    %38 = vector.broadcast %36 : f32 to vector<2x16x16xf32>
    %39 = arith.mulf %38, %37 : vector<2x16x16xf32>
    %40 = arith.addf %35, %39 : vector<2x16x16xf32>
    %c6 = arith.constant 6 : index
    %41 = memref.load %arg2[%c6] : memref<98xf32, #tpu.memory_space<smem>>
    %42 = vector.extract_strided_slice %10 {offsets = [0, 0, 6], sizes = [2, 16, 16], strides = [1, 1, 1]} : vector<2x16x22xf32> to vector<2x16x16xf32>
    %43 = vector.broadcast %41 : f32 to vector<2x16x16xf32>
    %44 = arith.mulf %43, %42 : vector<2x16x16xf32>
    %45 = arith.addf %40, %44 : vector<2x16x16xf32>
    %46 = vector.extract_strided_slice %9 {offsets = [0, 1, 0], sizes = [2, 16, 22], strides = [1, 1, 1]} : vector<2x22x22xf32> to vector<2x16x22xf32>
    %c7 = arith.constant 7 : index
    %47 = memref.load %arg2[%c7] : memref<98xf32, #tpu.memory_space<smem>>
    %48 = vector.extract_strided_slice %46 {offsets = [0, 0, 0], sizes = [2, 16, 16], strides = [1, 1, 1]} : vector<2x16x22xf32> to vector<2x16x16xf32>
    %49 = vector.broadcast %47 : f32 to vector<2x16x16xf32>
    %50 = arith.mulf %49, %48 : vector<2x16x16xf32>
    %51 = arith.addf %45, %50 : vector<2x16x16xf32>
    %c8 = arith.constant 8 : index
    %52 = memref.load %arg2[%c8] : memref<98xf32, #tpu.memory_space<smem>>
    %53 = vector.extract_strided_slice %46 {offsets = [0, 0, 1], sizes = [2, 16, 16], strides = [1, 1, 1]} : vector<2x16x22xf32> to vector<2x16x16xf32>
    %54 = vector.broadcast %52 : f32 to vector<2x16x16xf32>
    %55 = arith.mulf %54, %53 : vector<2x16x16xf32>
    %56 = arith.addf %51, %55 : vector<2x16x16xf32>
    %c9 = arith.constant 9 : index
    %57 = memref.load %arg2[%c9] : memref<98xf32, #tpu.memory_space<smem>>
    %58 = vector.extract_strided_slice %46 {offsets = [0, 0, 2], sizes = [2, 16, 16], strides = [1, 1, 1]} : vector<2x16x22xf32> to vector<2x16x16xf32>
    %59 = vector.broadcast %57 : f32 to vector<2x16x16xf32>
    %60 = arith.mulf %59, %58 : vector<2x16x16xf32>
    %61 = arith.addf %56, %60 : vector<2x16x16xf32>
    %c10 = arith.constant 10 : index
    %62 = memref.load %arg2[%c10] : memref<98xf32, #tpu.memory_space<smem>>
    %63 = vector.extract_strided_slice %46 {offsets = [0, 0, 3], sizes = [2, 16, 16], strides = [1, 1, 1]} : vector<2x16x22xf32> to vector<2x16x16xf32>
    %64 = vector.broadcast %62 : f32 to vector<2x16x16xf32>
    %65 = arith.mulf %64, %63 : vector<2x16x16xf32>
    %66 = arith.addf %61, %65 : vector<2x16x16xf32>
    %c11 = arith.constant 11 : index
    %67 = memref.load %arg2[%c11] : memref<98xf32, #tpu.memory_space<smem>>
    %68 = vector.extract_strided_slice %46 {offsets = [0, 0, 4], sizes = [2, 16, 16], strides = [1, 1, 1]} : vector<2x16x22xf32> to vector<2x16x16xf32>
    %69 = vector.broadcast %67 : f32 to vector<2x16x16xf32>
    %70 = arith.mulf %69, %68 : vector<2x16x16xf32>
    %71 = arith.addf %66, %70 : vector<2x16x16xf32>
    %c12 = arith.constant 12 : index
    %72 = memref.load %arg2[%c12] : memref<98xf32, #tpu.memory_space<smem>>
    %73 = vector.extract_strided_slice %46 {offsets = [0, 0, 5], sizes = [2, 16, 16], strides = [1, 1, 1]} : vector<2x16x22xf32> to vector<2x16x16xf32>
    %74 = vector.broadcast %72 : f32 to vector<2x16x16xf32>
    %75 = arith.mulf %74, %73 : vector<2x16x16xf32>
    %76 = arith.addf %71, %75 : vector<2x16x16xf32>
    %c13 = arith.constant 13 : index
    %77 = memref.load %arg2[%c13] : memref<98xf32, #tpu.memory_space<smem>>
    %78 = vector.extract_strided_slice %46 {offsets = [0, 0, 6], sizes = [2, 16, 16], strides = [1, 1, 1]} : vector<2x16x22xf32> to vector<2x16x16xf32>
    %79 = vector.broadcast %77 : f32 to vector<2x16x16xf32>
    %80 = arith.mulf %79, %78 : vector<2x16x16xf32>
    %81 = arith.addf %76, %80 : vector<2x16x16xf32>
    %82 = vector.extract_strided_slice %9 {offsets = [0, 2, 0], sizes = [2, 16, 22], strides = [1, 1, 1]} : vector<2x22x22xf32> to vector<2x16x22xf32>
    %c14 = arith.constant 14 : index
    %83 = memref.load %arg2[%c14] : memref<98xf32, #tpu.memory_space<smem>>
    %84 = vector.extract_strided_slice %82 {offsets = [0, 0, 0], sizes = [2, 16, 16], strides = [1, 1, 1]} : vector<2x16x22xf32> to vector<2x16x16xf32>
    %85 = vector.broadcast %83 : f32 to vector<2x16x16xf32>
    %86 = arith.mulf %85, %84 : vector<2x16x16xf32>
    %87 = arith.addf %81, %86 : vector<2x16x16xf32>
    %c15 = arith.constant 15 : index
    %88 = memref.load %arg2[%c15] : memref<98xf32, #tpu.memory_space<smem>>
    %89 = vector.extract_strided_slice %82 {offsets = [0, 0, 1], sizes = [2, 16, 16], strides = [1, 1, 1]} : vector<2x16x22xf32> to vector<2x16x16xf32>
    %90 = vector.broadcast %88 : f32 to vector<2x16x16xf32>
    %91 = arith.mulf %90, %89 : vector<2x16x16xf32>
    %92 = arith.addf %87, %91 : vector<2x16x16xf32>
    %c16 = arith.constant 16 : index
    %93 = memref.load %arg2[%c16] : memref<98xf32, #tpu.memory_space<smem>>
    %94 = vector.extract_strided_slice %82 {offsets = [0, 0, 2], sizes = [2, 16, 16], strides = [1, 1, 1]} : vector<2x16x22xf32> to vector<2x16x16xf32>
    %95 = vector.broadcast %93 : f32 to vector<2x16x16xf32>
    %96 = arith.mulf %95, %94 : vector<2x16x16xf32>
    %97 = arith.addf %92, %96 : vector<2x16x16xf32>
    %c17 = arith.constant 17 : index
    %98 = memref.load %arg2[%c17] : memref<98xf32, #tpu.memory_space<smem>>
    %99 = vector.extract_strided_slice %82 {offsets = [0, 0, 3], sizes = [2, 16, 16], strides = [1, 1, 1]} : vector<2x16x22xf32> to vector<2x16x16xf32>
    %100 = vector.broadcast %98 : f32 to vector<2x16x16xf32>
    %101 = arith.mulf %100, %99 : vector<2x16x16xf32>
    %102 = arith.addf %97, %101 : vector<2x16x16xf32>
    %c18 = arith.constant 18 : index
    %103 = memref.load %arg2[%c18] : memref<98xf32, #tpu.memory_space<smem>>
    %104 = vector.extract_strided_slice %82 {offsets = [0, 0, 4], sizes = [2, 16, 16], strides = [1, 1, 1]} : vector<2x16x22xf32> to vector<2x16x16xf32>
    %105 = vector.broadcast %103 : f32 to vector<2x16x16xf32>
    %106 = arith.mulf %105, %104 : vector<2x16x16xf32>
    %107 = arith.addf %102, %106 : vector<2x16x16xf32>
    %c19 = arith.constant 19 : index
    %108 = memref.load %arg2[%c19] : memref<98xf32, #tpu.memory_space<smem>>
    %109 = vector.extract_strided_slice %82 {offsets = [0, 0, 5], sizes = [2, 16, 16], strides = [1, 1, 1]} : vector<2x16x22xf32> to vector<2x16x16xf32>
    %110 = vector.broadcast %108 : f32 to vector<2x16x16xf32>
    %111 = arith.mulf %110, %109 : vector<2x16x16xf32>
    %112 = arith.addf %107, %111 : vector<2x16x16xf32>
    %c20 = arith.constant 20 : index
    %113 = memref.load %arg2[%c20] : memref<98xf32, #tpu.memory_space<smem>>
    %114 = vector.extract_strided_slice %82 {offsets = [0, 0, 6], sizes = [2, 16, 16], strides = [1, 1, 1]} : vector<2x16x22xf32> to vector<2x16x16xf32>
    %115 = vector.broadcast %113 : f32 to vector<2x16x16xf32>
    %116 = arith.mulf %115, %114 : vector<2x16x16xf32>
    %117 = arith.addf %112, %116 : vector<2x16x16xf32>
    %118 = vector.extract_strided_slice %9 {offsets = [0, 3, 0], sizes = [2, 16, 22], strides = [1, 1, 1]} : vector<2x22x22xf32> to vector<2x16x22xf32>
    %c21 = arith.constant 21 : index
    %119 = memref.load %arg2[%c21] : memref<98xf32, #tpu.memory_space<smem>>
    %120 = vector.extract_strided_slice %118 {offsets = [0, 0, 0], sizes = [2, 16, 16], strides = [1, 1, 1]} : vector<2x16x22xf32> to vector<2x16x16xf32>
    %121 = vector.broadcast %119 : f32 to vector<2x16x16xf32>
    %122 = arith.mulf %121, %120 : vector<2x16x16xf32>
    %123 = arith.addf %117, %122 : vector<2x16x16xf32>
    %c22 = arith.constant 22 : index
    %124 = memref.load %arg2[%c22] : memref<98xf32, #tpu.memory_space<smem>>
    %125 = vector.extract_strided_slice %118 {offsets = [0, 0, 1], sizes = [2, 16, 16], strides = [1, 1, 1]} : vector<2x16x22xf32> to vector<2x16x16xf32>
    %126 = vector.broadcast %124 : f32 to vector<2x16x16xf32>
    %127 = arith.mulf %126, %125 : vector<2x16x16xf32>
    %128 = arith.addf %123, %127 : vector<2x16x16xf32>
    %c23 = arith.constant 23 : index
    %129 = memref.load %arg2[%c23] : memref<98xf32, #tpu.memory_space<smem>>
    %130 = vector.extract_strided_slice %118 {offsets = [0, 0, 2], sizes = [2, 16, 16], strides = [1, 1, 1]} : vector<2x16x22xf32> to vector<2x16x16xf32>
    %131 = vector.broadcast %129 : f32 to vector<2x16x16xf32>
    %132 = arith.mulf %131, %130 : vector<2x16x16xf32>
    %133 = arith.addf %128, %132 : vector<2x16x16xf32>
    %c24 = arith.constant 24 : index
    %134 = memref.load %arg2[%c24] : memref<98xf32, #tpu.memory_space<smem>>
    %135 = vector.extract_strided_slice %118 {offsets = [0, 0, 3], sizes = [2, 16, 16], strides = [1, 1, 1]} : vector<2x16x22xf32> to vector<2x16x16xf32>
    %136 = vector.broadcast %134 : f32 to vector<2x16x16xf32>
    %137 = arith.mulf %136, %135 : vector<2x16x16xf32>
    %138 = arith.addf %133, %137 : vector<2x16x16xf32>
    %c25 = arith.constant 25 : index
    %139 = memref.load %arg2[%c25] : memref<98xf32, #tpu.memory_space<smem>>
    %140 = vector.extract_strided_slice %118 {offsets = [0, 0, 4], sizes = [2, 16, 16], strides = [1, 1, 1]} : vector<2x16x22xf32> to vector<2x16x16xf32>
    %141 = vector.broadcast %139 : f32 to vector<2x16x16xf32>
    %142 = arith.mulf %141, %140 : vector<2x16x16xf32>
    %143 = arith.addf %138, %142 : vector<2x16x16xf32>
    %c26 = arith.constant 26 : index
    %144 = memref.load %arg2[%c26] : memref<98xf32, #tpu.memory_space<smem>>
    %145 = vector.extract_strided_slice %118 {offsets = [0, 0, 5], sizes = [2, 16, 16], strides = [1, 1, 1]} : vector<2x16x22xf32> to vector<2x16x16xf32>
    %146 = vector.broadcast %144 : f32 to vector<2x16x16xf32>
    %147 = arith.mulf %146, %145 : vector<2x16x16xf32>
    %148 = arith.addf %143, %147 : vector<2x16x16xf32>
    %c27 = arith.constant 27 : index
    %149 = memref.load %arg2[%c27] : memref<98xf32, #tpu.memory_space<smem>>
    %150 = vector.extract_strided_slice %118 {offsets = [0, 0, 6], sizes = [2, 16, 16], strides = [1, 1, 1]} : vector<2x16x22xf32> to vector<2x16x16xf32>
    %151 = vector.broadcast %149 : f32 to vector<2x16x16xf32>
    %152 = arith.mulf %151, %150 : vector<2x16x16xf32>
    %153 = arith.addf %148, %152 : vector<2x16x16xf32>
    %154 = vector.extract_strided_slice %9 {offsets = [0, 4, 0], sizes = [2, 16, 22], strides = [1, 1, 1]} : vector<2x22x22xf32> to vector<2x16x22xf32>
    %c28 = arith.constant 28 : index
    %155 = memref.load %arg2[%c28] : memref<98xf32, #tpu.memory_space<smem>>
    %156 = vector.extract_strided_slice %154 {offsets = [0, 0, 0], sizes = [2, 16, 16], strides = [1, 1, 1]} : vector<2x16x22xf32> to vector<2x16x16xf32>
    %157 = vector.broadcast %155 : f32 to vector<2x16x16xf32>
    %158 = arith.mulf %157, %156 : vector<2x16x16xf32>
    %159 = arith.addf %153, %158 : vector<2x16x16xf32>
    %c29 = arith.constant 29 : index
    %160 = memref.load %arg2[%c29] : memref<98xf32, #tpu.memory_space<smem>>
    %161 = vector.extract_strided_slice %154 {offsets = [0, 0, 1], sizes = [2, 16, 16], strides = [1, 1, 1]} : vector<2x16x22xf32> to vector<2x16x16xf32>
    %162 = vector.broadcast %160 : f32 to vector<2x16x16xf32>
    %163 = arith.mulf %162, %161 : vector<2x16x16xf32>
    %164 = arith.addf %159, %163 : vector<2x16x16xf32>
    %c30 = arith.constant 30 : index
    %165 = memref.load %arg2[%c30] : memref<98xf32, #tpu.memory_space<smem>>
    %166 = vector.extract_strided_slice %154 {offsets = [0, 0, 2], sizes = [2, 16, 16], strides = [1, 1, 1]} : vector<2x16x22xf32> to vector<2x16x16xf32>
    %167 = vector.broadcast %165 : f32 to vector<2x16x16xf32>
    %168 = arith.mulf %167, %166 : vector<2x16x16xf32>
    %169 = arith.addf %164, %168 : vector<2x16x16xf32>
    %c31 = arith.constant 31 : index
    %170 = memref.load %arg2[%c31] : memref<98xf32, #tpu.memory_space<smem>>
    %171 = vector.extract_strided_slice %154 {offsets = [0, 0, 3], sizes = [2, 16, 16], strides = [1, 1, 1]} : vector<2x16x22xf32> to vector<2x16x16xf32>
    %172 = vector.broadcast %170 : f32 to vector<2x16x16xf32>
    %173 = arith.mulf %172, %171 : vector<2x16x16xf32>
    %174 = arith.addf %169, %173 : vector<2x16x16xf32>
    %c32 = arith.constant 32 : index
    %175 = memref.load %arg2[%c32] : memref<98xf32, #tpu.memory_space<smem>>
    %176 = vector.extract_strided_slice %154 {offsets = [0, 0, 4], sizes = [2, 16, 16], strides = [1, 1, 1]} : vector<2x16x22xf32> to vector<2x16x16xf32>
    %177 = vector.broadcast %175 : f32 to vector<2x16x16xf32>
    %178 = arith.mulf %177, %176 : vector<2x16x16xf32>
    %179 = arith.addf %174, %178 : vector<2x16x16xf32>
    %c33 = arith.constant 33 : index
    %180 = memref.load %arg2[%c33] : memref<98xf32, #tpu.memory_space<smem>>
    %181 = vector.extract_strided_slice %154 {offsets = [0, 0, 5], sizes = [2, 16, 16], strides = [1, 1, 1]} : vector<2x16x22xf32> to vector<2x16x16xf32>
    %182 = vector.broadcast %180 : f32 to vector<2x16x16xf32>
    %183 = arith.mulf %182, %181 : vector<2x16x16xf32>
    %184 = arith.addf %179, %183 : vector<2x16x16xf32>
    %c34 = arith.constant 34 : index
    %185 = memref.load %arg2[%c34] : memref<98xf32, #tpu.memory_space<smem>>
    %186 = vector.extract_strided_slice %154 {offsets = [0, 0, 6], sizes = [2, 16, 16], strides = [1, 1, 1]} : vector<2x16x22xf32> to vector<2x16x16xf32>
    %187 = vector.broadcast %185 : f32 to vector<2x16x16xf32>
    %188 = arith.mulf %187, %186 : vector<2x16x16xf32>
    %189 = arith.addf %184, %188 : vector<2x16x16xf32>
    %190 = vector.extract_strided_slice %9 {offsets = [0, 5, 0], sizes = [2, 16, 22], strides = [1, 1, 1]} : vector<2x22x22xf32> to vector<2x16x22xf32>
    %c35 = arith.constant 35 : index
    %191 = memref.load %arg2[%c35] : memref<98xf32, #tpu.memory_space<smem>>
    %192 = vector.extract_strided_slice %190 {offsets = [0, 0, 0], sizes = [2, 16, 16], strides = [1, 1, 1]} : vector<2x16x22xf32> to vector<2x16x16xf32>
    %193 = vector.broadcast %191 : f32 to vector<2x16x16xf32>
    %194 = arith.mulf %193, %192 : vector<2x16x16xf32>
    %195 = arith.addf %189, %194 : vector<2x16x16xf32>
    %c36 = arith.constant 36 : index
    %196 = memref.load %arg2[%c36] : memref<98xf32, #tpu.memory_space<smem>>
    %197 = vector.extract_strided_slice %190 {offsets = [0, 0, 1], sizes = [2, 16, 16], strides = [1, 1, 1]} : vector<2x16x22xf32> to vector<2x16x16xf32>
    %198 = vector.broadcast %196 : f32 to vector<2x16x16xf32>
    %199 = arith.mulf %198, %197 : vector<2x16x16xf32>
    %200 = arith.addf %195, %199 : vector<2x16x16xf32>
    %c37 = arith.constant 37 : index
    %201 = memref.load %arg2[%c37] : memref<98xf32, #tpu.memory_space<smem>>
    %202 = vector.extract_strided_slice %190 {offsets = [0, 0, 2], sizes = [2, 16, 16], strides = [1, 1, 1]} : vector<2x16x22xf32> to vector<2x16x16xf32>
    %203 = vector.broadcast %201 : f32 to vector<2x16x16xf32>
    %204 = arith.mulf %203, %202 : vector<2x16x16xf32>
    %205 = arith.addf %200, %204 : vector<2x16x16xf32>
    %c38 = arith.constant 38 : index
    %206 = memref.load %arg2[%c38] : memref<98xf32, #tpu.memory_space<smem>>
    %207 = vector.extract_strided_slice %190 {offsets = [0, 0, 3], sizes = [2, 16, 16], strides = [1, 1, 1]} : vector<2x16x22xf32> to vector<2x16x16xf32>
    %208 = vector.broadcast %206 : f32 to vector<2x16x16xf32>
    %209 = arith.mulf %208, %207 : vector<2x16x16xf32>
    %210 = arith.addf %205, %209 : vector<2x16x16xf32>
    %c39 = arith.constant 39 : index
    %211 = memref.load %arg2[%c39] : memref<98xf32, #tpu.memory_space<smem>>
    %212 = vector.extract_strided_slice %190 {offsets = [0, 0, 4], sizes = [2, 16, 16], strides = [1, 1, 1]} : vector<2x16x22xf32> to vector<2x16x16xf32>
    %213 = vector.broadcast %211 : f32 to vector<2x16x16xf32>
    %214 = arith.mulf %213, %212 : vector<2x16x16xf32>
    %215 = arith.addf %210, %214 : vector<2x16x16xf32>
    %c40 = arith.constant 40 : index
    %216 = memref.load %arg2[%c40] : memref<98xf32, #tpu.memory_space<smem>>
    %217 = vector.extract_strided_slice %190 {offsets = [0, 0, 5], sizes = [2, 16, 16], strides = [1, 1, 1]} : vector<2x16x22xf32> to vector<2x16x16xf32>
    %218 = vector.broadcast %216 : f32 to vector<2x16x16xf32>
    %219 = arith.mulf %218, %217 : vector<2x16x16xf32>
    %220 = arith.addf %215, %219 : vector<2x16x16xf32>
    %c41 = arith.constant 41 : index
    %221 = memref.load %arg2[%c41] : memref<98xf32, #tpu.memory_space<smem>>
    %222 = vector.extract_strided_slice %190 {offsets = [0, 0, 6], sizes = [2, 16, 16], strides = [1, 1, 1]} : vector<2x16x22xf32> to vector<2x16x16xf32>
    %223 = vector.broadcast %221 : f32 to vector<2x16x16xf32>
    %224 = arith.mulf %223, %222 : vector<2x16x16xf32>
    %225 = arith.addf %220, %224 : vector<2x16x16xf32>
    %226 = vector.extract_strided_slice %9 {offsets = [0, 6, 0], sizes = [2, 16, 22], strides = [1, 1, 1]} : vector<2x22x22xf32> to vector<2x16x22xf32>
    %c42 = arith.constant 42 : index
    %227 = memref.load %arg2[%c42] : memref<98xf32, #tpu.memory_space<smem>>
    %228 = vector.extract_strided_slice %226 {offsets = [0, 0, 0], sizes = [2, 16, 16], strides = [1, 1, 1]} : vector<2x16x22xf32> to vector<2x16x16xf32>
    %229 = vector.broadcast %227 : f32 to vector<2x16x16xf32>
    %230 = arith.mulf %229, %228 : vector<2x16x16xf32>
    %231 = arith.addf %225, %230 : vector<2x16x16xf32>
    %c43 = arith.constant 43 : index
    %232 = memref.load %arg2[%c43] : memref<98xf32, #tpu.memory_space<smem>>
    %233 = vector.extract_strided_slice %226 {offsets = [0, 0, 1], sizes = [2, 16, 16], strides = [1, 1, 1]} : vector<2x16x22xf32> to vector<2x16x16xf32>
    %234 = vector.broadcast %232 : f32 to vector<2x16x16xf32>
    %235 = arith.mulf %234, %233 : vector<2x16x16xf32>
    %236 = arith.addf %231, %235 : vector<2x16x16xf32>
    %c44 = arith.constant 44 : index
    %237 = memref.load %arg2[%c44] : memref<98xf32, #tpu.memory_space<smem>>
    %238 = vector.extract_strided_slice %226 {offsets = [0, 0, 2], sizes = [2, 16, 16], strides = [1, 1, 1]} : vector<2x16x22xf32> to vector<2x16x16xf32>
    %239 = vector.broadcast %237 : f32 to vector<2x16x16xf32>
    %240 = arith.mulf %239, %238 : vector<2x16x16xf32>
    %241 = arith.addf %236, %240 : vector<2x16x16xf32>
    %c45 = arith.constant 45 : index
    %242 = memref.load %arg2[%c45] : memref<98xf32, #tpu.memory_space<smem>>
    %243 = vector.extract_strided_slice %226 {offsets = [0, 0, 3], sizes = [2, 16, 16], strides = [1, 1, 1]} : vector<2x16x22xf32> to vector<2x16x16xf32>
    %244 = vector.broadcast %242 : f32 to vector<2x16x16xf32>
    %245 = arith.mulf %244, %243 : vector<2x16x16xf32>
    %246 = arith.addf %241, %245 : vector<2x16x16xf32>
    %c46 = arith.constant 46 : index
    %247 = memref.load %arg2[%c46] : memref<98xf32, #tpu.memory_space<smem>>
    %248 = vector.extract_strided_slice %226 {offsets = [0, 0, 4], sizes = [2, 16, 16], strides = [1, 1, 1]} : vector<2x16x22xf32> to vector<2x16x16xf32>
    %249 = vector.broadcast %247 : f32 to vector<2x16x16xf32>
    %250 = arith.mulf %249, %248 : vector<2x16x16xf32>
    %251 = arith.addf %246, %250 : vector<2x16x16xf32>
    %c47 = arith.constant 47 : index
    %252 = memref.load %arg2[%c47] : memref<98xf32, #tpu.memory_space<smem>>
    %253 = vector.extract_strided_slice %226 {offsets = [0, 0, 5], sizes = [2, 16, 16], strides = [1, 1, 1]} : vector<2x16x22xf32> to vector<2x16x16xf32>
    %254 = vector.broadcast %252 : f32 to vector<2x16x16xf32>
    %255 = arith.mulf %254, %253 : vector<2x16x16xf32>
    %256 = arith.addf %251, %255 : vector<2x16x16xf32>
    %c48 = arith.constant 48 : index
    %257 = memref.load %arg2[%c48] : memref<98xf32, #tpu.memory_space<smem>>
    %258 = vector.extract_strided_slice %226 {offsets = [0, 0, 6], sizes = [2, 16, 16], strides = [1, 1, 1]} : vector<2x16x22xf32> to vector<2x16x16xf32>
    %259 = vector.broadcast %257 : f32 to vector<2x16x16xf32>
    %260 = arith.mulf %259, %258 : vector<2x16x16xf32>
    %261 = arith.addf %256, %260 : vector<2x16x16xf32>
    %262 = tpu.concatenate %5, %4, %5 in 1 : vector<2x3x16xf32>, vector<2x16x16xf32>, vector<2x3x16xf32> -> vector<2x22x16xf32>
    %263 = tpu.concatenate %6, %262, %6 in 2 : vector<2x22x3xf32>, vector<2x22x16xf32>, vector<2x22x3xf32> -> vector<2x22x22xf32>
    %264 = vector.extract_strided_slice %263 {offsets = [0, 0, 0], sizes = [2, 16, 22], strides = [1, 1, 1]} : vector<2x22x22xf32> to vector<2x16x22xf32>
    %c49 = arith.constant 49 : index
    %265 = memref.load %arg2[%c49] : memref<98xf32, #tpu.memory_space<smem>>
    %266 = vector.extract_strided_slice %264 {offsets = [0, 0, 0], sizes = [2, 16, 16], strides = [1, 1, 1]} : vector<2x16x22xf32> to vector<2x16x16xf32>
    %267 = vector.broadcast %265 : f32 to vector<2x16x16xf32>
    %268 = arith.mulf %267, %266 : vector<2x16x16xf32>
    %269 = arith.addf %261, %268 : vector<2x16x16xf32>
    %c50 = arith.constant 50 : index
    %270 = memref.load %arg2[%c50] : memref<98xf32, #tpu.memory_space<smem>>
    %271 = vector.extract_strided_slice %264 {offsets = [0, 0, 1], sizes = [2, 16, 16], strides = [1, 1, 1]} : vector<2x16x22xf32> to vector<2x16x16xf32>
    %272 = vector.broadcast %270 : f32 to vector<2x16x16xf32>
    %273 = arith.mulf %272, %271 : vector<2x16x16xf32>
    %274 = arith.addf %269, %273 : vector<2x16x16xf32>
    %c51 = arith.constant 51 : index
    %275 = memref.load %arg2[%c51] : memref<98xf32, #tpu.memory_space<smem>>
    %276 = vector.extract_strided_slice %264 {offsets = [0, 0, 2], sizes = [2, 16, 16], strides = [1, 1, 1]} : vector<2x16x22xf32> to vector<2x16x16xf32>
    %277 = vector.broadcast %275 : f32 to vector<2x16x16xf32>
    %278 = arith.mulf %277, %276 : vector<2x16x16xf32>
    %279 = arith.addf %274, %278 : vector<2x16x16xf32>
    %c52 = arith.constant 52 : index
    %280 = memref.load %arg2[%c52] : memref<98xf32, #tpu.memory_space<smem>>
    %281 = vector.extract_strided_slice %264 {offsets = [0, 0, 3], sizes = [2, 16, 16], strides = [1, 1, 1]} : vector<2x16x22xf32> to vector<2x16x16xf32>
    %282 = vector.broadcast %280 : f32 to vector<2x16x16xf32>
    %283 = arith.mulf %282, %281 : vector<2x16x16xf32>
    %284 = arith.addf %279, %283 : vector<2x16x16xf32>
    %c53 = arith.constant 53 : index
    %285 = memref.load %arg2[%c53] : memref<98xf32, #tpu.memory_space<smem>>
    %286 = vector.extract_strided_slice %264 {offsets = [0, 0, 4], sizes = [2, 16, 16], strides = [1, 1, 1]} : vector<2x16x22xf32> to vector<2x16x16xf32>
    %287 = vector.broadcast %285 : f32 to vector<2x16x16xf32>
    %288 = arith.mulf %287, %286 : vector<2x16x16xf32>
    %289 = arith.addf %284, %288 : vector<2x16x16xf32>
    %c54 = arith.constant 54 : index
    %290 = memref.load %arg2[%c54] : memref<98xf32, #tpu.memory_space<smem>>
    %291 = vector.extract_strided_slice %264 {offsets = [0, 0, 5], sizes = [2, 16, 16], strides = [1, 1, 1]} : vector<2x16x22xf32> to vector<2x16x16xf32>
    %292 = vector.broadcast %290 : f32 to vector<2x16x16xf32>
    %293 = arith.mulf %292, %291 : vector<2x16x16xf32>
    %294 = arith.addf %289, %293 : vector<2x16x16xf32>
    %c55 = arith.constant 55 : index
    %295 = memref.load %arg2[%c55] : memref<98xf32, #tpu.memory_space<smem>>
    %296 = vector.extract_strided_slice %264 {offsets = [0, 0, 6], sizes = [2, 16, 16], strides = [1, 1, 1]} : vector<2x16x22xf32> to vector<2x16x16xf32>
    %297 = vector.broadcast %295 : f32 to vector<2x16x16xf32>
    %298 = arith.mulf %297, %296 : vector<2x16x16xf32>
    %299 = arith.addf %294, %298 : vector<2x16x16xf32>
    %300 = vector.extract_strided_slice %263 {offsets = [0, 1, 0], sizes = [2, 16, 22], strides = [1, 1, 1]} : vector<2x22x22xf32> to vector<2x16x22xf32>
    %c56 = arith.constant 56 : index
    %301 = memref.load %arg2[%c56] : memref<98xf32, #tpu.memory_space<smem>>
    %302 = vector.extract_strided_slice %300 {offsets = [0, 0, 0], sizes = [2, 16, 16], strides = [1, 1, 1]} : vector<2x16x22xf32> to vector<2x16x16xf32>
    %303 = vector.broadcast %301 : f32 to vector<2x16x16xf32>
    %304 = arith.mulf %303, %302 : vector<2x16x16xf32>
    %305 = arith.addf %299, %304 : vector<2x16x16xf32>
    %c57 = arith.constant 57 : index
    %306 = memref.load %arg2[%c57] : memref<98xf32, #tpu.memory_space<smem>>
    %307 = vector.extract_strided_slice %300 {offsets = [0, 0, 1], sizes = [2, 16, 16], strides = [1, 1, 1]} : vector<2x16x22xf32> to vector<2x16x16xf32>
    %308 = vector.broadcast %306 : f32 to vector<2x16x16xf32>
    %309 = arith.mulf %308, %307 : vector<2x16x16xf32>
    %310 = arith.addf %305, %309 : vector<2x16x16xf32>
    %c58 = arith.constant 58 : index
    %311 = memref.load %arg2[%c58] : memref<98xf32, #tpu.memory_space<smem>>
    %312 = vector.extract_strided_slice %300 {offsets = [0, 0, 2], sizes = [2, 16, 16], strides = [1, 1, 1]} : vector<2x16x22xf32> to vector<2x16x16xf32>
    %313 = vector.broadcast %311 : f32 to vector<2x16x16xf32>
    %314 = arith.mulf %313, %312 : vector<2x16x16xf32>
    %315 = arith.addf %310, %314 : vector<2x16x16xf32>
    %c59 = arith.constant 59 : index
    %316 = memref.load %arg2[%c59] : memref<98xf32, #tpu.memory_space<smem>>
    %317 = vector.extract_strided_slice %300 {offsets = [0, 0, 3], sizes = [2, 16, 16], strides = [1, 1, 1]} : vector<2x16x22xf32> to vector<2x16x16xf32>
    %318 = vector.broadcast %316 : f32 to vector<2x16x16xf32>
    %319 = arith.mulf %318, %317 : vector<2x16x16xf32>
    %320 = arith.addf %315, %319 : vector<2x16x16xf32>
    %c60 = arith.constant 60 : index
    %321 = memref.load %arg2[%c60] : memref<98xf32, #tpu.memory_space<smem>>
    %322 = vector.extract_strided_slice %300 {offsets = [0, 0, 4], sizes = [2, 16, 16], strides = [1, 1, 1]} : vector<2x16x22xf32> to vector<2x16x16xf32>
    %323 = vector.broadcast %321 : f32 to vector<2x16x16xf32>
    %324 = arith.mulf %323, %322 : vector<2x16x16xf32>
    %325 = arith.addf %320, %324 : vector<2x16x16xf32>
    %c61 = arith.constant 61 : index
    %326 = memref.load %arg2[%c61] : memref<98xf32, #tpu.memory_space<smem>>
    %327 = vector.extract_strided_slice %300 {offsets = [0, 0, 5], sizes = [2, 16, 16], strides = [1, 1, 1]} : vector<2x16x22xf32> to vector<2x16x16xf32>
    %328 = vector.broadcast %326 : f32 to vector<2x16x16xf32>
    %329 = arith.mulf %328, %327 : vector<2x16x16xf32>
    %330 = arith.addf %325, %329 : vector<2x16x16xf32>
    %c62 = arith.constant 62 : index
    %331 = memref.load %arg2[%c62] : memref<98xf32, #tpu.memory_space<smem>>
    %332 = vector.extract_strided_slice %300 {offsets = [0, 0, 6], sizes = [2, 16, 16], strides = [1, 1, 1]} : vector<2x16x22xf32> to vector<2x16x16xf32>
    %333 = vector.broadcast %331 : f32 to vector<2x16x16xf32>
    %334 = arith.mulf %333, %332 : vector<2x16x16xf32>
    %335 = arith.addf %330, %334 : vector<2x16x16xf32>
    %336 = vector.extract_strided_slice %263 {offsets = [0, 2, 0], sizes = [2, 16, 22], strides = [1, 1, 1]} : vector<2x22x22xf32> to vector<2x16x22xf32>
    %c63 = arith.constant 63 : index
    %337 = memref.load %arg2[%c63] : memref<98xf32, #tpu.memory_space<smem>>
    %338 = vector.extract_strided_slice %336 {offsets = [0, 0, 0], sizes = [2, 16, 16], strides = [1, 1, 1]} : vector<2x16x22xf32> to vector<2x16x16xf32>
    %339 = vector.broadcast %337 : f32 to vector<2x16x16xf32>
    %340 = arith.mulf %339, %338 : vector<2x16x16xf32>
    %341 = arith.addf %335, %340 : vector<2x16x16xf32>
    %c64 = arith.constant 64 : index
    %342 = memref.load %arg2[%c64] : memref<98xf32, #tpu.memory_space<smem>>
    %343 = vector.extract_strided_slice %336 {offsets = [0, 0, 1], sizes = [2, 16, 16], strides = [1, 1, 1]} : vector<2x16x22xf32> to vector<2x16x16xf32>
    %344 = vector.broadcast %342 : f32 to vector<2x16x16xf32>
    %345 = arith.mulf %344, %343 : vector<2x16x16xf32>
    %346 = arith.addf %341, %345 : vector<2x16x16xf32>
    %c65 = arith.constant 65 : index
    %347 = memref.load %arg2[%c65] : memref<98xf32, #tpu.memory_space<smem>>
    %348 = vector.extract_strided_slice %336 {offsets = [0, 0, 2], sizes = [2, 16, 16], strides = [1, 1, 1]} : vector<2x16x22xf32> to vector<2x16x16xf32>
    %349 = vector.broadcast %347 : f32 to vector<2x16x16xf32>
    %350 = arith.mulf %349, %348 : vector<2x16x16xf32>
    %351 = arith.addf %346, %350 : vector<2x16x16xf32>
    %c66 = arith.constant 66 : index
    %352 = memref.load %arg2[%c66] : memref<98xf32, #tpu.memory_space<smem>>
    %353 = vector.extract_strided_slice %336 {offsets = [0, 0, 3], sizes = [2, 16, 16], strides = [1, 1, 1]} : vector<2x16x22xf32> to vector<2x16x16xf32>
    %354 = vector.broadcast %352 : f32 to vector<2x16x16xf32>
    %355 = arith.mulf %354, %353 : vector<2x16x16xf32>
    %356 = arith.addf %351, %355 : vector<2x16x16xf32>
    %c67 = arith.constant 67 : index
    %357 = memref.load %arg2[%c67] : memref<98xf32, #tpu.memory_space<smem>>
    %358 = vector.extract_strided_slice %336 {offsets = [0, 0, 4], sizes = [2, 16, 16], strides = [1, 1, 1]} : vector<2x16x22xf32> to vector<2x16x16xf32>
    %359 = vector.broadcast %357 : f32 to vector<2x16x16xf32>
    %360 = arith.mulf %359, %358 : vector<2x16x16xf32>
    %361 = arith.addf %356, %360 : vector<2x16x16xf32>
    %c68 = arith.constant 68 : index
    %362 = memref.load %arg2[%c68] : memref<98xf32, #tpu.memory_space<smem>>
    %363 = vector.extract_strided_slice %336 {offsets = [0, 0, 5], sizes = [2, 16, 16], strides = [1, 1, 1]} : vector<2x16x22xf32> to vector<2x16x16xf32>
    %364 = vector.broadcast %362 : f32 to vector<2x16x16xf32>
    %365 = arith.mulf %364, %363 : vector<2x16x16xf32>
    %366 = arith.addf %361, %365 : vector<2x16x16xf32>
    %c69 = arith.constant 69 : index
    %367 = memref.load %arg2[%c69] : memref<98xf32, #tpu.memory_space<smem>>
    %368 = vector.extract_strided_slice %336 {offsets = [0, 0, 6], sizes = [2, 16, 16], strides = [1, 1, 1]} : vector<2x16x22xf32> to vector<2x16x16xf32>
    %369 = vector.broadcast %367 : f32 to vector<2x16x16xf32>
    %370 = arith.mulf %369, %368 : vector<2x16x16xf32>
    %371 = arith.addf %366, %370 : vector<2x16x16xf32>
    %372 = vector.extract_strided_slice %263 {offsets = [0, 3, 0], sizes = [2, 16, 22], strides = [1, 1, 1]} : vector<2x22x22xf32> to vector<2x16x22xf32>
    %c70 = arith.constant 70 : index
    %373 = memref.load %arg2[%c70] : memref<98xf32, #tpu.memory_space<smem>>
    %374 = vector.extract_strided_slice %372 {offsets = [0, 0, 0], sizes = [2, 16, 16], strides = [1, 1, 1]} : vector<2x16x22xf32> to vector<2x16x16xf32>
    %375 = vector.broadcast %373 : f32 to vector<2x16x16xf32>
    %376 = arith.mulf %375, %374 : vector<2x16x16xf32>
    %377 = arith.addf %371, %376 : vector<2x16x16xf32>
    %c71 = arith.constant 71 : index
    %378 = memref.load %arg2[%c71] : memref<98xf32, #tpu.memory_space<smem>>
    %379 = vector.extract_strided_slice %372 {offsets = [0, 0, 1], sizes = [2, 16, 16], strides = [1, 1, 1]} : vector<2x16x22xf32> to vector<2x16x16xf32>
    %380 = vector.broadcast %378 : f32 to vector<2x16x16xf32>
    %381 = arith.mulf %380, %379 : vector<2x16x16xf32>
    %382 = arith.addf %377, %381 : vector<2x16x16xf32>
    %c72 = arith.constant 72 : index
    %383 = memref.load %arg2[%c72] : memref<98xf32, #tpu.memory_space<smem>>
    %384 = vector.extract_strided_slice %372 {offsets = [0, 0, 2], sizes = [2, 16, 16], strides = [1, 1, 1]} : vector<2x16x22xf32> to vector<2x16x16xf32>
    %385 = vector.broadcast %383 : f32 to vector<2x16x16xf32>
    %386 = arith.mulf %385, %384 : vector<2x16x16xf32>
    %387 = arith.addf %382, %386 : vector<2x16x16xf32>
    %c73 = arith.constant 73 : index
    %388 = memref.load %arg2[%c73] : memref<98xf32, #tpu.memory_space<smem>>
    %389 = vector.extract_strided_slice %372 {offsets = [0, 0, 3], sizes = [2, 16, 16], strides = [1, 1, 1]} : vector<2x16x22xf32> to vector<2x16x16xf32>
    %390 = vector.broadcast %388 : f32 to vector<2x16x16xf32>
    %391 = arith.mulf %390, %389 : vector<2x16x16xf32>
    %392 = arith.addf %387, %391 : vector<2x16x16xf32>
    %c74 = arith.constant 74 : index
    %393 = memref.load %arg2[%c74] : memref<98xf32, #tpu.memory_space<smem>>
    %394 = vector.extract_strided_slice %372 {offsets = [0, 0, 4], sizes = [2, 16, 16], strides = [1, 1, 1]} : vector<2x16x22xf32> to vector<2x16x16xf32>
    %395 = vector.broadcast %393 : f32 to vector<2x16x16xf32>
    %396 = arith.mulf %395, %394 : vector<2x16x16xf32>
    %397 = arith.addf %392, %396 : vector<2x16x16xf32>
    %c75 = arith.constant 75 : index
    %398 = memref.load %arg2[%c75] : memref<98xf32, #tpu.memory_space<smem>>
    %399 = vector.extract_strided_slice %372 {offsets = [0, 0, 5], sizes = [2, 16, 16], strides = [1, 1, 1]} : vector<2x16x22xf32> to vector<2x16x16xf32>
    %400 = vector.broadcast %398 : f32 to vector<2x16x16xf32>
    %401 = arith.mulf %400, %399 : vector<2x16x16xf32>
    %402 = arith.addf %397, %401 : vector<2x16x16xf32>
    %c76 = arith.constant 76 : index
    %403 = memref.load %arg2[%c76] : memref<98xf32, #tpu.memory_space<smem>>
    %404 = vector.extract_strided_slice %372 {offsets = [0, 0, 6], sizes = [2, 16, 16], strides = [1, 1, 1]} : vector<2x16x22xf32> to vector<2x16x16xf32>
    %405 = vector.broadcast %403 : f32 to vector<2x16x16xf32>
    %406 = arith.mulf %405, %404 : vector<2x16x16xf32>
    %407 = arith.addf %402, %406 : vector<2x16x16xf32>
    %408 = vector.extract_strided_slice %263 {offsets = [0, 4, 0], sizes = [2, 16, 22], strides = [1, 1, 1]} : vector<2x22x22xf32> to vector<2x16x22xf32>
    %c77 = arith.constant 77 : index
    %409 = memref.load %arg2[%c77] : memref<98xf32, #tpu.memory_space<smem>>
    %410 = vector.extract_strided_slice %408 {offsets = [0, 0, 0], sizes = [2, 16, 16], strides = [1, 1, 1]} : vector<2x16x22xf32> to vector<2x16x16xf32>
    %411 = vector.broadcast %409 : f32 to vector<2x16x16xf32>
    %412 = arith.mulf %411, %410 : vector<2x16x16xf32>
    %413 = arith.addf %407, %412 : vector<2x16x16xf32>
    %c78 = arith.constant 78 : index
    %414 = memref.load %arg2[%c78] : memref<98xf32, #tpu.memory_space<smem>>
    %415 = vector.extract_strided_slice %408 {offsets = [0, 0, 1], sizes = [2, 16, 16], strides = [1, 1, 1]} : vector<2x16x22xf32> to vector<2x16x16xf32>
    %416 = vector.broadcast %414 : f32 to vector<2x16x16xf32>
    %417 = arith.mulf %416, %415 : vector<2x16x16xf32>
    %418 = arith.addf %413, %417 : vector<2x16x16xf32>
    %c79 = arith.constant 79 : index
    %419 = memref.load %arg2[%c79] : memref<98xf32, #tpu.memory_space<smem>>
    %420 = vector.extract_strided_slice %408 {offsets = [0, 0, 2], sizes = [2, 16, 16], strides = [1, 1, 1]} : vector<2x16x22xf32> to vector<2x16x16xf32>
    %421 = vector.broadcast %419 : f32 to vector<2x16x16xf32>
    %422 = arith.mulf %421, %420 : vector<2x16x16xf32>
    %423 = arith.addf %418, %422 : vector<2x16x16xf32>
    %c80 = arith.constant 80 : index
    %424 = memref.load %arg2[%c80] : memref<98xf32, #tpu.memory_space<smem>>
    %425 = vector.extract_strided_slice %408 {offsets = [0, 0, 3], sizes = [2, 16, 16], strides = [1, 1, 1]} : vector<2x16x22xf32> to vector<2x16x16xf32>
    %426 = vector.broadcast %424 : f32 to vector<2x16x16xf32>
    %427 = arith.mulf %426, %425 : vector<2x16x16xf32>
    %428 = arith.addf %423, %427 : vector<2x16x16xf32>
    %c81 = arith.constant 81 : index
    %429 = memref.load %arg2[%c81] : memref<98xf32, #tpu.memory_space<smem>>
    %430 = vector.extract_strided_slice %408 {offsets = [0, 0, 4], sizes = [2, 16, 16], strides = [1, 1, 1]} : vector<2x16x22xf32> to vector<2x16x16xf32>
    %431 = vector.broadcast %429 : f32 to vector<2x16x16xf32>
    %432 = arith.mulf %431, %430 : vector<2x16x16xf32>
    %433 = arith.addf %428, %432 : vector<2x16x16xf32>
    %c82 = arith.constant 82 : index
    %434 = memref.load %arg2[%c82] : memref<98xf32, #tpu.memory_space<smem>>
    %435 = vector.extract_strided_slice %408 {offsets = [0, 0, 5], sizes = [2, 16, 16], strides = [1, 1, 1]} : vector<2x16x22xf32> to vector<2x16x16xf32>
    %436 = vector.broadcast %434 : f32 to vector<2x16x16xf32>
    %437 = arith.mulf %436, %435 : vector<2x16x16xf32>
    %438 = arith.addf %433, %437 : vector<2x16x16xf32>
    %c83 = arith.constant 83 : index
    %439 = memref.load %arg2[%c83] : memref<98xf32, #tpu.memory_space<smem>>
    %440 = vector.extract_strided_slice %408 {offsets = [0, 0, 6], sizes = [2, 16, 16], strides = [1, 1, 1]} : vector<2x16x22xf32> to vector<2x16x16xf32>
    %441 = vector.broadcast %439 : f32 to vector<2x16x16xf32>
    %442 = arith.mulf %441, %440 : vector<2x16x16xf32>
    %443 = arith.addf %438, %442 : vector<2x16x16xf32>
    %444 = vector.extract_strided_slice %263 {offsets = [0, 5, 0], sizes = [2, 16, 22], strides = [1, 1, 1]} : vector<2x22x22xf32> to vector<2x16x22xf32>
    %c84 = arith.constant 84 : index
    %445 = memref.load %arg2[%c84] : memref<98xf32, #tpu.memory_space<smem>>
    %446 = vector.extract_strided_slice %444 {offsets = [0, 0, 0], sizes = [2, 16, 16], strides = [1, 1, 1]} : vector<2x16x22xf32> to vector<2x16x16xf32>
    %447 = vector.broadcast %445 : f32 to vector<2x16x16xf32>
    %448 = arith.mulf %447, %446 : vector<2x16x16xf32>
    %449 = arith.addf %443, %448 : vector<2x16x16xf32>
    %c85 = arith.constant 85 : index
    %450 = memref.load %arg2[%c85] : memref<98xf32, #tpu.memory_space<smem>>
    %451 = vector.extract_strided_slice %444 {offsets = [0, 0, 1], sizes = [2, 16, 16], strides = [1, 1, 1]} : vector<2x16x22xf32> to vector<2x16x16xf32>
    %452 = vector.broadcast %450 : f32 to vector<2x16x16xf32>
    %453 = arith.mulf %452, %451 : vector<2x16x16xf32>
    %454 = arith.addf %449, %453 : vector<2x16x16xf32>
    %c86 = arith.constant 86 : index
    %455 = memref.load %arg2[%c86] : memref<98xf32, #tpu.memory_space<smem>>
    %456 = vector.extract_strided_slice %444 {offsets = [0, 0, 2], sizes = [2, 16, 16], strides = [1, 1, 1]} : vector<2x16x22xf32> to vector<2x16x16xf32>
    %457 = vector.broadcast %455 : f32 to vector<2x16x16xf32>
    %458 = arith.mulf %457, %456 : vector<2x16x16xf32>
    %459 = arith.addf %454, %458 : vector<2x16x16xf32>
    %c87 = arith.constant 87 : index
    %460 = memref.load %arg2[%c87] : memref<98xf32, #tpu.memory_space<smem>>
    %461 = vector.extract_strided_slice %444 {offsets = [0, 0, 3], sizes = [2, 16, 16], strides = [1, 1, 1]} : vector<2x16x22xf32> to vector<2x16x16xf32>
    %462 = vector.broadcast %460 : f32 to vector<2x16x16xf32>
    %463 = arith.mulf %462, %461 : vector<2x16x16xf32>
    %464 = arith.addf %459, %463 : vector<2x16x16xf32>
    %c88 = arith.constant 88 : index
    %465 = memref.load %arg2[%c88] : memref<98xf32, #tpu.memory_space<smem>>
    %466 = vector.extract_strided_slice %444 {offsets = [0, 0, 4], sizes = [2, 16, 16], strides = [1, 1, 1]} : vector<2x16x22xf32> to vector<2x16x16xf32>
    %467 = vector.broadcast %465 : f32 to vector<2x16x16xf32>
    %468 = arith.mulf %467, %466 : vector<2x16x16xf32>
    %469 = arith.addf %464, %468 : vector<2x16x16xf32>
    %c89 = arith.constant 89 : index
    %470 = memref.load %arg2[%c89] : memref<98xf32, #tpu.memory_space<smem>>
    %471 = vector.extract_strided_slice %444 {offsets = [0, 0, 5], sizes = [2, 16, 16], strides = [1, 1, 1]} : vector<2x16x22xf32> to vector<2x16x16xf32>
    %472 = vector.broadcast %470 : f32 to vector<2x16x16xf32>
    %473 = arith.mulf %472, %471 : vector<2x16x16xf32>
    %474 = arith.addf %469, %473 : vector<2x16x16xf32>
    %c90 = arith.constant 90 : index
    %475 = memref.load %arg2[%c90] : memref<98xf32, #tpu.memory_space<smem>>
    %476 = vector.extract_strided_slice %444 {offsets = [0, 0, 6], sizes = [2, 16, 16], strides = [1, 1, 1]} : vector<2x16x22xf32> to vector<2x16x16xf32>
    %477 = vector.broadcast %475 : f32 to vector<2x16x16xf32>
    %478 = arith.mulf %477, %476 : vector<2x16x16xf32>
    %479 = arith.addf %474, %478 : vector<2x16x16xf32>
    %480 = vector.extract_strided_slice %263 {offsets = [0, 6, 0], sizes = [2, 16, 22], strides = [1, 1, 1]} : vector<2x22x22xf32> to vector<2x16x22xf32>
    %c91 = arith.constant 91 : index
    %481 = memref.load %arg2[%c91] : memref<98xf32, #tpu.memory_space<smem>>
    %482 = vector.extract_strided_slice %480 {offsets = [0, 0, 0], sizes = [2, 16, 16], strides = [1, 1, 1]} : vector<2x16x22xf32> to vector<2x16x16xf32>
    %483 = vector.broadcast %481 : f32 to vector<2x16x16xf32>
    %484 = arith.mulf %483, %482 : vector<2x16x16xf32>
    %485 = arith.addf %479, %484 : vector<2x16x16xf32>
    %c92 = arith.constant 92 : index
    %486 = memref.load %arg2[%c92] : memref<98xf32, #tpu.memory_space<smem>>
    %487 = vector.extract_strided_slice %480 {offsets = [0, 0, 1], sizes = [2, 16, 16], strides = [1, 1, 1]} : vector<2x16x22xf32> to vector<2x16x16xf32>
    %488 = vector.broadcast %486 : f32 to vector<2x16x16xf32>
    %489 = arith.mulf %488, %487 : vector<2x16x16xf32>
    %490 = arith.addf %485, %489 : vector<2x16x16xf32>
    %c93 = arith.constant 93 : index
    %491 = memref.load %arg2[%c93] : memref<98xf32, #tpu.memory_space<smem>>
    %492 = vector.extract_strided_slice %480 {offsets = [0, 0, 2], sizes = [2, 16, 16], strides = [1, 1, 1]} : vector<2x16x22xf32> to vector<2x16x16xf32>
    %493 = vector.broadcast %491 : f32 to vector<2x16x16xf32>
    %494 = arith.mulf %493, %492 : vector<2x16x16xf32>
    %495 = arith.addf %490, %494 : vector<2x16x16xf32>
    %c94 = arith.constant 94 : index
    %496 = memref.load %arg2[%c94] : memref<98xf32, #tpu.memory_space<smem>>
    %497 = vector.extract_strided_slice %480 {offsets = [0, 0, 3], sizes = [2, 16, 16], strides = [1, 1, 1]} : vector<2x16x22xf32> to vector<2x16x16xf32>
    %498 = vector.broadcast %496 : f32 to vector<2x16x16xf32>
    %499 = arith.mulf %498, %497 : vector<2x16x16xf32>
    %500 = arith.addf %495, %499 : vector<2x16x16xf32>
    %c95 = arith.constant 95 : index
    %501 = memref.load %arg2[%c95] : memref<98xf32, #tpu.memory_space<smem>>
    %502 = vector.extract_strided_slice %480 {offsets = [0, 0, 4], sizes = [2, 16, 16], strides = [1, 1, 1]} : vector<2x16x22xf32> to vector<2x16x16xf32>
    %503 = vector.broadcast %501 : f32 to vector<2x16x16xf32>
    %504 = arith.mulf %503, %502 : vector<2x16x16xf32>
    %505 = arith.addf %500, %504 : vector<2x16x16xf32>
    %c96 = arith.constant 96 : index
    %506 = memref.load %arg2[%c96] : memref<98xf32, #tpu.memory_space<smem>>
    %507 = vector.extract_strided_slice %480 {offsets = [0, 0, 5], sizes = [2, 16, 16], strides = [1, 1, 1]} : vector<2x16x22xf32> to vector<2x16x16xf32>
    %508 = vector.broadcast %506 : f32 to vector<2x16x16xf32>
    %509 = arith.mulf %508, %507 : vector<2x16x16xf32>
    %510 = arith.addf %505, %509 : vector<2x16x16xf32>
    %c97 = arith.constant 97 : index
    %511 = memref.load %arg2[%c97] : memref<98xf32, #tpu.memory_space<smem>>
    %512 = vector.extract_strided_slice %480 {offsets = [0, 0, 6], sizes = [2, 16, 16], strides = [1, 1, 1]} : vector<2x16x22xf32> to vector<2x16x16xf32>
    %513 = vector.broadcast %511 : f32 to vector<2x16x16xf32>
    %514 = arith.mulf %513, %512 : vector<2x16x16xf32>
    %515 = arith.addf %510, %514 : vector<2x16x16xf32>
    %cst_9 = arith.constant 0.000000e+00 : f32
    %516 = vector.broadcast %cst_9 : f32 to vector<2x16x16xf32>
    %517 = arith.subf %516, %515 : vector<2x16x16xf32>
    %518 = math.exp %517 : vector<2x16x16xf32>
    %cst_10 = arith.constant 1.000000e+00 : f32
    %519 = vector.broadcast %cst_10 : f32 to vector<2x16x16xf32>
    %520 = arith.addf %519, %518 : vector<2x16x16xf32>
    %cst_11 = arith.constant 1.000000e+00 : f32
    %521 = vector.broadcast %cst_11 : f32 to vector<2x16x16xf32>
    %522 = arith.divf %521, %520 : vector<2x16x16xf32>
    %523 = vector.shape_cast %522 : vector<2x16x16xf32> to vector<2x1x16x16xf32>
    %524 = vector.broadcast %523 : vector<2x1x16x16xf32> to vector<2x4x16x16xf32>
    %525 = arith.mulf %0, %524 : vector<2x4x16x16xf32>
    %c0_12 = arith.constant 0 : index
    %c0_13 = arith.constant 0 : index
    %c0_14 = arith.constant 0 : index
    %c0_15 = arith.constant 0 : index
    %526 = vector.load %arg3[%c0_12, %c0_13, %c0_14, %c0_15] : memref<2x4x16x16xf32, #tpu.memory_space<vmem>>, vector<2x4x16x16xf32>
    tpu.vector_store %arg3[%c0_12, %c0_13, %c0_14, %c0_15], %525 {strides = array<i32>} : memref<2x4x16x16xf32, #tpu.memory_space<vmem>>, vector<2x4x16x16xf32>,
    return
  }
  func.func @transform_0(%arg0: i32) -> (i32, i32, i32, i32) {
    %c0_i32 = arith.constant 0 : i32
    %c0_i32_0 = arith.constant 0 : i32
    %c0_i32_1 = arith.constant 0 : i32
    %c0_i32_2 = arith.constant 0 : i32
    return %arg0, %c0_i32, %c0_i32_0, %c0_i32_1 : i32, i32, i32, i32
  }
  func.func @transform_1(%arg0: i32) -> i32 {
    %c0_i32 = arith.constant 0 : i32
    %c0_i32_0 = arith.constant 0 : i32
    return %c0_i32 : i32
  }
  func.func @transform_2(%arg0: i32) -> (i32, i32, i32, i32) {
    %c0_i32 = arith.constant 0 : i32
    %c0_i32_0 = arith.constant 0 : i32
    %c0_i32_1 = arith.constant 0 : i32
    %c0_i32_2 = arith.constant 0 : i32
    return %arg0, %c0_i32, %c0_i32_0, %c0_i32_1 : i32, i32, i32, i32
  }
}

</mosaic_0001>

<bundles_post_ra>
// kernel: tpu_custom_call.1
= control target key start
LH: loop header
LB: loop body
LE: loop exit
PB: predicated region body
PF: predicated region fallthrough
CT: control target
= control target key end

     0   :  { %7 = vsyncpa [#allocation3], 0  ;;  %s6565_s0 = inlined_call_operand.hbm [shape: f32[2,4,16,16], index: 0, kind: input, shape index: {}]   ;;  %s6566_s1 = inlined_call_operand.vmem [shape: f32[98], index: 1, kind: input, shape index: {}]   ;;  %s6567_s2 = inlined_call_operand.hbm [shape: f32[2,4,16,16], index: 2, kind: output, shape index: {}]  }
   0x1   :  { %8 = vsyncpa [#allocation5], 0 }
   0x2   :  { %9 = vsyncpa [#allocation4], 0  ;;  %s4117_s9 = smov [#allocation2]   ;;  %s28_s13 = sshll.u32 %s6566_s1, 4  ;;  %s29_s13 = int_to_ptr.vmem [resolvable:$true] %s28_s13 }
   0x3   :  { %s15_s10 = sshll.u32 %s4117_s9, 4  ;;  %s4055_s16 = scalar_lea.hbm %s6565_s0, 2048  ;;  %s16_s10 = int_to_ptr.vmem [resolvable:$true] %s15_s10 }
   0x4   :  { %p4056_p0 = scmp.ne.s32.totalorder %s6565_s0, %s4055_s16  ;;  %p4059_p1 = scmp.lt.u32.totalorder %s4055_s16, %s6565_s0 }
   0x6   :  { %p4061_p2 = pnand %p4059_p1, %p4056_p0 }
   0x8   :  { %4064 = shalt.err (!%p4061_p2)
}
   0x9   :  { %s4065_s21 = scalar_lea.vmem %s16_s10, 2048  ;;  %p4070_p4 = scmp.lt.s32.totalorder %s16_s10, %s16_s10 }
   0xa   :  { %p4066_p3 = scmp.ne.s32.totalorder %s16_s10, %s4065_s21  ;;  %p4071_p5 = scmp.lt.s32.totalorder %s4065_s21, %s4065_s21 }
   0xc   :  { %p4072_p6 = por %p4071_p5, %p4070_p4 }
   0xe   :  { %p4073_p7 = pnand %p4072_p6, %p4066_p3 }
  0x10   :  { %4076 = shalt.err (!%p4073_p7)
}
  0x11   :  { %s4118_s1 = smov 128   ;;  %s4119_s22 = smov 8  }
  0x12   :  { %21 = dma.hbm_to_vmem [thread:$0]  %s6565_s0, 2048, %s16_s10, [#allocation3], %s4118_s1, %s4118_s1, %s4119_s22  }
  0x13   :  { %s4077_s25 = scalar_lea.vmem %s29_s13, 16  ;;  %p4082_p9 = scmp.lt.s32.totalorder %s29_s13, %s29_s13 }
  0x14   :  { %p4078_p8 = scmp.ne.s32.totalorder %s29_s13, %s4077_s25  ;;  %p4083_p10 = scmp.lt.s32.totalorder %s4077_s25, %s4077_s25 }
  0x16   :  { %p4084_p11 = por %p4083_p10, %p4082_p9 }
  0x18   :  { %p4085_p12 = pnand %p4084_p11, %p4078_p8 }
  0x1a   :  { %4088 = shalt.err (!%p4085_p12)
}
  0x1b   :  { %s4120_s26 = smov [#allocation6]  }
  0x1c   :  { %31 = dma.vmem_to_smem %s29_s13, 16, %s4120_s26, [#allocation5]  }
  0x1d   :  { %4111 = dma.done.wait [#allocation3], 2048  }
  0x1e   :  { %4112 = vsyncadd [#allocation3], 4294965248 }
  0x1f   :  { %4113 = dma.done.wait [#allocation5], 16  }
  0x20   :  { %4114 = vsyncadd [#allocation5], 4294967280 }
  0x21   :  { %38 = sfence }
  0x22   :  { %v40_v0 = vld [vmem:[#allocation2 + $0x8] sm:$0xff]  ;;  %v42_v1 = vld [vmem:[#allocation2 + $0x18] sm:$0xff]  ;;  %vm55_vm0 = vcmask 130048   ;;  %v39_v7 = vld [vmem:[#allocation2] sm:$0xff]  ;;  %vm120_vm1 = vcmask 1042432   ;;  %s4121_s0 = smov 3  }
  0x23   :  { %v44_v2 = vld [vmem:[#allocation2 + $0x28] sm:$0xff]  ;;  %v46_v3 = vld [vmem:[#allocation2 + $0x38] sm:$0xff]  ;;  %v63_v4 = vsel %vm55_vm0, %v40_v0, 0.0  ;;  %v64_v5 = vsel %vm55_vm0, %v42_v1, 0.0  ;;  %v41_v9 = vld [vmem:[#allocation2 + $0x10] sm:$0xff]  ;;  %v56_v13 = vsel %vm55_vm0, %v39_v7, 0.0 }
  0x24   :  { %v66_v6 = vsel %vm55_vm0, %v44_v2, 0.0  ;;  %v65_v8 = vadd.f32 %v64_v5, %v63_v4  ;;  %v43_v10 = vld [vmem:[#allocation2 + $0x20] sm:$0xff]  ;;  %v45_v11 = vld [vmem:[#allocation2 + $0x30] sm:$0xff]  ;;  %v68_v12 = vsel %vm55_vm0, %v46_v3, 0.0  ;;  %v57_v14 = vsel %vm55_vm0, %v41_v9, 0.0  ;;  %v48_v23 = vld [vmem:[#allocation2 + $0x48] sm:$0xff] }
  0x25   :  { %v59_v15 = vsel %vm55_vm0, %v43_v10, 0.0  ;;  %v47_v16 = vld [vmem:[#allocation2 + $0x40] sm:$0xff]  ;;  %v49_v17 = vld [vmem:[#allocation2 + $0x50] sm:$0xff]  ;;  %v58_v19 = vadd.f32 %v57_v14, %v56_v13  ;;  %v61_v24 = vsel %vm55_vm0, %v45_v11, 0.0  ;;  %v50_v27 = vld [vmem:[#allocation2 + $0x58] sm:$0xff]  ;;  %v77_v33 = vsel %vm55_vm0, %v48_v23, 0.0 }
  0x26   :  { %v67_v18 = vadd.f32 %v66_v6, %v65_v8  ;;  %v51_v20 = vld [vmem:[#allocation2 + $0x60] sm:$0xff]  ;;  %v53_v21 = vld [vmem:[#allocation2 + $0x70] sm:$0xff]  ;;  %v70_v22 = vsel %vm55_vm0, %v47_v16, 0.0  ;;  %v71_v25 = vsel %vm55_vm0, %v49_v17, 0.0  ;;  %v52_v28 = vld [vmem:[#allocation2 + $0x68] sm:$0xff]  ;;  %v78_v35 = vsel %vm55_vm0, %v50_v27, 0.0 }
  0x27   :  { %v73_v26 = vsel %vm55_vm0, %v51_v20, 0.0  ;;  %v60_v30 = vadd.f32 %v59_v15, %v58_v19  ;;  %v72_v31 = vadd.f32 %v71_v25, %v70_v22  ;;  %v54_v32 = vld [vmem:[#allocation2 + $0x78] sm:$0xff]  ;;  %v75_v34 = vsel %vm55_vm0, %v53_v21, 0.0  ;;  %s3898_s27 = sld [smem:[#allocation6 + $0x1]]  ;;  %s3899_s28 = sld [smem:[#allocation6 + $0x2]] }
  0x28   :  { %v69_v29 = vadd.f32 %v68_v12, %v67_v18  ;;  %v80_v36 = vsel %vm55_vm0, %v52_v28, 0.0  ;;  %v79_v40 = vadd.f32 %v78_v35, %v77_v33  ;;  %v82_v41 = vsel %vm55_vm0, %v54_v32, 0.0  ;;  %s4122_s29 = smov 127   ;;  %s3900_s30 = sld [smem:[#allocation6 + $0x3]] }
  0x29   :  { %v62_v38 = vadd.f32 %v61_v24, %v60_v30  ;;  %v74_v39 = vadd.f32 %v73_v26, %v72_v31  ;;  %vm157_vm2 = vcmask 23552   ;;  %vm164_vm3 = vcmask 154624   ;;  %s4123_s3 = smov 126   ;;  %s3901_s4 = sld [smem:[#allocation6 + $0x4]] }
  0x2a   :  { %v85_v37 = vmul.f32 0.25, %v69_v29  ;;  %v81_v45 = vadd.f32 %v80_v36, %v79_v40  ;;  %s4124_s5 = smov 125   ;;  %s3902_s6 = sld [smem:[#allocation6 + $0x5]]  ;;  %vm351_vm4 = vcmask 1046528   ;;  %vm624_vm5 = vcmask 1045504  }
  0x2b   :  { %v84_v43 = vmul.f32 0.25, %v62_v38  ;;  %v76_v44 = vadd.f32 %v75_v34, %v74_v39  ;;  %s4125_s7 = smov 124   ;;  %s3903_s8 = sld [smem:[#allocation6 + $0x6]]  ;;  %vm897_vm6 = vcmask 1044480   ;;  %vm1170_vm7 = vcmask 1043456  }
  0x2c   :  { %v122_v42 = vrot.slane %v85_v37, 5  ;;  %v83_v49 = vadd.f32 %v82_v41, %v81_v45  ;;  %s3905_s9 = sld [smem:[#allocation6 + $0x8]]  ;;  %s4126_s10 = smov 123   ;;  %vm1715_vm8 = vcmask 1041408  }
  0x2d   :  { %v121_v47 = vrot.slane %v84_v43, 5  ;;  %v86_v48 = vmul.f32 0.25, %v76_v44  ;;  %v182_v60 = vstv %s3898_s27  ;;  %v208_v9 = vstv %s3899_s28  ;;  %s3906_s11 = sld [smem:[#allocation6 + $0x9]]  ;;  %s4127_s12 = smov 122  }
  0x2e   :  { %v133_v46 = vsel %vm120_vm1, %v122_v42, 0.0  ;;  %v87_v52 = vmul.f32 0.25, %v83_v49  ;;  %v234_v16 = vstv %s3900_s30  ;;  %s3907_s13 = sld [smem:[#allocation6 + $0xa]]  ;;  %s3908_s14 = sld [smem:[#allocation6 + $0xb]] }
  0x2f   :  { %143 = vrot.lane.b32.xlu1 %v133_v46, %s4121_s0  ;;  %v131_v50 = vsel %vm120_vm1, 0.0, %v121_v47  ;;  %v124_v51 = vrot.slane %v86_v48, 5  ;;  %v123_v54 = vsel %vm120_vm1, %v121_v47, %v122_v42  ;;  %v260_v21 = vstv %s3901_s4  ;;  %s3909_s15 = sld [smem:[#allocation6 + $0xc]]  ;;  %s3910_s16 = sld [smem:[#allocation6 + $0xd]] }
  0x30   :  { %139 = vrot.lane.b32.xlu0 %v131_v50, %s4121_s0  ;;  %v125_v55 = vrot.slane %v87_v52, 5  ;;  %v286_v26 = vstv %s3902_s6  ;;  %s3912_s17 = sld [smem:[#allocation6 + $0xf]]  ;;  %s3913_s18 = sld [smem:[#allocation6 + $0x10]] }
  0x31   :  { %v132_v53 = vsel %vm120_vm1, 0.0, %v124_v51  ;;  %v312_v31 = vstv %s3903_s8  ;;  %s3914_s19 = sld [smem:[#allocation6 + $0x11]]  ;;  %s3915_s20 = sld [smem:[#allocation6 + $0x12]] }
  0x32   :  { %v134_v56 = vsel %vm120_vm1, %v125_v55, 0.0  ;;  %v126_v57 = vsel %vm120_vm1, %v124_v51, %v125_v55  ;;  %v371_v35 = vstv %s3905_s9  ;;  %s3916_s21 = sld [smem:[#allocation6 + $0x13]]  ;;  %s3917_s23 = sld [smem:[#allocation6 + $0x14]] }
  0x33   :  { %145 = vrot.lane.b32.xlu1 %v132_v53, %s4121_s0  ;;  %v411_v49 = vstv %s3906_s11  ;;  %s3919_s24 = sld [smem:[#allocation6 + $0x16]]  ;;  %s3920_s25 = sld [smem:[#allocation6 + $0x17]] }
  0x34   :  { %141 = vrot.lane.b32.xlu0 %v123_v54, %s4121_s0  ;;  %s3921_s26 = sld [smem:[#allocation6 + $0x18]]  ;;  %s3922_s27 = sld [smem:[#allocation6 + $0x19]] }
  0x35   :  { %s3923_s28 = sld [smem:[#allocation6 + $0x1a]]  ;;  %s3924_s30 = sld [smem:[#allocation6 + $0x1b]] }
  0x36   :  { %s3926_s4 = sld [smem:[#allocation6 + $0x1d]]  ;;  %s3927_s6 = sld [smem:[#allocation6 + $0x1e]] }
  0x37   :  { %149 = vrot.lane.b32.xlu1 %v134_v56, %s4121_s0  ;;  %s3928_s8 = sld [smem:[#allocation6 + $0x1f]]  ;;  %s3929_s9 = sld [smem:[#allocation6 + $0x20]] }
  0x38   :  { %147 = vrot.lane.b32.xlu0 %v126_v57, %s4121_s0  ;;  %s3930_s11 = sld [smem:[#allocation6 + $0x21]] }
  0xa1   :  { %v4190_v58 = vpop.permute.xlu1 %143 }
  0xa2   :  { %v140_v59 = vpop.permute.xlu0 %139  ;;  %v160_v36 = vsel %vm157_vm2, 0.0, %v4190_v58 }
  0xa3   :  { %v158_v61 = vsel %vm157_vm2, 0.0, %v140_v59  ;;  %v4256_v40 = vsel %vm164_vm3, %v160_v36, 0.0 }
  0xa4   :  { %v4194_v62 = vsel %vm164_vm3, %v158_v61, 0.0  ;;  %v374_v48 = vmul.f32 %v371_v35, %v4256_v40 }
  0xa5   :  { %v146_v63 = vpop.permute.xlu1 %145  ;;  %v183_v1 = vmul.f32 %v182_v60, %v4194_v62  ;;  %v209_v12 = vmul.f32 %v208_v9, %v4194_v62  ;;  %v235_v17 = vmul.f32 %v234_v16, %v4194_v62  ;;  %v261_v22 = vmul.f32 %v260_v21, %v4194_v62 }
  0xa6   :  { %v161_v0 = vsel %vm157_vm2, 0.0, %v146_v63  ;;  %v142_v3 = vpop.permute.xlu0 %141  ;;  %v287_v27 = vmul.f32 %v286_v26, %v4194_v62  ;;  %v313_v33 = vmul.f32 %v312_v31, %v4194_v62  ;;  %v372_v39 = vmul.f32 %v371_v35, %v4194_v62 }
  0xa7   :  { %v4199_v2 = vsel %vm164_vm3, %v161_v0, 0.0  ;;  %v159_v4 = vsel %vm157_vm2, 0.0, %v142_v3  ;;  %191 = vrot.lane.b32.xlu0 %v183_v1, %s4122_s29  ;;  %v412_v55 = vmul.f32 %v411_v49, %v4194_v62  ;;  %v387_v57 = vrot.slane %v374_v48, 1 }
  0xa8   :  { %v185_v5 = vmul.f32 %v182_v60, %v4199_v2  ;;  %v4205_v6 = vsel %vm164_vm3, %v159_v4, 0.0  ;;  %v211_v14 = vmul.f32 %v208_v9, %v4199_v2  ;;  %v237_v19 = vmul.f32 %v234_v16, %v4199_v2 }
  0xa9   :  { %v184_v7 = vmul.f32 %v182_v60, %v4205_v6  ;;  %v210_v15 = vmul.f32 %v208_v9, %v4205_v6  ;;  %v236_v20 = vmul.f32 %v234_v16, %v4205_v6  ;;  %v263_v24 = vmul.f32 %v260_v21, %v4199_v2  ;;  %v150_v32 = vpop.permute.xlu1 %149 }
  0xaa   :  { %v148_v8 = vpop.permute.xlu0 %147  ;;  %v262_v25 = vmul.f32 %v260_v21, %v4205_v6  ;;  %v289_v29 = vmul.f32 %v286_v26, %v4199_v2  ;;  %v288_v30 = vmul.f32 %v286_v26, %v4205_v6  ;;  %v373_v37 = vmul.f32 %v371_v35, %v4205_v6 }
  0xab   :  { %v162_v10 = vsel %vm157_vm2, 0.0, %v148_v8  ;;  %195 = vrot.lane.b32.xlu0 %v185_v5, %s4122_s29  ;;  %193 = vrot.lane.b32.xlu1 %v184_v7, %s4122_s29  ;;  %v163_v38 = vsel %vm157_vm2, 0.0, %v150_v32  ;;  %v315_v41 = vmul.f32 %v312_v31, %v4199_v2  ;;  %v314_v42 = vmul.f32 %v312_v31, %v4205_v6 }
  0xac   :  { %v4212_v11 = vsel %vm164_vm3, %v162_v10, 0.0  ;;  %v385_v43 = vrot.slane %v373_v37, 1  ;;  %v4262_v45 = vsel %vm164_vm3, %v163_v38, 0.0  ;;  %v384_v46 = vrot.slane %v372_v39, 1 }
  0xad   :  { %v186_v13 = vmul.f32 %v182_v60, %v4212_v11  ;;  %v212_v18 = vmul.f32 %v208_v9, %v4212_v11  ;;  %v238_v23 = vmul.f32 %v234_v16, %v4212_v11  ;;  %v264_v28 = vmul.f32 %v260_v21, %v4212_v11 }
  0xae   :  { %v290_v34 = vmul.f32 %v286_v26, %v4212_v11  ;;  %v376_v44 = vmul.f32 %v371_v35, %v4212_v11  ;;  %v375_v47 = vmul.f32 %v371_v35, %v4199_v2  ;;  %v316_v50 = vmul.f32 %v312_v31, %v4212_v11 }
  0xaf   :  { %217 = vrot.lane.b32.xlu0 %v209_v12, %s4123_s3  ;;  %197 = vrot.lane.b32.xlu1 %v186_v13, %s4122_s29  ;;  %v413_v51 = vmul.f32 %v411_v49, %v4205_v6  ;;  %v386_v52 = vsel %vm351_vm4, %v384_v46, %v385_v43  ;;  %v377_v54 = vmul.f32 %v371_v35, %v4262_v45  ;;  %v424_v0 = vrot.slane %v412_v55, 1 }
  0xb0   :  { %v390_v53 = vrot.slane %v376_v44, 1  ;;  %v389_v56 = vrot.slane %v375_v47, 1  ;;  %v388_v60 = vsel %vm351_vm4, %v385_v43, %v387_v57  ;;  %v416_v63 = vmul.f32 %v411_v49, %v4212_v11 }
  0xb1   :  { %v425_v58 = vrot.slane %v413_v51, 1  ;;  %v392_v61 = vrot.slane %v377_v54, 1  ;;  %v414_v1 = vmul.f32 %v411_v49, %v4256_v40  ;;  %v415_v3 = vmul.f32 %v411_v49, %v4199_v2 }
  0xb2   :  { %v391_v59 = vsel %vm351_vm4, %v389_v56, %v390_v53  ;;  %v451_v5 = vstv %s3907_s13  ;;  %v430_v8 = vrot.slane %v416_v63, 1  ;;  %v417_v10 = vmul.f32 %v411_v49, %v4262_v45  ;;  %s3931_s13 = sld [smem:[#allocation6 + $0x22]] }
  0xb3   :  { %221 = vrot.lane.b32.xlu0 %v211_v14, %s4123_s3  ;;  %219 = vrot.lane.b32.xlu1 %v210_v15, %s4123_s3  ;;  %v426_v4 = vsel %vm351_vm4, %v424_v0, %v425_v58  ;;  %v393_v7 = vsel %vm351_vm4, %v390_v53, %v392_v61  ;;  %v453_v9 = vmul.f32 %v451_v5, %v4205_v6  ;;  %v427_v12 = vrot.slane %v414_v1, 1 }
  0xb4   :  { %v429_v13 = vrot.slane %v415_v3, 1  ;;  %v452_v14 = vmul.f32 %v451_v5, %v4194_v62  ;;  %v455_v21 = vmul.f32 %v451_v5, %v4199_v2 }
  0xb5   :  { %v428_v15 = vsel %vm351_vm4, %v425_v58, %v427_v12 }
  0xb6   :  { %v431_v16 = vsel %vm351_vm4, %v429_v13, %v430_v8 }
  0xb7   :  { %243 = vrot.lane.b32.xlu0 %v235_v17, %s4124_s5  ;;  %223 = vrot.lane.b32.xlu1 %v212_v18, %s4123_s3  ;;  %v465_v17 = vrot.slane %v453_v9, 1  ;;  %v432_v18 = vrot.slane %v417_v10, 1 }
  0xb9   :  { %v433_v26 = vsel %vm351_vm4, %v430_v8, %v432_v18 }
  0xbb   :  { %247 = vrot.lane.b32.xlu0 %v237_v19, %s4124_s5  ;;  %245 = vrot.lane.b32.xlu1 %v236_v20, %s4124_s5  ;;  %v456_v19 = vmul.f32 %v451_v5, %v4212_v11  ;;  %v464_v20 = vrot.slane %v452_v14, 1 }
  0xbf   :  { %269 = vrot.lane.b32.xlu0 %v261_v22, %s4125_s7  ;;  %249 = vrot.lane.b32.xlu1 %v238_v23, %s4124_s5  ;;  %v454_v22 = vmul.f32 %v451_v5, %v4256_v40  ;;  %v491_v23 = vstv %s3908_s14  ;;  %s3933_s14 = sld [smem:[#allocation6 + $0x24]] }
  0xc0   :  { %v496_v36 = vmul.f32 %v491_v23, %v4212_v11  ;;  %v494_v38 = vmul.f32 %v491_v23, %v4256_v40  ;;  %v495_v39 = vmul.f32 %v491_v23, %v4199_v2  ;;  %v497_v47 = vmul.f32 %v491_v23, %v4262_v45 }
  0xc1   :  { %v467_v31 = vrot.slane %v454_v22, 1 }
  0xc2   :  { %v510_v44 = vrot.slane %v496_v36, 1  ;;  %v507_v48 = vrot.slane %v494_v38, 1  ;;  %v509_v49 = vrot.slane %v495_v39, 1  ;;  %v512_v54 = vrot.slane %v497_v47, 1 }
  0xc3   :  { %273 = vrot.lane.b32.xlu0 %v263_v24, %s4125_s7  ;;  %271 = vrot.lane.b32.xlu1 %v262_v25, %s4125_s7  ;;  %v493_v24 = vmul.f32 %v491_v23, %v4205_v6  ;;  %v466_v25 = vsel %vm351_vm4, %v464_v20, %v465_v17 }
  0xc4   :  { %v513_v63 = vsel %vm351_vm4, %v510_v44, %v512_v54 }
  0xc5   :  { %v505_v32 = vrot.slane %v493_v24, 1 }
  0xc7   :  { %295 = vrot.lane.b32.xlu0 %v287_v27, %s4126_s10  ;;  %275 = vrot.lane.b32.xlu1 %v264_v28, %s4125_s7  ;;  %v470_v27 = vrot.slane %v456_v19, 1  ;;  %v457_v28 = vmul.f32 %v451_v5, %v4262_v45  ;;  %v508_v51 = vsel %vm351_vm4, %v505_v32, %v507_v48 }
  0xc9   :  { %v472_v35 = vrot.slane %v457_v28, 1 }
  0xcb   :  { %299 = vrot.lane.b32.xlu0 %v289_v29, %s4126_s10  ;;  %297 = vrot.lane.b32.xlu1 %v288_v30, %s4126_s10  ;;  %v492_v29 = vmul.f32 %v491_v23, %v4194_v62  ;;  %v469_v30 = vrot.slane %v455_v21, 1  ;;  %v473_v43 = vsel %vm351_vm4, %v470_v27, %v472_v35 }
  0xcd   :  { %v504_v37 = vrot.slane %v492_v29, 1 }
  0xcf   :  { %321 = vrot.lane.b32.xlu0 %v313_v33, %s4127_s12  ;;  %301 = vrot.lane.b32.xlu1 %v290_v34, %s4126_s10  ;;  %v471_v33 = vsel %vm351_vm4, %v469_v30, %v470_v27  ;;  %v468_v34 = vsel %vm351_vm4, %v465_v17, %v467_v31  ;;  %v644_v17 = vstv %s3912_s17  ;;  %s3936_s17 = sld [smem:[#allocation6 + $0x27]] }
  0xd0   :  { %v646_v20 = vmul.f32 %v644_v17, %v4205_v6  ;;  %v645_v24 = vmul.f32 %v644_v17, %v4194_v62  ;;  %v649_v29 = vmul.f32 %v644_v17, %v4212_v11  ;;  %v648_v31 = vmul.f32 %v644_v17, %v4199_v2 }
  0xd1   :  { %v650_v38 = vmul.f32 %v644_v17, %v4262_v45 }
  0xd2   :  { %v658_v27 = vrot.slane %v646_v20, 2  ;;  %v657_v30 = vrot.slane %v645_v24, 2 }
  0xd3   :  { %325 = vrot.lane.b32.xlu0 %v315_v41, %s4127_s12  ;;  %323 = vrot.lane.b32.xlu1 %v314_v42, %s4127_s12  ;;  %v506_v41 = vsel %vm351_vm4, %v504_v37, %v505_v32  ;;  %v531_v42 = vstv %s3909_s15  ;;  %v647_v32 = vmul.f32 %v644_v17, %v4256_v40  ;;  %v663_v37 = vrot.slane %v649_v29, 2  ;;  %s3934_s15 = sld [smem:[#allocation6 + $0x25]] }
  0xd4   :  { %v533_v46 = vmul.f32 %v531_v42, %v4205_v6  ;;  %v536_v55 = vmul.f32 %v531_v42, %v4212_v11  ;;  %v535_v57 = vmul.f32 %v531_v42, %v4199_v2  ;;  %v534_v58 = vmul.f32 %v531_v42, %v4256_v40 }
  0xd5   :  { %v537_v1 = vmul.f32 %v531_v42, %v4262_v45  ;;  %v659_v35 = vsel %vm624_vm5, %v657_v30, %v658_v27  ;;  %v665_v47 = vrot.slane %v650_v38, 2 }
  0xd6   :  { %v545_v53 = vrot.slane %v533_v46, 1  ;;  %v550_v0 = vrot.slane %v536_v55, 1  ;;  %v547_v5 = vrot.slane %v534_v58, 1 }
  0xd7   :  { %394 = vrot.lane.b32.xlu0 %v386_v52, %s4122_s29  ;;  %327 = vrot.lane.b32.xlu1 %v316_v50, %s4127_s12  ;;  %v532_v50 = vmul.f32 %v531_v42, %v4194_v62  ;;  %v511_v52 = vsel %vm351_vm4, %v509_v49, %v510_v44  ;;  %v552_v10 = vrot.slane %v537_v1, 1  ;;  %v660_v42 = vrot.slane %v647_v32, 2 }
  0xd8   :  { %v548_v9 = vsel %vm351_vm4, %v545_v53, %v547_v5  ;;  %v666_v54 = vsel %vm624_vm5, %v663_v37, %v665_v47 }
  0xd9   :  { %v544_v56 = vrot.slane %v532_v50, 1  ;;  %v553_v18 = vsel %vm351_vm4, %v550_v0, %v552_v10  ;;  %v661_v46 = vsel %vm624_vm5, %v658_v27, %v660_v42  ;;  %v804_v27 = vstv %s3916_s21  ;;  %s3941_s21 = sld [smem:[#allocation6 + $0x2c]] }
  0xda   :  { %v806_v30 = vmul.f32 %v804_v27, %v4205_v6 }
  0xdb   :  { %398 = vrot.lane.b32.xlu0 %v391_v59, %s4122_s29  ;;  %396 = vrot.lane.b32.xlu1 %v388_v60, %s4122_s29  ;;  %v571_v59 = vstv %s3910_s16  ;;  %v546_v61 = vsel %vm351_vm4, %v544_v56, %v545_v53  ;;  %v724_v53 = vstv %s3914_s19  ;;  %s3935_s16 = sld [smem:[#allocation6 + $0x26]]  ;;  %s3938_s19 = sld [smem:[#allocation6 + $0x29]] }
  0xdc   :  { %v573_v60 = vmul.f32 %v571_v59, %v4205_v6  ;;  %v572_v3 = vmul.f32 %v571_v59, %v4194_v62  ;;  %v576_v12 = vmul.f32 %v571_v59, %v4212_v11  ;;  %v574_v14 = vmul.f32 %v571_v59, %v4256_v40 }
  0xdd   :  { %v577_v21 = vmul.f32 %v571_v59, %v4262_v45  ;;  %v726_v56 = vmul.f32 %v724_v53, %v4205_v6 }
  0xde   :  { %v584_v13 = vrot.slane %v572_v3, 1  ;;  %v590_v19 = vrot.slane %v576_v12, 1  ;;  %v587_v22 = vrot.slane %v574_v14, 1  ;;  %v730_v14 = vmul.f32 %v724_v53, %v4262_v45 }
  0xdf   :  { %434 = vrot.lane.b32.xlu0 %v426_v4, %s4123_s3  ;;  %400 = vrot.lane.b32.xlu1 %v393_v7, %s4122_s29  ;;  %v549_v4 = vrot.slane %v535_v57, 1  ;;  %v585_v7 = vrot.slane %v573_v60, 1  ;;  %v592_v28 = vrot.slane %v577_v21, 1  ;;  %v725_v60 = vmul.f32 %v724_v53, %v4194_v62 }
  0xe0   :  { %v738_v1 = vrot.slane %v726_v56, 2 }
  0xe1   :  { %v551_v8 = vsel %vm351_vm4, %v549_v4, %v550_v0  ;;  %v593_v36 = vsel %vm351_vm4, %v590_v19, %v592_v28  ;;  %v728_v4 = vmul.f32 %v724_v53, %v4199_v2  ;;  %v737_v5 = vrot.slane %v725_v60, 2 }
  0xe3   :  { %438 = vrot.lane.b32.xlu0 %v431_v16, %s4123_s3  ;;  %436 = vrot.lane.b32.xlu1 %v428_v15, %s4123_s3  ;;  %v575_v15 = vmul.f32 %v571_v59, %v4199_v2  ;;  %v586_v16 = vsel %vm351_vm4, %v584_v13, %v585_v7  ;;  %v739_v10 = vsel %vm624_vm5, %v737_v5, %v738_v1 }
  0xe5   :  { %v589_v23 = vrot.slane %v575_v15, 1  ;;  %v742_v15 = vrot.slane %v728_v4, 2 }
  0xe7   :  { %474 = vrot.lane.b32.xlu0 %v466_v25, %s4124_s5  ;;  %440 = vrot.lane.b32.xlu1 %v433_v26, %s4123_s3  ;;  %v588_v25 = vsel %vm351_vm4, %v585_v7, %v587_v22  ;;  %v591_v26 = vsel %vm351_vm4, %v589_v23, %v590_v19  ;;  %v727_v7 = vmul.f32 %v724_v53, %v4256_v40  ;;  %v745_v22 = vrot.slane %v730_v14, 2 }
  0xe8   :  { %v917_v14 = vstv %s3919_s24  ;;  %s3943_s24 = sld [smem:[#allocation6 + $0x2e]] }
  0xeb   :  { %478 = vrot.lane.b32.xlu0 %v471_v33, %s4124_s5  ;;  %476 = vrot.lane.b32.xlu1 %v468_v34, %s4124_s5  ;;  %v684_v33 = vstv %s3913_s18  ;;  %s3937_s18 = sld [smem:[#allocation6 + $0x28]] }
  0xec   :  { %v686_v34 = vmul.f32 %v684_v33, %v4205_v6  ;;  %v685_v39 = vmul.f32 %v684_v33, %v4194_v62  ;;  %v689_v48 = vmul.f32 %v684_v33, %v4212_v11  ;;  %v688_v50 = vmul.f32 %v684_v33, %v4199_v2 }
  0xed   :  { %v690_v57 = vmul.f32 %v684_v33, %v4262_v45 }
  0xee   :  { %v697_v49 = vrot.slane %v685_v39, 2  ;;  %v703_v55 = vrot.slane %v689_v48, 2  ;;  %v702_v58 = vrot.slane %v688_v50, 2  ;;  %v808_v48 = vmul.f32 %v804_v27, %v4199_v2 }
  0xef   :  { %514 = vrot.lane.b32.xlu0 %v506_v41, %s4125_s7  ;;  %480 = vrot.lane.b32.xlu1 %v473_v43, %s4124_s5  ;;  %v662_v41 = vrot.slane %v648_v31, 2  ;;  %v698_v43 = vrot.slane %v686_v34, 2  ;;  %v705_v3 = vrot.slane %v690_v57, 2  ;;  %v810_v57 = vmul.f32 %v804_v27, %v4262_v45 }
  0xf1   :  { %v664_v44 = vsel %vm624_vm5, %v662_v41, %v663_v37  ;;  %v706_v12 = vsel %vm624_vm5, %v703_v55, %v705_v3  ;;  %v818_v41 = vrot.slane %v806_v30, 2  ;;  %v825_v5 = vrot.slane %v810_v57, 2 }
  0xf3   :  { %518 = vrot.lane.b32.xlu0 %v511_v52, %s4125_s7  ;;  %516 = vrot.lane.b32.xlu1 %v508_v51, %s4125_s7  ;;  %v687_v51 = vmul.f32 %v684_v33, %v4256_v40  ;;  %v699_v52 = vsel %vm624_vm5, %v697_v49, %v698_v43  ;;  %v807_v49 = vmul.f32 %v804_v27, %v4256_v40 }
  0xf5   :  { %v700_v59 = vrot.slane %v687_v51, 2 }
  0xf7   :  { %554 = vrot.lane.b32.xlu0 %v546_v61, %s4126_s10  ;;  %520 = vrot.lane.b32.xlu1 %v513_v63, %s4125_s7  ;;  %v729_v61 = vmul.f32 %v724_v53, %v4212_v11  ;;  %v704_v63 = vsel %vm624_vm5, %v702_v58, %v703_v55  ;;  %v701_v0 = vsel %vm624_vm5, %v698_v43, %v700_v59  ;;  %v844_v53 = vstv %s3917_s23  ;;  %s3942_s23 = sld [smem:[#allocation6 + $0x2d]] }
  0xf8   :  { %v846_v56 = vmul.f32 %v844_v53, %v4205_v6  ;;  %v822_v58 = vrot.slane %v808_v48, 2  ;;  %v820_v59 = vrot.slane %v807_v49, 2  ;;  %v845_v60 = vmul.f32 %v844_v53, %v4194_v62 }
  0xfa   :  { %v821_v3 = vsel %vm624_vm5, %v818_v41, %v820_v59  ;;  %v858_v4 = vrot.slane %v846_v56, 2 }
  0xfb   :  { %558 = vrot.lane.b32.xlu0 %v551_v8, %s4126_s10  ;;  %556 = vrot.lane.b32.xlu1 %v548_v9, %s4126_s10  ;;  %v743_v8 = vrot.slane %v729_v61, 2  ;;  %v764_v9 = vstv %s3915_s20  ;;  %s3940_s20 = sld [smem:[#allocation6 + $0x2b]] }
  0xfc   :  { %v766_v13 = vmul.f32 %v764_v9, %v4205_v6  ;;  %v765_v17 = vmul.f32 %v764_v9, %v4194_v62  ;;  %v769_v23 = vmul.f32 %v764_v9, %v4212_v11  ;;  %v770_v34 = vmul.f32 %v764_v9, %v4262_v45 }
  0xfd   :  { %v744_v19 = vsel %vm624_vm5, %v742_v15, %v743_v8  ;;  %v746_v32 = vsel %vm624_vm5, %v743_v8, %v745_v22  ;;  %v857_v8 = vrot.slane %v845_v60, 2  ;;  %v918_v22 = vmul.f32 %v917_v14, %v4194_v62 }
  0xfe   :  { %v778_v21 = vrot.slane %v766_v13, 2  ;;  %v777_v24 = vrot.slane %v765_v17, 2  ;;  %v783_v33 = vrot.slane %v769_v23, 2  ;;  %v919_v17 = vmul.f32 %v917_v14, %v4205_v6 }
  0xff   :  { %594 = vrot.lane.b32.xlu0 %v586_v16, %s4127_s12  ;;  %560 = vrot.lane.b32.xlu1 %v553_v18, %s4126_s10  ;;  %v740_v16 = vrot.slane %v727_v7, 2  ;;  %v848_v7 = vmul.f32 %v844_v53, %v4199_v2  ;;  %v859_v15 = vsel %vm624_vm5, %v857_v8, %v858_v4 }
 0x100   :  { %v779_v31 = vsel %vm624_vm5, %v777_v24, %v778_v21 }
 0x101   :  { %v741_v20 = vsel %vm624_vm5, %v738_v1, %v740_v16 }
 0x103   :  { %598 = vrot.lane.b32.xlu0 %v591_v26, %s4127_s12  ;;  %596 = vrot.lane.b32.xlu1 %v588_v25, %s4127_s12  ;;  %v768_v25 = vmul.f32 %v764_v9, %v4199_v2  ;;  %v767_v26 = vmul.f32 %v764_v9, %v4256_v40  ;;  %v847_v9 = vmul.f32 %v844_v53, %v4256_v40 }
 0x105   :  { %v780_v37 = vrot.slane %v767_v26, 2 }
 0x107   :  { %667 = vrot.lane.b32.xlu0 %v659_v35, %s4122_s29  ;;  %600 = vrot.lane.b32.xlu1 %v593_v36, %s4127_s12  ;;  %v805_v35 = vmul.f32 %v804_v27, %v4194_v62  ;;  %v782_v36 = vrot.slane %v768_v25, 2  ;;  %v781_v43 = vsel %vm624_vm5, %v778_v21, %v780_v37  ;;  %v860_v21 = vrot.slane %v847_v9, 2 }
 0x109   :  { %v784_v42 = vsel %vm624_vm5, %v782_v36, %v783_v33  ;;  %v817_v47 = vrot.slane %v805_v35, 2  ;;  %v861_v26 = vsel %vm624_vm5, %v858_v4, %v860_v21  ;;  %v957_v35 = vstv %s3920_s25  ;;  %s3944_s25 = sld [smem:[#allocation6 + $0x2f]] }
 0x10a   :  { %v961_v60 = vmul.f32 %v957_v35, %v4199_v2 }
 0x10b   :  { %671 = vrot.lane.b32.xlu0 %v664_v44, %s4122_s29  ;;  %669 = vrot.lane.b32.xlu1 %v661_v46, %s4122_s29  ;;  %v785_v44 = vrot.slane %v770_v34, 2  ;;  %v809_v46 = vmul.f32 %v804_v27, %v4212_v11  ;;  %v931_v27 = vrot.slane %v919_v17, 3  ;;  %v920_v34 = vmul.f32 %v917_v14, %v4256_v40 }
 0x10d   :  { %v823_v55 = vrot.slane %v809_v46, 2  ;;  %v923_v46 = vmul.f32 %v917_v14, %v4262_v45  ;;  %v933_v49 = vrot.slane %v920_v34, 3 }
 0x10f   :  { %707 = vrot.lane.b32.xlu0 %v699_v52, %s4123_s3  ;;  %673 = vrot.lane.b32.xlu1 %v666_v54, %s4122_s29  ;;  %v819_v52 = vsel %vm624_vm5, %v817_v47, %v818_v41  ;;  %v786_v54 = vsel %vm624_vm5, %v783_v33, %v785_v44  ;;  %v824_v1 = vsel %vm624_vm5, %v822_v58, %v823_v55  ;;  %v938_v57 = vrot.slane %v923_v46, 3 }
 0x110   :  { %v826_v16 = vsel %vm624_vm5, %v823_v55, %v825_v5  ;;  %v921_v33 = vmul.f32 %v917_v14, %v4199_v2  ;;  %v959_v41 = vmul.f32 %v957_v35, %v4205_v6  ;;  %v958_v47 = vmul.f32 %v957_v35, %v4194_v62 }
 0x111   :  { %v934_v56 = vsel %vm897_vm6, %v931_v27, %v933_v49  ;;  %v962_v58 = vmul.f32 %v957_v35, %v4212_v11  ;;  %v997_v5 = vstv %s3921_s26  ;;  %s4924_s26 = sld [smem:[#allocation6 + $0x30]] }
 0x112   :  { %v935_v48 = vrot.slane %v921_v33, 3  ;;  %v970_v59 = vrot.slane %v958_v47, 3  ;;  %v999_v9 = vmul.f32 %v997_v5, %v4205_v6 }
 0x113   :  { %711 = vrot.lane.b32.xlu0 %v704_v63, %s4123_s3  ;;  %709 = vrot.lane.b32.xlu1 %v701_v0, %s4123_s3  ;;  %v849_v0 = vmul.f32 %v844_v53, %v4212_v11  ;;  %v976_v8 = vrot.slane %v962_v58, 3 }
 0x115   :  { %v863_v13 = vrot.slane %v849_v0, 2  ;;  %v960_v0 = vmul.f32 %v957_v35, %v4256_v40 }
 0x117   :  { %747 = vrot.lane.b32.xlu0 %v739_v10, %s4124_s5  ;;  %713 = vrot.lane.b32.xlu1 %v706_v12, %s4123_s3 }
 0x119   :  { %v4387_v18 = vpop.permute.xlu0 %191 }
 0x11b   :  { %751 = vrot.lane.b32.xlu0 %v744_v19, %s4124_s5  ;;  %749 = vrot.lane.b32.xlu1 %v741_v20, %s4124_s5  ;;  %v850_v19 = vmul.f32 %v844_v53, %v4262_v45  ;;  %v862_v20 = vrot.slane %v848_v7, 2 }
 0x11d   :  { %v4396_v28 = vpop.permute.xlu1 %193  ;;  %v4398_v29 = vpop.permute.xlu0 %195  ;;  %v864_v25 = vsel %vm624_vm5, %v862_v20, %v863_v13  ;;  %v865_v30 = vrot.slane %v850_v19, 2  ;;  %v1002_v20 = vmul.f32 %v997_v5, %v4212_v11 }
 0x11f   :  { %787 = vrot.lane.b32.xlu0 %v779_v31, %s4125_s7  ;;  %753 = vrot.lane.b32.xlu1 %v746_v32, %s4124_s5  ;;  %v922_v31 = vmul.f32 %v917_v14, %v4212_v11  ;;  %v930_v32 = vrot.slane %v918_v22, 3  ;;  %v975_v14 = vrot.slane %v961_v60, 3  ;;  %v1016_v34 = vrot.slane %v1002_v20, 3 }
 0x121   :  { %v4407_v38 = vpop.permute.xlu1 %197  ;;  %v4409_v39 = vpop.permute.xlu0 %217  ;;  %v936_v44 = vrot.slane %v922_v31, 3  ;;  %v977_v21 = vsel %vm897_vm6, %v975_v14, %v976_v8  ;;  %v1000_v31 = vmul.f32 %v997_v5, %v4256_v40 }
 0x123   :  { %791 = vrot.lane.b32.xlu0 %v784_v42, %s4125_s7  ;;  %789 = vrot.lane.b32.xlu1 %v781_v43, %s4125_s7  ;;  %v932_v42 = vsel %vm897_vm6, %v930_v32, %v931_v27  ;;  %v866_v43 = vsel %vm624_vm5, %v863_v13, %v865_v30  ;;  %v937_v55 = vsel %vm897_vm6, %v935_v48, %v936_v44  ;;  %v1013_v47 = vrot.slane %v1000_v31, 3 }
 0x124   :  { %v939_v7 = vsel %vm897_vm6, %v936_v44, %v938_v57  ;;  %v963_v13 = vmul.f32 %v957_v35, %v4262_v45  ;;  %v1001_v27 = vmul.f32 %v997_v5, %v4199_v2  ;;  %v1037_v35 = vstv %s3922_s27  ;;  %s3948_s27 = sld [smem:[#allocation6 + $0x33]] }
 0x125   :  { %v4418_v50 = vpop.permute.xlu1 %219  ;;  %v4420_v51 = vpop.permute.xlu0 %221  ;;  %v1003_v44 = vmul.f32 %v997_v5, %v4262_v45  ;;  %v1038_v48 = vmul.f32 %v1037_v35, %v4194_v62 }
 0x126   :  { %v1015_v46 = vrot.slane %v1001_v27, 3 }
 0x127   :  { %827 = vrot.lane.b32.xlu0 %v819_v52, %s4126_s10  ;;  %793 = vrot.lane.b32.xlu1 %v786_v54, %s4125_s7  ;;  %v971_v54 = vrot.slane %v959_v41, 3  ;;  %v1018_v58 = vrot.slane %v1003_v44, 3  ;;  %v1050_v60 = vrot.slane %v1038_v48, 3  ;;  %v1117_v48 = vstv %s3924_s30  ;;  %s3950_s30 = sld [smem:[#allocation6 + $0x35]] }
 0x129   :  { %v4429_v61 = vpop.permute.xlu1 %223  ;;  %v4431_v63 = vpop.permute.xlu0 %243  ;;  %v972_v4 = vsel %vm897_vm6, %v970_v59, %v971_v54  ;;  %v1042_v59 = vmul.f32 %v1037_v35, %v4212_v11  ;;  %v1019_v14 = vsel %vm897_vm6, %v1016_v34, %v1018_v58 }
 0x12b   :  { %831 = vrot.lane.b32.xlu0 %v824_v1, %s4126_s10  ;;  %829 = vrot.lane.b32.xlu1 %v821_v3, %s4126_s10 }
 0x12d   :  { %v4440_v10 = vpop.permute.xlu1 %245  ;;  %v4442_v12 = vpop.permute.xlu0 %247 }
 0x12f   :  { %867 = vrot.lane.b32.xlu0 %v859_v15, %s4127_s12  ;;  %833 = vrot.lane.b32.xlu1 %v826_v16, %s4126_s10  ;;  %v973_v15 = vrot.slane %v960_v0, 3  ;;  %v998_v16 = vmul.f32 %v997_v5, %v4194_v62  ;;  %v1041_v0 = vmul.f32 %v1037_v35, %v4199_v2  ;;  %v1077_v5 = vstv %s3923_s28  ;;  %s3949_s28 = sld [smem:[#allocation6 + $0x34]] }
 0x130   :  { %v1078_v20 = vmul.f32 %v1077_v5, %v4194_v62  ;;  %v1083_v58 = vmul.f32 %v1077_v5, %v4262_v45 }
 0x131   :  { %v4451_v23 = vpop.permute.xlu1 %249  ;;  %v4453_v24 = vpop.permute.xlu0 %269  ;;  %v974_v22 = vsel %vm897_vm6, %v971_v54, %v973_v15  ;;  %v1010_v30 = vrot.slane %v998_v16, 3  ;;  %v1056_v15 = vrot.slane %v1042_v59, 3  ;;  %v1043_v16 = vmul.f32 %v1037_v35, %v4262_v45 }
 0x133   :  { %871 = vrot.lane.b32.xlu0 %v864_v25, %s4127_s12  ;;  %869 = vrot.lane.b32.xlu1 %v861_v26, %s4127_s12  ;;  %v1011_v25 = vrot.slane %v999_v9, 3  ;;  %v978_v26 = vrot.slane %v963_v13, 3  ;;  %v1079_v9 = vmul.f32 %v1077_v5, %v4205_v6 }
 0x135   :  { %v4462_v36 = vpop.permute.xlu1 %271  ;;  %v4464_v37 = vpop.permute.xlu0 %273  ;;  %v1012_v41 = vsel %vm897_vm6, %v1010_v30, %v1011_v25  ;;  %v1091_v27 = vrot.slane %v1079_v9, 3 }
 0x137   :  { %940 = vrot.lane.b32.xlu0 %v932_v42, %s4122_s29  ;;  %873 = vrot.lane.b32.xlu1 %v866_v43, %s4127_s12  ;;  %v979_v42 = vsel %vm897_vm6, %v976_v8, %v978_v26  ;;  %v1039_v43 = vmul.f32 %v1037_v35, %v4205_v6 }
 0x139   :  { %v4473_v52 = vpop.permute.xlu1 %275  ;;  %v4475_v53 = vpop.permute.xlu0 %295  ;;  %v1051_v57 = vrot.slane %v1039_v43, 3  ;;  %v1080_v43 = vmul.f32 %v1077_v5, %v4256_v40 }
 0x13b   :  { %944 = vrot.lane.b32.xlu0 %v937_v55, %s4122_s29  ;;  %942 = vrot.lane.b32.xlu1 %v934_v56, %s4122_s29  ;;  %v1017_v55 = vsel %vm897_vm6, %v1015_v46, %v1016_v34  ;;  %v1014_v56 = vsel %vm897_vm6, %v1011_v25, %v1013_v47  ;;  %v1052_v13 = vsel %vm897_vm6, %v1050_v60, %v1051_v57  ;;  %v1058_v34 = vrot.slane %v1043_v16, 3 }
 0x13c   :  { %v1093_v60 = vrot.slane %v1080_v43, 3  ;;  %v1123_v43 = vmul.f32 %v1117_v48, %v4262_v45 }
 0x13d   :  { %v4484_v1 = vpop.permute.xlu1 %297  ;;  %v4486_v3 = vpop.permute.xlu0 %299 }
 0x13f   :  { %980 = vrot.lane.b32.xlu0 %v972_v4, %s4123_s3  ;;  %946 = vrot.lane.b32.xlu1 %v939_v7, %s4122_s29  ;;  %v1040_v4 = vmul.f32 %v1037_v35, %v4256_v40  ;;  %v1082_v35 = vmul.f32 %v1077_v5, %v4212_v11 }
 0x141   :  { %v4495_v17 = vpop.permute.xlu1 %301  ;;  %v4497_v19 = vpop.permute.xlu0 %321 }
 0x143   :  { %984 = vrot.lane.b32.xlu0 %v977_v21, %s4123_s3  ;;  %982 = vrot.lane.b32.xlu1 %v974_v22, %s4123_s3  ;;  %v1055_v21 = vrot.slane %v1041_v0, 3  ;;  %v1053_v22 = vrot.slane %v1040_v4, 3  ;;  %v1118_v0 = vmul.f32 %v1117_v48, %v4194_v62 }
 0x145   :  { %v4506_v32 = vpop.permute.xlu1 %323  ;;  %v4508_v33 = vpop.permute.xlu0 %325  ;;  %v1057_v30 = vsel %vm897_vm6, %v1055_v21, %v1056_v15  ;;  %v1054_v31 = vsel %vm897_vm6, %v1051_v57, %v1053_v22  ;;  %v1119_v57 = vmul.f32 %v1117_v48, %v4205_v6  ;;  %v1130_v21 = vrot.slane %v1118_v0, 3 }
 0x146   :  { %v1120_v22 = vmul.f32 %v1117_v48, %v4256_v40 }
 0x147   :  { %1020 = vrot.lane.b32.xlu0 %v1012_v41, %s4124_s5  ;;  %986 = vrot.lane.b32.xlu1 %v979_v42, %s4123_s3  ;;  %v1090_v41 = vrot.slane %v1078_v20, 3  ;;  %v1081_v42 = vmul.f32 %v1077_v5, %v4199_v2  ;;  %v1131_v16 = vrot.slane %v1119_v57, 3  ;;  %v1098_v5 = vrot.slane %v1083_v58, 3 }
 0x148   :  { %v1121_v20 = vmul.f32 %v1117_v48, %v4199_v2 }
 0x149   :  { %v4517_v49 = vpop.permute.xlu1 %327  ;;  %v4519_v54 = vpop.permute.xlu0 %394  ;;  %v1092_v47 = vsel %vm897_vm6, %v1090_v41, %v1091_v27  ;;  %v1095_v59 = vrot.slane %v1081_v42, 3 }
 0x14b   :  { %1024 = vrot.lane.b32.xlu0 %v1017_v55, %s4124_s5  ;;  %1022 = vrot.lane.b32.xlu1 %v1014_v56, %s4124_s5  ;;  %v1059_v55 = vsel %vm897_vm6, %v1056_v15, %v1058_v34  ;;  %v1096_v56 = vrot.slane %v1082_v35, 3  ;;  %v1094_v15 = vsel %vm897_vm6, %v1091_v27, %v1093_v60  ;;  %v1190_v35 = vstv %s3926_s4  ;;  %s3904_s4 = sld [smem:[#allocation6 + $0x7]] }
 0x14c   :  { %v1132_v27 = vsel %vm897_vm6, %v1130_v21, %v1131_v16  ;;  %v1192_v42 = vmul.f32 %v1190_v35, %v4205_v6  ;;  %v1191_v57 = vmul.f32 %v1190_v35, %v4194_v62 }
 0x14d   :  { %v4528_v7 = vpop.permute.xlu1 %396  ;;  %v4530_v8 = vpop.permute.xlu0 %398  ;;  %v1099_v41 = vsel %vm897_vm6, %v1096_v56, %v1098_v5  ;;  %v1194_v5 = vmul.f32 %v1190_v35, %v4199_v2 }
 0x14e   :  { %v1204_v0 = vrot.slane %v1192_v42, 4 }
 0x14f   :  { %1060 = vrot.lane.b32.xlu0 %v1052_v13, %s4125_s7  ;;  %1026 = vrot.lane.b32.xlu1 %v1019_v14, %s4124_s5  ;;  %v1122_v13 = vmul.f32 %v1117_v48, %v4212_v11  ;;  %v1097_v14 = vsel %vm897_vm6, %v1095_v59, %v1096_v56  ;;  %v1195_v48 = vmul.f32 %v1190_v35, %v4212_v11 }
 0x151   :  { %v4539_v25 = vpop.permute.xlu1 %400  ;;  %v4541_v26 = vpop.permute.xlu0 %434  ;;  %v1136_v34 = vrot.slane %v1122_v13, 3  ;;  %v1138_v13 = vrot.slane %v1123_v43, 3  ;;  %v1209_v42 = vrot.slane %v1195_v48, 4 }
 0x153   :  { %1064 = vrot.lane.b32.xlu0 %v1057_v30, %s4125_s7  ;;  %1062 = vrot.lane.b32.xlu1 %v1054_v31, %s4125_s7 }
 0x155   :  { %v4550_v44 = vpop.permute.xlu1 %436  ;;  %v4552_v46 = vpop.permute.xlu0 %438 }
 0x156   :  { %6568 = vst [vmem:[#allocation11_spill] sm:$0xff] %v4550_v44  ;;  %6569 = vst [vmem:[#allocation12_spill] sm:$0xff] %v4552_v46  ;;  %v4035_v46 = vld [vmem:[#allocation2 + $0x60] sm:$0xff] }
 0x157   :  { %1100 = vrot.lane.b32.xlu0 %v1092_v47, %s4126_s10  ;;  %1066 = vrot.lane.b32.xlu1 %v1059_v55, %s4125_s7  ;;  %v1135_v47 = vrot.slane %v1121_v20, 3  ;;  %v1133_v55 = vrot.slane %v1120_v22, 3  ;;  %v1230_v22 = vstv %s3927_s6  ;;  %s171_s6 = sld [smem:[#allocation6]] }
 0x158   :  { %v1232_v43 = vmul.f32 %v1230_v22, %v4205_v6  ;;  %v1235_v48 = vmul.f32 %v1230_v22, %v4212_v11 }
 0x159   :  { %v4561_v4 = vpop.permute.xlu1 %440  ;;  %v4563_v9 = vpop.permute.xlu0 %474  ;;  %v1137_v60 = vsel %vm897_vm6, %v1135_v47, %v1136_v34  ;;  %v1134_v56 = vsel %vm897_vm6, %v1131_v16, %v1133_v55  ;;  %v1196_v16 = vmul.f32 %v1190_v35, %v4262_v45  ;;  %v1208_v55 = vrot.slane %v1194_v5, 4 }
 0x15a   :  { %6570 = vst [vmem:[#allocation13_spill] sm:$0xff] %v4561_v4  ;;  %6571 = vst [vmem:[#allocation14_spill] sm:$0xff] %v4563_v9  ;;  %v4032_v9 = vld [vmem:[#allocation2 + $0x48] sm:$0xff]  ;;  %v4034_v4 = vld [vmem:[#allocation2 + $0x38] sm:$0xff] }
 0x15b   :  { %1104 = vrot.lane.b32.xlu0 %v1097_v14, %s4126_s10  ;;  %1102 = vrot.lane.b32.xlu1 %v1094_v15, %s4126_s10  ;;  %v1203_v14 = vrot.slane %v1191_v57, 4  ;;  %v1193_v15 = vmul.f32 %v1190_v35, %v4256_v40  ;;  %v1231_v57 = vmul.f32 %v1230_v22, %v4194_v62 }
 0x15d   :  { %v4572_v30 = vpop.permute.xlu1 %476  ;;  %v4574_v31 = vpop.permute.xlu0 %478  ;;  %v1206_v47 = vrot.slane %v1193_v15, 4  ;;  %v1233_v15 = vmul.f32 %v1230_v22, %v4256_v40  ;;  %v1243_v5 = vrot.slane %v1231_v57, 4 }
 0x15e   :  { %6572 = vst [vmem:[#allocation15_spill] sm:$0xff] %v4572_v30  ;;  %6573 = vst [vmem:[#allocation16_spill] sm:$0xff] %v4574_v31  ;;  %v4030_v30 = vld [vmem:[#allocation2 + $0x40] sm:$0xff] }
 0x15f   :  { %1140 = vrot.lane.b32.xlu0 %v1132_v27, %s4127_s12  ;;  %1106 = vrot.lane.b32.xlu1 %v1099_v41, %s4126_s10  ;;  %v1205_v27 = vsel %vm1170_vm7, %v1203_v14, %v1204_v0  ;;  %v1139_v41 = vsel %vm897_vm6, %v1136_v34, %v1138_v13  ;;  %v1207_v14 = vsel %vm1170_vm7, %v1204_v0, %v1206_v47  ;;  %v1244_v13 = vrot.slane %v1232_v43, 4 }
 0x160   :  { %v1210_v34 = vsel %vm1170_vm7, %v1208_v55, %v1209_v42  ;;  %v1249_v47 = vrot.slane %v1235_v48, 4  ;;  %v1236_v55 = vmul.f32 %v1230_v22, %v4262_v45  ;;  %v1246_v57 = vrot.slane %v1233_v15, 4 }
 0x161   :  { %v4583_v58 = vpop.permute.xlu1 %480  ;;  %v4585_v59 = vpop.permute.xlu0 %514  ;;  %v1245_v43 = vsel %vm1170_vm7, %v1243_v5, %v1244_v13 }
 0x162   :  { %6574 = vst [vmem:[#allocation17_spill] sm:$0xff] %v4583_v58  ;;  %6575 = vst [vmem:[#allocation18_spill] sm:$0xff] %v4585_v59  ;;  %v1251_v5 = vrot.slane %v1236_v55, 4  ;;  %v4026_v59 = vld [vmem:[#allocation2 + $0x18] sm:$0xff] }
 0x163   :  { %1144 = vrot.lane.b32.xlu0 %v1137_v60, %s4127_s12  ;;  %1142 = vrot.lane.b32.xlu1 %v1134_v56, %s4127_s12  ;;  %v1211_v56 = vrot.slane %v1196_v16, 4  ;;  %v1270_v16 = vstv %s3928_s8  ;;  %s3911_s8 = sld [smem:[#allocation6 + $0xe]] }
 0x164   :  { %v1252_v55 = vsel %vm1170_vm7, %v1249_v47, %v1251_v5 }
 0x165   :  { %v4594_v20 = vpop.permute.xlu1 %516  ;;  %v4596_v21 = vpop.permute.xlu0 %518  ;;  %v1212_v0 = vsel %vm1170_vm7, %v1209_v42, %v1211_v56  ;;  %v1247_v56 = vsel %vm1170_vm7, %v1244_v13, %v1246_v57  ;;  %v1276_v13 = vmul.f32 %v1270_v16, %v4262_v45  ;;  %v1310_v57 = vstv %s3929_s9  ;;  %s3951_s9 = sld [smem:[#allocation6 + $0x36]] }
 0x166   :  { %6576 = vst [vmem:[#allocation19_spill] sm:$0xff] %v4594_v20  ;;  %6577 = vst [vmem:[#allocation20_spill] sm:$0xff] %v4596_v21  ;;  %v1935_v20 = vstv %s4924_s26  ;;  %s5545_s26 = sld [smem:[#allocation6 + $0x23]] }
 0x167   :  { %1213 = vrot.lane.b32.xlu0 %v1205_v27, %s4122_s29  ;;  %1146 = vrot.lane.b32.xlu1 %v1139_v41, %s4127_s12  ;;  %v1234_v27 = vmul.f32 %v1230_v22, %v4199_v2 }
 0x169   :  { %v4605_v60 = vpop.permute.xlu1 %520  ;;  %v4607_v35 = vpop.permute.xlu0 %554 }
 0x16a   :  { %6578 = vst [vmem:[#allocation21_spill] sm:$0xff] %v4605_v60  ;;  %6579 = vst [vmem:[#allocation22_spill] sm:$0xff] %v4607_v35  ;;  %v1275_v60 = vmul.f32 %v1270_v16, %v4212_v11 }
 0x16b   :  { %1215 = vrot.lane.b32.xlu1 %v1207_v14, %s4122_s29  ;;  %1217 = vrot.lane.b32.xlu0 %v1210_v34, %s4122_s29  ;;  %v1272_v14 = vmul.f32 %v1270_v16, %v4205_v6  ;;  %v1248_v34 = vrot.slane %v1234_v27, 4  ;;  %v1273_v27 = vmul.f32 %v1270_v16, %v4256_v40 }
 0x16d   :  { %v4616_v41 = vpop.permute.xlu1 %556  ;;  %v4618_v35 = vpop.permute.xlu0 %558  ;;  %v1250_v48 = vsel %vm1170_vm7, %v1248_v34, %v1249_v47  ;;  %v1284_v22 = vrot.slane %v1272_v14, 4  ;;  %v1289_v34 = vrot.slane %v1275_v60, 4 }
 0x16e   :  { %6580 = vst [vmem:[#allocation23_spill] sm:$0xff] %v4616_v41  ;;  %6581 = vst [vmem:[#allocation24_spill] sm:$0xff] %v4618_v35  ;;  %v1271_v41 = vmul.f32 %v1270_v16, %v4194_v62 }
 0x16f   :  { %1219 = vrot.lane.b32.xlu1 %v1212_v0, %s4122_s29  ;;  %1253 = vrot.lane.b32.xlu0 %v1245_v43, %s4123_s3  ;;  %v1274_v0 = vmul.f32 %v1270_v16, %v4199_v2 }
 0x170   :  { %v1283_v15 = vrot.slane %v1271_v41, 4  ;;  %v1286_v41 = vrot.slane %v1273_v27, 4  ;;  %v1313_v27 = vmul.f32 %v1310_v57, %v4256_v40 }
 0x171   :  { %v4627_v35 = vpop.permute.xlu1 %560  ;;  %v4629_v42 = vpop.permute.xlu0 %594 }
 0x172   :  { %6582 = vst [vmem:[#allocation25_spill] sm:$0xff] %v4627_v35  ;;  %6583 = vst [vmem:[#allocation26_spill] sm:$0xff] %v4629_v42  ;;  %v1285_v14 = vsel %vm1170_vm7, %v1283_v15, %v1284_v22  ;;  %v1291_v35 = vrot.slane %v1276_v13, 4  ;;  %v1287_v47 = vsel %vm1170_vm7, %v1284_v22, %v1286_v41  ;;  %v1315_v15 = vmul.f32 %v1310_v57, %v4212_v11 }
 0x173   :  { %1255 = vrot.lane.b32.xlu1 %v1247_v56, %s4123_s3  ;;  %1257 = vrot.lane.b32.xlu0 %v1250_v48, %s4123_s3  ;;  %v1312_v56 = vmul.f32 %v1310_v57, %v4205_v6  ;;  %v1288_v48 = vrot.slane %v1274_v0, 4  ;;  %v1350_v13 = vstv %s3930_s11  ;;  %s3918_s11 = sld [smem:[#allocation6 + $0x15]] }
 0x174   :  { %v1292_v22 = vsel %vm1170_vm7, %v1289_v34, %v1291_v35  ;;  %v1329_v41 = vrot.slane %v1315_v15, 4 }
 0x175   :  { %v4638_v43 = vpop.permute.xlu1 %596  ;;  %v4640_v42 = vpop.permute.xlu0 %598  ;;  %v1290_v5 = vsel %vm1170_vm7, %v1288_v48, %v1289_v34  ;;  %v1324_v60 = vrot.slane %v1312_v56, 4  ;;  %v1316_v48 = vmul.f32 %v1310_v57, %v4262_v45 }
 0x176   :  { %6584 = vst [vmem:[#allocation27_spill] sm:$0xff] %v4638_v43  ;;  %6585 = vst [vmem:[#allocation28_spill] sm:$0xff] %v4640_v42  ;;  %v1311_v43 = vmul.f32 %v1310_v57, %v4194_v62 }
 0x177   :  { %1259 = vrot.lane.b32.xlu1 %v1252_v55, %s4123_s3  ;;  %1293 = vrot.lane.b32.xlu0 %v1285_v14, %s4124_s5  ;;  %v1314_v55 = vmul.f32 %v1310_v57, %v4199_v2 }
 0x178   :  { %v1323_v0 = vrot.slane %v1311_v43, 4  ;;  %v1326_v43 = vrot.slane %v1313_v27, 4 }
 0x179   :  { %v4649_v42 = vpop.permute.xlu1 %600  ;;  %v4651_v16 = vpop.permute.xlu0 %667 }
 0x17a   :  { %6586 = vst [vmem:[#allocation29_spill] sm:$0xff] %v4649_v42  ;;  %6587 = vst [vmem:[#allocation30_spill] sm:$0xff] %v4651_v16  ;;  %v1325_v56 = vsel %vm1170_vm7, %v1323_v0, %v1324_v60  ;;  %v1327_v34 = vsel %vm1170_vm7, %v1324_v60, %v1326_v43  ;;  %v1331_v0 = vrot.slane %v1316_v48, 4  ;;  %v1355_v42 = vmul.f32 %v1350_v13, %v4212_v11 }
 0x17b   :  { %1295 = vrot.lane.b32.xlu1 %v1287_v47, %s4124_s5  ;;  %1297 = vrot.lane.b32.xlu0 %v1290_v5, %s4124_s5  ;;  %v1352_v47 = vmul.f32 %v1350_v13, %v4205_v6  ;;  %v1328_v5 = vrot.slane %v1314_v55, 4  ;;  %v1353_v55 = vmul.f32 %v1350_v13, %v4256_v40  ;;  %v1356_v60 = vmul.f32 %v1350_v13, %v4262_v45 }
 0x17c   :  { %v1390_v43 = vstv %s3931_s13  ;;  %v1332_v48 = vsel %vm1170_vm7, %v1329_v41, %v1331_v0  ;;  %s5202_s13 = sld [smem:[#allocation6 + $0x37]] }
 0x17d   :  { %v4660_v14 = vpop.permute.xlu1 %669  ;;  %v4662_v16 = vpop.permute.xlu0 %671  ;;  %v1330_v15 = vsel %vm1170_vm7, %v1328_v5, %v1329_v41  ;;  %v1364_v57 = vrot.slane %v1352_v47, 4  ;;  %v1369_v5 = vrot.slane %v1355_v42, 4 }
 0x17e   :  { %6588 = vst [vmem:[#allocation31_spill] sm:$0xff] %v4660_v14  ;;  %6589 = vst [vmem:[#allocation32_spill] sm:$0xff] %v4662_v16  ;;  %v1351_v14 = vmul.f32 %v1350_v13, %v4194_v62 }
 0x17f   :  { %1299 = vrot.lane.b32.xlu1 %v1292_v22, %s4124_s5  ;;  %1333 = vrot.lane.b32.xlu0 %v1325_v56, %s4125_s7  ;;  %v1354_v22 = vmul.f32 %v1350_v13, %v4199_v2 }
 0x180   :  { %v1363_v27 = vrot.slane %v1351_v14, 4  ;;  %v1366_v14 = vrot.slane %v1353_v55, 4  ;;  %v1393_v55 = vmul.f32 %v1390_v43, %v4256_v40 }
 0x181   :  { %v4671_v16 = vpop.permute.xlu1 %673  ;;  %v4673_v35 = vpop.permute.xlu0 %707 }
 0x182   :  { %6590 = vst [vmem:[#allocation33_spill] sm:$0xff] %v4671_v16  ;;  %6591 = vst [vmem:[#allocation34_spill] sm:$0xff] %v4673_v35  ;;  %v1365_v47 = vsel %vm1170_vm7, %v1363_v27, %v1364_v57  ;;  %v1371_v16 = vrot.slane %v1356_v60, 4  ;;  %v1367_v41 = vsel %vm1170_vm7, %v1364_v57, %v1366_v14  ;;  %v1395_v27 = vmul.f32 %v1390_v43, %v4212_v11 }
 0x183   :  { %1335 = vrot.lane.b32.xlu1 %v1327_v34, %s4125_s7  ;;  %1337 = vrot.lane.b32.xlu0 %v1330_v15, %s4125_s7  ;;  %v1392_v34 = vmul.f32 %v1390_v43, %v4205_v6  ;;  %v1368_v15 = vrot.slane %v1354_v22, 4  ;;  %v1462_v60 = vstv %s3933_s14  ;;  %s5215_s14 = sld [smem:[#allocation6 + $0x39]] }
 0x184   :  { %v1372_v57 = vsel %vm1170_vm7, %v1369_v5, %v1371_v16  ;;  %v1409_v14 = vrot.slane %v1395_v27, 4 }
 0x185   :  { %v4682_v56 = vpop.permute.xlu1 %709  ;;  %v4684_v35 = vpop.permute.xlu0 %711  ;;  %v1370_v0 = vsel %vm1170_vm7, %v1368_v15, %v1369_v5  ;;  %v1404_v42 = vrot.slane %v1392_v34, 4  ;;  %v1396_v15 = vmul.f32 %v1390_v43, %v4262_v45 }
 0x186   :  { %6592 = vst [vmem:[#allocation35_spill] sm:$0xff] %v4682_v56  ;;  %6593 = vst [vmem:[#allocation36_spill] sm:$0xff] %v4684_v35  ;;  %v1391_v56 = vmul.f32 %v1390_v43, %v4194_v62 }
 0x187   :  { %1339 = vrot.lane.b32.xlu1 %v1332_v48, %s4125_s7  ;;  %1373 = vrot.lane.b32.xlu0 %v1365_v47, %s4126_s10  ;;  %v1394_v48 = vmul.f32 %v1390_v43, %v4199_v2 }
 0x188   :  { %v1403_v22 = vrot.slane %v1391_v56, 4  ;;  %v1406_v56 = vrot.slane %v1393_v55, 4 }
 0x189   :  { %v4693_v35 = vpop.permute.xlu1 %713  ;;  %v4695_v13 = vpop.permute.xlu0 %747 }
 0x18a   :  { %6594 = vst [vmem:[#allocation37_spill] sm:$0xff] %v4693_v35  ;;  %6595 = vst [vmem:[#allocation38_spill] sm:$0xff] %v4695_v13  ;;  %v1405_v34 = vsel %vm1170_vm7, %v1403_v22, %v1404_v42  ;;  %v1407_v5 = vsel %vm1170_vm7, %v1404_v42, %v1406_v56  ;;  %v1411_v22 = vrot.slane %v1396_v15, 4  ;;  %v1467_v35 = vmul.f32 %v1462_v60, %v4212_v11 }
 0x18b   :  { %1375 = vrot.lane.b32.xlu1 %v1367_v41, %s4126_s10  ;;  %1377 = vrot.lane.b32.xlu0 %v1370_v0, %s4126_s10  ;;  %v1464_v41 = vmul.f32 %v1462_v60, %v4205_v6  ;;  %v1408_v0 = vrot.slane %v1394_v48, 4  ;;  %v1465_v48 = vmul.f32 %v1462_v60, %v4256_v40  ;;  %v1468_v42 = vmul.f32 %v1462_v60, %v4262_v45 }
 0x18c   :  { %v1502_v56 = vstv %s3934_s15  ;;  %v1412_v15 = vsel %vm1170_vm7, %v1409_v14, %v1411_v22  ;;  %s5251_s15 = sld [smem:[#allocation6 + $0x3a]] }
 0x18d   :  { %v4704_v47 = vpop.permute.xlu1 %749  ;;  %v4706_v13 = vpop.permute.xlu0 %751  ;;  %v1410_v27 = vsel %vm1170_vm7, %v1408_v0, %v1409_v14  ;;  %v1476_v43 = vrot.slane %v1464_v41, 5  ;;  %v1481_v0 = vrot.slane %v1467_v35, 5 }
 0x18e   :  { %6596 = vst [vmem:[#allocation39_spill] sm:$0xff] %v4704_v47  ;;  %6597 = vst [vmem:[#allocation40_spill] sm:$0xff] %v4706_v13  ;;  %v1463_v47 = vmul.f32 %v1462_v60, %v4194_v62 }
 0x18f   :  { %1379 = vrot.lane.b32.xlu1 %v1372_v57, %s4126_s10  ;;  %1413 = vrot.lane.b32.xlu0 %v1405_v34, %s4127_s12  ;;  %v1466_v57 = vmul.f32 %v1462_v60, %v4199_v2 }
 0x190   :  { %v1475_v55 = vrot.slane %v1463_v47, 5  ;;  %v1478_v47 = vrot.slane %v1465_v48, 5  ;;  %v1505_v48 = vmul.f32 %v1502_v56, %v4256_v40 }
 0x191   :  { %v4715_v13 = vpop.permute.xlu1 %753  ;;  %v4717_v16 = vpop.permute.xlu0 %787 }
 0x192   :  { %6598 = vst [vmem:[#allocation41_spill] sm:$0xff] %v4715_v13  ;;  %6599 = vst [vmem:[#allocation42_spill] sm:$0xff] %v4717_v16  ;;  %v1477_v41 = vsel %vm120_vm1, %v1475_v55, %v1476_v43  ;;  %v1483_v13 = vrot.slane %v1468_v42, 5  ;;  %v1479_v14 = vsel %vm120_vm1, %v1476_v43, %v1478_v47  ;;  %v1507_v55 = vmul.f32 %v1502_v56, %v4212_v11 }
 0x193   :  { %1415 = vrot.lane.b32.xlu1 %v1407_v5, %s4127_s12  ;;  %1417 = vrot.lane.b32.xlu0 %v1410_v27, %s4127_s12  ;;  %v1504_v5 = vmul.f32 %v1502_v56, %v4205_v6  ;;  %v1480_v27 = vrot.slane %v1466_v57, 5  ;;  %v1542_v42 = vstv %s3935_s16  ;;  %s5290_s16 = sld [smem:[#allocation6 + $0x3b]] }
 0x194   :  { %v1484_v43 = vsel %vm120_vm1, %v1481_v0, %v1483_v13  ;;  %v1521_v47 = vrot.slane %v1507_v55, 5 }
 0x195   :  { %v4726_v34 = vpop.permute.xlu1 %789  ;;  %v4728_v16 = vpop.permute.xlu0 %791  ;;  %v1482_v22 = vsel %vm120_vm1, %v1480_v27, %v1481_v0  ;;  %v1516_v35 = vrot.slane %v1504_v5, 5  ;;  %v1508_v27 = vmul.f32 %v1502_v56, %v4262_v45 }
 0x196   :  { %6600 = vst [vmem:[#allocation43_spill] sm:$0xff] %v4726_v34  ;;  %6601 = vst [vmem:[#allocation44_spill] sm:$0xff] %v4728_v16  ;;  %v1503_v34 = vmul.f32 %v1502_v56, %v4194_v62 }
 0x197   :  { %1419 = vrot.lane.b32.xlu1 %v1412_v15, %s4127_s12  ;;  %1485 = vrot.lane.b32.xlu0 %v1477_v41, %s4122_s29  ;;  %v1506_v15 = vmul.f32 %v1502_v56, %v4199_v2 }
 0x198   :  { %v1515_v57 = vrot.slane %v1503_v34, 5  ;;  %v1518_v34 = vrot.slane %v1505_v48, 5 }
 0x199   :  { %v4737_v16 = vpop.permute.xlu1 %793  ;;  %v4739_v60 = vpop.permute.xlu0 %827 }
 0x19a   :  { %6602 = vst [vmem:[#allocation45_spill] sm:$0xff] %v4737_v16  ;;  %6603 = vst [vmem:[#allocation46_spill] sm:$0xff] %v4739_v60  ;;  %v1517_v5 = vsel %vm120_vm1, %v1515_v57, %v1516_v35  ;;  %v1519_v0 = vsel %vm120_vm1, %v1516_v35, %v1518_v34  ;;  %v1523_v57 = vrot.slane %v1508_v27, 5  ;;  %v1547_v16 = vmul.f32 %v1542_v42, %v4212_v11 }
 0x19b   :  { %1487 = vrot.lane.b32.xlu1 %v1479_v14, %s4122_s29  ;;  %1489 = vrot.lane.b32.xlu0 %v1482_v22, %s4122_s29  ;;  %v1544_v14 = vmul.f32 %v1542_v42, %v4205_v6  ;;  %v1520_v22 = vrot.slane %v1506_v15, 5  ;;  %v1545_v15 = vmul.f32 %v1542_v42, %v4256_v40  ;;  %v1548_v35 = vmul.f32 %v1542_v42, %v4262_v45 }
 0x19c   :  { %v1582_v34 = vstv %s3936_s17  ;;  %v1524_v27 = vsel %vm120_vm1, %v1521_v47, %v1523_v57  ;;  %s5329_s17 = sld [smem:[#allocation6 + $0x3c]] }
 0x19d   :  { %v4748_v41 = vpop.permute.xlu1 %829  ;;  %v4750_v60 = vpop.permute.xlu0 %831  ;;  %v1522_v55 = vsel %vm120_vm1, %v1520_v22, %v1521_v47  ;;  %v1556_v56 = vrot.slane %v1544_v14, 5  ;;  %v1561_v22 = vrot.slane %v1547_v16, 5 }
 0x19e   :  { %6604 = vst [vmem:[#allocation47_spill] sm:$0xff] %v4748_v41  ;;  %6605 = vst [vmem:[#allocation48_spill] sm:$0xff] %v4750_v60  ;;  %v1543_v41 = vmul.f32 %v1542_v42, %v4194_v62 }
 0x19f   :  { %1491 = vrot.lane.b32.xlu1 %v1484_v43, %s4122_s29  ;;  %1525 = vrot.lane.b32.xlu0 %v1517_v5, %s4123_s3  ;;  %v1546_v43 = vmul.f32 %v1542_v42, %v4199_v2 }
 0x1a0   :  { %v1555_v48 = vrot.slane %v1543_v41, 5  ;;  %v1558_v41 = vrot.slane %v1545_v15, 5  ;;  %v1585_v15 = vmul.f32 %v1582_v34, %v4256_v40 }
 0x1a1   :  { %v4759_v60 = vpop.permute.xlu1 %833  ;;  %v4761_v13 = vpop.permute.xlu0 %867 }
 0x1a2   :  { %6606 = vst [vmem:[#allocation49_spill] sm:$0xff] %v4759_v60  ;;  %6607 = vst [vmem:[#allocation50_spill] sm:$0xff] %v4761_v13  ;;  %v1557_v14 = vsel %vm120_vm1, %v1555_v48, %v1556_v56  ;;  %v1563_v60 = vrot.slane %v1548_v35, 5  ;;  %v1559_v47 = vsel %vm120_vm1, %v1556_v56, %v1558_v41  ;;  %v1587_v48 = vmul.f32 %v1582_v34, %v4212_v11 }
 0x1a3   :  { %1527 = vrot.lane.b32.xlu1 %v1519_v0, %s4123_s3  ;;  %1529 = vrot.lane.b32.xlu0 %v1522_v55, %s4123_s3  ;;  %v1584_v0 = vmul.f32 %v1582_v34, %v4205_v6  ;;  %v1560_v55 = vrot.slane %v1546_v43, 5  ;;  %v1622_v35 = vstv %s3937_s18  ;;  %s5357_s18 = sld [smem:[#allocation6 + $0x3d]] }
 0x1a4   :  { %v1564_v56 = vsel %vm120_vm1, %v1561_v22, %v1563_v60  ;;  %v1601_v41 = vrot.slane %v1587_v48, 5 }
 0x1a5   :  { %v4770_v5 = vpop.permute.xlu1 %869  ;;  %v4772_v13 = vpop.permute.xlu0 %871  ;;  %v1562_v57 = vsel %vm120_vm1, %v1560_v55, %v1561_v22  ;;  %v1596_v16 = vrot.slane %v1584_v0, 5  ;;  %v1588_v55 = vmul.f32 %v1582_v34, %v4262_v45 }
 0x1a6   :  { %6608 = vst [vmem:[#allocation51_spill] sm:$0xff] %v4770_v5  ;;  %6609 = vst [vmem:[#allocation52_spill] sm:$0xff] %v4772_v13  ;;  %v1583_v5 = vmul.f32 %v1582_v34, %v4194_v62 }
 0x1a7   :  { %1531 = vrot.lane.b32.xlu1 %v1524_v27, %s4123_s3  ;;  %1565 = vrot.lane.b32.xlu0 %v1557_v14, %s4124_s5  ;;  %v1586_v27 = vmul.f32 %v1582_v34, %v4199_v2 }
 0x1a8   :  { %v1595_v43 = vrot.slane %v1583_v5, 5  ;;  %v1598_v5 = vrot.slane %v1585_v15, 5 }
 0x1a9   :  { %v4781_v13 = vpop.permute.xlu1 %873  ;;  %v4783_v42 = vpop.permute.xlu0 %940 }
 0x1aa   :  { %6610 = vst [vmem:[#allocation53_spill] sm:$0xff] %v4781_v13  ;;  %6611 = vst [vmem:[#allocation54_spill] sm:$0xff] %v4783_v42  ;;  %v1597_v0 = vsel %vm120_vm1, %v1595_v43, %v1596_v16  ;;  %v1599_v22 = vsel %vm120_vm1, %v1596_v16, %v1598_v5  ;;  %v1603_v43 = vrot.slane %v1588_v55, 5  ;;  %v1627_v13 = vmul.f32 %v1622_v35, %v4212_v11 }
 0x1ab   :  { %1567 = vrot.lane.b32.xlu1 %v1559_v47, %s4124_s5  ;;  %1569 = vrot.lane.b32.xlu0 %v1562_v57, %s4124_s5  ;;  %v1624_v47 = vmul.f32 %v1622_v35, %v4205_v6  ;;  %v1600_v57 = vrot.slane %v1586_v27, 5  ;;  %v1625_v27 = vmul.f32 %v1622_v35, %v4256_v40  ;;  %v1628_v16 = vmul.f32 %v1622_v35, %v4262_v45 }
 0x1ac   :  { %v1662_v5 = vstv %s3938_s19  ;;  %v1604_v55 = vsel %vm120_vm1, %v1601_v41, %v1603_v43  ;;  %s5390_s19 = sld [smem:[#allocation6 + $0x3e]] }
 0x1ad   :  { %v4792_v14 = vpop.permute.xlu1 %942  ;;  %v4794_v42 = vpop.permute.xlu0 %944  ;;  %v1602_v48 = vsel %vm120_vm1, %v1600_v57, %v1601_v41  ;;  %v1636_v34 = vrot.slane %v1624_v47, 5  ;;  %v1641_v57 = vrot.slane %v1627_v13, 5 }
 0x1ae   :  { %6612 = vst [vmem:[#allocation55_spill] sm:$0xff] %v4792_v14  ;;  %6613 = vst [vmem:[#allocation56_spill] sm:$0xff] %v4794_v42  ;;  %v1623_v14 = vmul.f32 %v1622_v35, %v4194_v62 }
 0x1af   :  { %1571 = vrot.lane.b32.xlu1 %v1564_v56, %s4124_s5  ;;  %1605 = vrot.lane.b32.xlu0 %v1597_v0, %s4125_s7  ;;  %v1626_v56 = vmul.f32 %v1622_v35, %v4199_v2 }
 0x1b0   :  { %v1635_v15 = vrot.slane %v1623_v14, 5  ;;  %v1638_v14 = vrot.slane %v1625_v27, 5 }
 0x1b1   :  { %v4803_v42 = vpop.permute.xlu1 %946  ;;  %v4805_v60 = vpop.permute.xlu0 %980 }
 0x1b2   :  { %6614 = vst [vmem:[#allocation57_spill] sm:$0xff] %v4803_v42  ;;  %6615 = vst [vmem:[#allocation58_spill] sm:$0xff] %v4805_v60  ;;  %v1637_v47 = vsel %vm120_vm1, %v1635_v15, %v1636_v34  ;;  %v1643_v42 = vrot.slane %v1628_v16, 5  ;;  %v1639_v41 = vsel %vm120_vm1, %v1636_v34, %v1638_v14  ;;  %v1667_v15 = vmul.f32 %v1662_v5, %v4212_v11 }
 0x1b3   :  { %1607 = vrot.lane.b32.xlu1 %v1599_v22, %s4125_s7  ;;  %1609 = vrot.lane.b32.xlu0 %v1602_v48, %s4125_s7  ;;  %v1664_v22 = vmul.f32 %v1662_v5, %v4205_v6  ;;  %v1640_v48 = vrot.slane %v1626_v56, 5  ;;  %v1665_v56 = vmul.f32 %v1662_v5, %v4256_v40  ;;  %v1668_v34 = vmul.f32 %v1662_v5, %v4262_v45 }
 0x1b4   :  { %v1735_v16 = vstv %s3940_s20  ;;  %s5422_s20 = sld [smem:[#allocation6 + $0x1c]] }
 0x1b5   :  { %v4814_v0 = vpop.permute.xlu1 %982  ;;  %v4816_v60 = vpop.permute.xlu0 %984  ;;  %v1642_v43 = vsel %vm120_vm1, %v1640_v48, %v1641_v57  ;;  %v1676_v13 = vrot.slane %v1664_v22, 5  ;;  %v1644_v22 = vsel %vm120_vm1, %v1641_v57, %v1643_v42  ;;  %v1681_v48 = vrot.slane %v1667_v15, 5 }
 0x1b6   :  { %6616 = vst [vmem:[#allocation59_spill] sm:$0xff] %v4814_v0  ;;  %6617 = vst [vmem:[#allocation60_spill] sm:$0xff] %v4816_v60  ;;  %v1663_v0 = vmul.f32 %v1662_v5, %v4194_v62 }
 0x1b7   :  { %1611 = vrot.lane.b32.xlu1 %v1604_v55, %s4125_s7  ;;  %1645 = vrot.lane.b32.xlu0 %v1637_v47, %s4126_s10  ;;  %v1666_v55 = vmul.f32 %v1662_v5, %v4199_v2 }
 0x1b8   :  { %v1675_v27 = vrot.slane %v1663_v0, 5  ;;  %v1678_v0 = vrot.slane %v1665_v56, 5  ;;  %v1738_v56 = vmul.f32 %v1735_v16, %v4256_v40 }
 0x1b9   :  { %v4825_v60 = vpop.permute.xlu1 %986  ;;  %v4827_v35 = vpop.permute.xlu0 %1020 }
 0x1ba   :  { %6618 = vst [vmem:[#allocation61_spill] sm:$0xff] %v4825_v60  ;;  %6619 = vst [vmem:[#allocation62_spill] sm:$0xff] %v4827_v35  ;;  %v1677_v14 = vsel %vm120_vm1, %v1675_v27, %v1676_v13  ;;  %v1683_v60 = vrot.slane %v1668_v34, 5  ;;  %v1679_v42 = vsel %vm120_vm1, %v1676_v13, %v1678_v0  ;;  %v1740_v27 = vmul.f32 %v1735_v16, %v4212_v11 }
 0x1bb   :  { %1647 = vrot.lane.b32.xlu1 %v1639_v41, %s4126_s10  ;;  %1649 = vrot.lane.b32.xlu0 %v1642_v43, %s4126_s10  ;;  %v1737_v41 = vmul.f32 %v1735_v16, %v4205_v6  ;;  %v1680_v43 = vrot.slane %v1666_v55, 5  ;;  %v1775_v0 = vstv %s3941_s21  ;;  %s5433_s21 = sld [smem:[#allocation6 + $0x40]] }
 0x1bc   :  { %v1684_v13 = vsel %vm120_vm1, %v1681_v48, %v1683_v60 }
 0x1bd   :  { %v4836_v47 = vpop.permute.xlu1 %1022  ;;  %v4838_v35 = vpop.permute.xlu0 %1024  ;;  %v1682_v57 = vsel %vm120_vm1, %v1680_v43, %v1681_v48  ;;  %v1749_v15 = vrot.slane %v1737_v41, 6  ;;  %v1754_v43 = vrot.slane %v1740_v27, 6 }
 0x1be   :  { %6620 = vst [vmem:[#allocation63_spill] sm:$0xff] %v4836_v47  ;;  %6621 = vst [vmem:[#allocation64_spill] sm:$0xff] %v4838_v35  ;;  %v1736_v47 = vmul.f32 %v1735_v16, %v4194_v62 }
 0x1bf   :  { %1651 = vrot.lane.b32.xlu1 %v1644_v22, %s4126_s10  ;;  %1685 = vrot.lane.b32.xlu0 %v1677_v14, %s4127_s12  ;;  %v1739_v22 = vmul.f32 %v1735_v16, %v4199_v2 }
 0x1c0   :  { %v1748_v55 = vrot.slane %v1736_v47, 6  ;;  %v1751_v47 = vrot.slane %v1738_v56, 6 }
 0x1c1   :  { %v4847_v35 = vpop.permute.xlu1 %1026  ;;  %v4849_v5 = vpop.permute.xlu0 %1060 }
 0x1c2   :  { %6622 = vst [vmem:[#allocation65_spill] sm:$0xff] %v4847_v35  ;;  %6623 = vst [vmem:[#allocation66_spill] sm:$0xff] %v4849_v5  ;;  %v1750_v41 = vsel %vm1715_vm8, %v1748_v55, %v1749_v15  ;;  %v1753_v5 = vrot.slane %v1739_v22, 6  ;;  %v1752_v48 = vsel %vm1715_vm8, %v1749_v15, %v1751_v47  ;;  %v1780_v35 = vmul.f32 %v1775_v0, %v4212_v11 }
 0x1c3   :  { %1687 = vrot.lane.b32.xlu1 %v1679_v42, %s4127_s12  ;;  %1689 = vrot.lane.b32.xlu0 %v1682_v57, %s4127_s12  ;;  %v1741_v42 = vmul.f32 %v1735_v16, %v4262_v45  ;;  %v1777_v57 = vmul.f32 %v1775_v0, %v4205_v6  ;;  %v1778_v22 = vmul.f32 %v1775_v0, %v4256_v40 }
 0x1c4   :  { %v1755_v27 = vsel %vm1715_vm8, %v1753_v5, %v1754_v43  ;;  %v1781_v15 = vmul.f32 %v1775_v0, %v4262_v45  ;;  %v1815_v5 = vstv %s3942_s23  ;;  %v1794_v47 = vrot.slane %v1780_v35, 6  ;;  %s5464_s23 = sld [smem:[#allocation6 + $0x41]] }
 0x1c5   :  { %v4858_v14 = vpop.permute.xlu1 %1062  ;;  %v4860_v34 = vpop.permute.xlu0 %1064  ;;  %v1756_v55 = vrot.slane %v1741_v42, 6  ;;  %v1789_v16 = vrot.slane %v1777_v57, 6 }
 0x1c6   :  { %6624 = vst [vmem:[#allocation67_spill] sm:$0xff] %v4858_v14  ;;  %6625 = vst [vmem:[#allocation68_spill] sm:$0xff] %v4860_v34  ;;  %v1776_v14 = vmul.f32 %v1775_v0, %v4194_v62 }
 0x1c7   :  { %1691 = vrot.lane.b32.xlu1 %v1684_v13, %s4127_s12  ;;  %1758 = vrot.lane.b32.xlu0 %v1750_v41, %s4122_s29  ;;  %v1779_v13 = vmul.f32 %v1775_v0, %v4199_v2  ;;  %v1757_v42 = vsel %vm1715_vm8, %v1754_v43, %v1756_v55 }
 0x1c8   :  { %v1788_v56 = vrot.slane %v1776_v14, 6  ;;  %v1791_v14 = vrot.slane %v1778_v22, 6  ;;  %v1818_v22 = vmul.f32 %v1815_v5, %v4256_v40 }
 0x1c9   :  { %v4869_v34 = vpop.permute.xlu1 %1066  ;;  %v4871_v60 = vpop.permute.xlu0 %1100 }
 0x1ca   :  { %6626 = vst [vmem:[#allocation69_spill] sm:$0xff] %v4869_v34  ;;  %6627 = vst [vmem:[#allocation70_spill] sm:$0xff] %v4871_v60  ;;  %v1790_v57 = vsel %vm1715_vm8, %v1788_v56, %v1789_v16  ;;  %v1796_v34 = vrot.slane %v1781_v15, 6  ;;  %v1792_v43 = vsel %vm1715_vm8, %v1789_v16, %v1791_v14  ;;  %v1820_v56 = vmul.f32 %v1815_v5, %v4212_v11 }
 0x1cb   :  { %1760 = vrot.lane.b32.xlu1 %v1752_v48, %s4122_s29  ;;  %1762 = vrot.lane.b32.xlu0 %v1755_v27, %s4122_s29  ;;  %v1817_v48 = vmul.f32 %v1815_v5, %v4205_v6  ;;  %v1793_v27 = vrot.slane %v1779_v13, 6  ;;  %v1855_v15 = vstv %s3943_s24  ;;  %s5494_s24 = sld [smem:[#allocation6 + $0x42]] }
 0x1cc   :  { %v1797_v16 = vsel %vm1715_vm8, %v1794_v47, %v1796_v34  ;;  %v1834_v14 = vrot.slane %v1820_v56, 6 }
 0x1cd   :  { %v4880_v41 = vpop.permute.xlu1 %1102  ;;  %v4882_v60 = vpop.permute.xlu0 %1104  ;;  %v1795_v55 = vsel %vm1715_vm8, %v1793_v27, %v1794_v47  ;;  %v1829_v35 = vrot.slane %v1817_v48, 6  ;;  %v1821_v27 = vmul.f32 %v1815_v5, %v4262_v45 }
 0x1ce   :  { %6628 = vst [vmem:[#allocation71_spill] sm:$0xff] %v4880_v41  ;;  %6629 = vst [vmem:[#allocation72_spill] sm:$0xff] %v4882_v60  ;;  %v1816_v41 = vmul.f32 %v1815_v5, %v4194_v62 }
 0x1cf   :  { %1764 = vrot.lane.b32.xlu1 %v1757_v42, %s4122_s29  ;;  %1798 = vrot.lane.b32.xlu0 %v1790_v57, %s4123_s3  ;;  %v1819_v42 = vmul.f32 %v1815_v5, %v4199_v2 }
 0x1d0   :  { %v1828_v13 = vrot.slane %v1816_v41, 6  ;;  %v1831_v41 = vrot.slane %v1818_v22, 6 }
 0x1d1   :  { %v4891_v60 = vpop.permute.xlu1 %1106  ;;  %v4893_v0 = vpop.permute.xlu0 %1140 }
 0x1d2   :  { %6630 = vst [vmem:[#allocation73_spill] sm:$0xff] %v4891_v60  ;;  %6631 = vst [vmem:[#allocation74_spill] sm:$0xff] %v4893_v0  ;;  %v1830_v48 = vsel %vm1715_vm8, %v1828_v13, %v1829_v35  ;;  %v1832_v47 = vsel %vm1715_vm8, %v1829_v35, %v1831_v41  ;;  %v1836_v13 = vrot.slane %v1821_v27, 6  ;;  %v1860_v60 = vmul.f32 %v1855_v15, %v4212_v11 }
 0x1d3   :  { %1800 = vrot.lane.b32.xlu1 %v1792_v43, %s4123_s3  ;;  %1802 = vrot.lane.b32.xlu0 %v1795_v55, %s4123_s3  ;;  %v1857_v43 = vmul.f32 %v1855_v15, %v4205_v6  ;;  %v1833_v55 = vrot.slane %v1819_v42, 6  ;;  %v1858_v42 = vmul.f32 %v1855_v15, %v4256_v40  ;;  %v1861_v27 = vmul.f32 %v1855_v15, %v4262_v45 }
 0x1d4   :  { %v1837_v41 = vsel %vm1715_vm8, %v1834_v14, %v1836_v13  ;;  %v4023_v13 = vld [vmem:[#allocation2] sm:$0xff] }
 0x1d5   :  { %v4902_v57 = vpop.permute.xlu1 %1142  ;;  %v4904_v0 = vpop.permute.xlu0 %1144  ;;  %v1835_v56 = vsel %vm1715_vm8, %v1833_v55, %v1834_v14  ;;  %v1869_v5 = vrot.slane %v1857_v43, 6  ;;  %v1895_v43 = vstv %s3944_s25  ;;  %s5538_s25 = sld [smem:[#allocation6 + $0x43]] }
 0x1d6   :  { %6632 = vst [vmem:[#allocation75_spill] sm:$0xff] %v4902_v57  ;;  %6633 = vst [vmem:[#allocation76_spill] sm:$0xff] %v4904_v0  ;;  %v1856_v57 = vmul.f32 %v1855_v15, %v4194_v62  ;;  %v1898_v14 = vmul.f32 %v1895_v43, %v4256_v40  ;;  %v4947_v21 = vmul.f32 %v1895_v43, %v4212_v11 }
 0x1d7   :  { %1804 = vrot.lane.b32.xlu1 %v1797_v16, %s4123_s3  ;;  %1838 = vrot.lane.b32.xlu0 %v1830_v48, %s4124_s5  ;;  %v1859_v16 = vmul.f32 %v1855_v15, %v4199_v2  ;;  %v1876_v15 = vrot.slane %v1861_v27, 6  ;;  %v1901_v31 = vmul.f32 %v1895_v43, %v4262_v45 }
 0x1d8   :  { %v1868_v22 = vrot.slane %v1856_v57, 6  ;;  %v1897_v57 = vmul.f32 %v1895_v43, %v4205_v6  ;;  %v1911_v58 = vrot.slane %v1898_v14, 6 }
 0x1d9   :  { %v4913_v0 = vpop.permute.xlu1 %1146  ;;  %v4915_v34 = vpop.permute.xlu0 %1213 }
 0x1da   :  { %6634 = vst [vmem:[#allocation77_spill] sm:$0xff] %v4913_v0  ;;  %6635 = vst [vmem:[#allocation78_spill] sm:$0xff] %v4915_v34  ;;  %v1870_v55 = vsel %vm1715_vm8, %v1868_v22, %v1869_v5  ;;  %v1873_v34 = vrot.slane %v1859_v16, 6  ;;  %v4024_v22 = vld [vmem:[#allocation2 + $0x10] sm:$0xff]  ;;  %v1909_v16 = vrot.slane %v1897_v57, 6 }
 0x1db   :  { %1840 = vrot.lane.b32.xlu1 %v1832_v47, %s4124_s5  ;;  %1842 = vrot.lane.b32.xlu0 %v1835_v56, %s4124_s5  ;;  %v1874_v47 = vrot.slane %v1860_v60, 6  ;;  %v1871_v56 = vrot.slane %v1858_v42, 6  ;;  %v88_v60 = vsel %vm55_vm0, %v4023_v13, -inf  ;;  %v1899_v13 = vmul.f32 %v1895_v43, %v4199_v2 }
 0x1dd   :  { %v4926_v48 = vpop.permute.xlu1 %1215  ;;  %v4928_v35 = vpop.permute.xlu0 %1217  ;;  %v1875_v42 = vsel %vm1715_vm8, %v1873_v34, %v1874_v47  ;;  %v1913_v14 = vrot.slane %v1899_v13, 6 }
 0x1de   :  { %6636 = vst [vmem:[#allocation79_spill] sm:$0xff] %v4926_v48  ;;  %6637 = vst [vmem:[#allocation80_spill] sm:$0xff] %v4928_v35  ;;  %v1896_v48 = vmul.f32 %v1895_v43, %v4194_v62 }
 0x1df   :  { %1844 = vrot.lane.b32.xlu1 %v1837_v41, %s4124_s5  ;;  %1878 = vrot.lane.b32.xlu0 %v1870_v55, %s4125_s7  ;;  %v89_v41 = vsel %vm55_vm0, %v4024_v22, -inf  ;;  %v1872_v55 = vsel %vm1715_vm8, %v1869_v5, %v1871_v56  ;;  %v96_v5 = vsel %vm55_vm0, %v4026_v59, -inf  ;;  %v1877_v56 = vsel %vm1715_vm8, %v1874_v47, %v1876_v15  ;;  %v4028_v59 = vld [vmem:[#allocation2 + $0x28] sm:$0xff] }
 0x1e0   :  { %v90_v22 = vmax.f32 %v88_v60, %v89_v41  ;;  %v4965_v60 = vmul.f32 %v1935_v20, %v4205_v6  ;;  %v98_v41 = vsel %vm55_vm0, %v4028_v59, -inf  ;;  %v1912_v47 = vsel %vm1715_vm8, %v1909_v16, %v1911_v58 }
 0x1e1   :  { %v4937_v0 = vpop.permute.xlu1 %1219  ;;  %v4939_v35 = vpop.permute.xlu0 %1253  ;;  %v1936_v15 = vmul.f32 %v1935_v20, %v4194_v62  ;;  %v102_v59 = vsel %vm55_vm0, %v4030_v30, -inf  ;;  %v109_v58 = vsel %vm55_vm0, %v4032_v9, -inf }
 0x1e2   :  { %6638 = vst [vmem:[#allocation81_spill] sm:$0xff] %v4937_v0  ;;  %6639 = vst [vmem:[#allocation82_spill] sm:$0xff] %v4939_v35  ;;  %v4025_v0 = vld [vmem:[#allocation2 + $0x8] sm:$0xff]  ;;  %v1908_v35 = vrot.slane %v1896_v48, 6  ;;  %v1914_v48 = vrot.slane %v4947_v21, 6 }
 0x1e3   :  { %v95_v27 = vsel %vm55_vm0, %v4025_v0, -inf  ;;  %1880 = vrot.lane.b32.xlu1 %v1872_v55, %s4125_s7  ;;  %1882 = vrot.lane.b32.xlu0 %v1875_v42, %s4125_s7  ;;  %v4027_v0 = vld [vmem:[#allocation2 + $0x20] sm:$0xff]  ;;  %v1948_v30 = vrot.slane %v1936_v15, 6 }
 0x1e4   :  { %v91_v55 = vsel %vm55_vm0, %v4027_v0, -inf  ;;  %v1910_v42 = vsel %vm1715_vm8, %v1908_v35, %v1909_v16  ;;  %v4029_v0 = vld [vmem:[#allocation2 + $0x30] sm:$0xff]  ;;  %v97_v43 = vmax.f32 %v95_v27, %v96_v5  ;;  %v4033_v16 = vld [vmem:[#allocation2 + $0x58] sm:$0xff]  ;;  %v1949_v27 = vrot.slane %v4965_v60, 6 }
 0x1e5   :  { %v4955_v34 = vpop.permute.xlu1 %1255  ;;  %v4957_v57 = vpop.permute.xlu0 %1257  ;;  %v92_v35 = vmax.f32 %v90_v22, %v91_v55  ;;  %v93_v21 = vsel %vm55_vm0, %v4029_v0, -inf  ;;  %v110_v13 = vsel %vm55_vm0, %v4033_v16, -inf  ;;  %v1915_v22 = vsel %vm1715_vm8, %v1913_v14, %v1914_v48 }
 0x1e6   :  { %6640 = vst [vmem:[#allocation83_spill] sm:$0xff] %v4955_v34  ;;  %6641 = vst [vmem:[#allocation84_spill] sm:$0xff] %v4957_v57  ;;  %v1916_v55 = vrot.slane %v1901_v31, 6  ;;  %v1940_v5 = vmul.f32 %v1935_v20, %v4212_v11  ;;  %v1938_v0 = vmul.f32 %v1935_v20, %v4256_v40  ;;  %v111_v16 = vmax.f32 %v109_v58, %v110_v13 }
 0x1e7   :  { %1884 = vrot.lane.b32.xlu1 %v1877_v56, %s4125_s7  ;;  %1918 = vrot.lane.b32.xlu0 %v1910_v42, %s4126_s10  ;;  %v4031_v56 = vld [vmem:[#allocation2 + $0x50] sm:$0xff]  ;;  %v94_v9 = vmax.f32 %v92_v35, %v93_v21  ;;  %v100_v31 = vsel %vm55_vm0, %v4034_v4, -inf  ;;  %v1950_v35 = vsel %vm1715_vm8, %v1948_v30, %v1949_v27  ;;  %v1941_v21 = vmul.f32 %v1935_v20, %v4262_v45 }
 0x1e8   :  { %v103_v42 = vsel %vm55_vm0, %v4031_v56, -inf  ;;  %v1939_v56 = vmul.f32 %v1935_v20, %v4199_v2  ;;  %v1917_v44 = vsel %vm1715_vm8, %v1914_v48, %v1916_v55  ;;  %v1951_v4 = vrot.slane %v1938_v0, 6  ;;  %v4037_v48 = vld [vmem:[#allocation2 + $0x70] sm:$0xff] }
 0x1e9   :  { %v4973_v57 = vpop.permute.xlu1 %1259  ;;  %v4975_v34 = vpop.permute.xlu0 %1293  ;;  %v107_v55 = vsel %vm55_vm0, %v4037_v48, -inf  ;;  %v1956_v0 = vrot.slane %v1941_v21, 6 }
 0x1ea   :  { %6642 = vst [vmem:[#allocation85_spill] sm:$0xff] %v4973_v57  ;;  %6643 = vst [vmem:[#allocation86_spill] sm:$0xff] %v4975_v34  ;;  %v99_v34 = vmax.f32 %v97_v43, %v98_v41  ;;  %v104_v57 = vmax.f32 %v102_v59, %v103_v42  ;;  %v1954_v41 = vrot.slane %v1940_v5, 6  ;;  %v1953_v43 = vrot.slane %v1939_v56, 6  ;;  %v4038_v5 = vld [vmem:[#allocation2 + $0x78] sm:$0xff] }
 0x1eb   :  { %1920 = vrot.lane.b32.xlu1 %v1912_v47, %s4126_s10  ;;  %1922 = vrot.lane.b32.xlu0 %v1915_v22, %s4126_s10  ;;  %v105_v47 = vsel %vm55_vm0, %v4035_v46, -inf  ;;  %v4036_v22 = vld [vmem:[#allocation2 + $0x68] sm:$0xff]  ;;  %v1978_v59 = vrot.slane %v94_v9, 5  ;;  %v114_v20 = vsel %vm55_vm0, %v4038_v5, -inf }
 0x1ec   :  { %v112_v15 = vsel %vm55_vm0, %v4036_v22, -inf  ;;  %v101_v42 = vmax.f32 %v99_v34, %v100_v31  ;;  %v106_v58 = vmax.f32 %v104_v57, %v105_v47  ;;  %v1955_v30 = vsel %vm1715_vm8, %v1953_v43, %v1954_v41 }
 0x1ed   :  { %v4989_v14 = vpop.permute.xlu1 %1295  ;;  %v4991_v60 = vpop.permute.xlu0 %1297  ;;  %v113_v46 = vmax.f32 %v111_v16, %v112_v15  ;;  %v1988_v34 = vsel %vm120_vm1, 0.0, %v1978_v59  ;;  %v1957_v47 = vsel %vm1715_vm8, %v1954_v41, %v1956_v0 }
 0x1ee   :  { %v1979_v57 = vrot.slane %v101_v42, 5  ;;  %v108_v56 = vmax.f32 %v106_v58, %v107_v55 }
 0x1ef   :  { %1924 = vrot.lane.b32.xlu1 %v1917_v44, %s4126_s10  ;;  %1958 = vrot.lane.b32.xlu0 %v1950_v35, %s4127_s12  ;;  %v1952_v44 = vsel %vm1715_vm8, %v1949_v27, %v1951_v4  ;;  %v115_v9 = vmax.f32 %v113_v46, %v114_v20 }
 0x1f0   :  { %v1980_v27 = vsel %vm120_vm1, %v1978_v59, %v1979_v57  ;;  %v1990_v15 = vsel %vm120_vm1, %v1979_v57, 0.0  ;;  %v1981_v35 = vrot.slane %v108_v56, 5 }
 0x1f1   :  { %v5000_v13 = vpop.permute.xlu1 %1299  ;;  %v5002_v22 = vpop.permute.xlu0 %1333  ;;  %v1982_v21 = vrot.slane %v115_v9, 5 }
 0x1f2   :  { %v1989_v41 = vsel %vm120_vm1, 0.0, %v1981_v35 }
 0x1f3   :  { %1960 = vrot.lane.b32.xlu1 %v1952_v44, %s4127_s12  ;;  %1962 = vrot.lane.b32.xlu0 %v1955_v30, %s4127_s12  ;;  %v1983_v42 = vsel %vm120_vm1, %v1981_v35, %v1982_v21  ;;  %v1991_v59 = vsel %vm120_vm1, %v1982_v21, 0.0 }
 0x1f5   :  { %v5011_v16 = vpop.permute.xlu1 %1335  ;;  %v5013_v31 = vpop.permute.xlu0 %1337 }
 0x1f7   :  { %1964 = vrot.lane.b32.xlu1 %v1957_v47, %s4127_s12  ;;  %1996 = vrot.lane.b32.xlu0 %v1988_v34, %s4121_s0 }
 0x1f9   :  { %v5020_v4 = vpop.permute.xlu1 %1339  ;;  %v5022_v43 = vpop.permute.xlu0 %1373 }
 0x1fa   :  { %6644 = vst [vmem:[#allocation87_spill] sm:$0xff] %v5020_v4  ;;  %6645 = vst [vmem:[#allocation88_spill] sm:$0xff] %v5022_v43 }
 0x1fb   :  { %1998 = vrot.lane.b32.xlu1 %v1980_v27, %s4121_s0  ;;  %2000 = vrot.lane.b32.xlu0 %v1990_v15, %s4121_s0 }
 0x1fd   :  { %v5028_v58 = vpop.permute.xlu1 %1375  ;;  %v5030_v46 = vpop.permute.xlu0 %1377 }
 0x1fe   :  { %6646 = vst [vmem:[#allocation89_spill] sm:$0xff] %v5028_v58  ;;  %6647 = vst [vmem:[#allocation90_spill] sm:$0xff] %v5030_v46  ;;  %v2141_v46 = vstv %s3951_s9  ;;  %s5835_s9 = sld [smem:[#allocation6 + $0x4b]] }
 0x1ff   :  { %2002 = vrot.lane.b32.xlu1 %v1989_v41, %s4121_s0  ;;  %2004 = vrot.lane.b32.xlu0 %v1983_v42, %s4121_s0 }
 0x201   :  { %v5035_v48 = vpop.permute.xlu1 %1379  ;;  %v5037_v55 = vpop.permute.xlu0 %1413 }
 0x202   :  { %6648 = vst [vmem:[#allocation91_spill] sm:$0xff] %v5035_v48  ;;  %6649 = vst [vmem:[#allocation92_spill] sm:$0xff] %v5037_v55 }
 0x203   :  { %2006 = vrot.lane.b32.xlu1 %v1991_v59, %s4121_s0  ;;  %s3947_s0 = sld [smem:[#allocation6 + $0x32]] }
 0x205   :  { %v5040_v5 = vpop.permute.xlu1 %1415  ;;  %v5042_v20 = vpop.permute.xlu0 %1417 }
 0x206   :  { %6650 = vst [vmem:[#allocation93_spill] sm:$0xff] %v5040_v5  ;;  %6651 = vst [vmem:[#allocation94_spill] sm:$0xff] %v5042_v20 }
 0x209   :  { %v5044_v44 = vpop.permute.xlu1 %1419  ;;  %v5046_v30 = vpop.permute.xlu0 %1485 }
 0x20a   :  { %6652 = vst [vmem:[#allocation95_spill] sm:$0xff] %v5044_v44  ;;  %6653 = vst [vmem:[#allocation96_spill] sm:$0xff] %v5046_v30  ;;  %v2063_v30 = vstv %s3948_s27  ;;  %s5604_s27 = sld [smem:[#allocation6 + $0x2a]] }
 0x20d   :  { %v5048_v0 = vpop.permute.xlu1 %1487  ;;  %v5050_v34 = vpop.permute.xlu0 %1489 }
 0x20e   :  { %6654 = vst [vmem:[#allocation97_spill] sm:$0xff] %v5048_v0  ;;  %6655 = vst [vmem:[#allocation98_spill] sm:$0xff] %v5050_v34 }
 0x211   :  { %v5052_v57 = vpop.permute.xlu1 %1491  ;;  %v5054_v56 = vpop.permute.xlu0 %1525 }
 0x212   :  { %6656 = vst [vmem:[#allocation99_spill] sm:$0xff] %v5052_v57  ;;  %6657 = vst [vmem:[#allocation100_spill] sm:$0xff] %v5054_v56 }
 0x215   :  { %v5056_v9 = vpop.permute.xlu1 %1527  ;;  %v5058_v47 = vpop.permute.xlu0 %1529 }
 0x216   :  { %6658 = vst [vmem:[#allocation101_spill] sm:$0xff] %v5056_v9  ;;  %6659 = vst [vmem:[#allocation102_spill] sm:$0xff] %v5058_v47 }
 0x219   :  { %v5060_v27 = vpop.permute.xlu1 %1531  ;;  %v5062_v15 = vpop.permute.xlu0 %1565 }
 0x21a   :  { %6660 = vst [vmem:[#allocation103_spill] sm:$0xff] %v5060_v27  ;;  %6661 = vst [vmem:[#allocation104_spill] sm:$0xff] %v5062_v15 }
 0x21d   :  { %v5064_v35 = vpop.permute.xlu1 %1567  ;;  %v5066_v21 = vpop.permute.xlu0 %1569 }
 0x21e   :  { %6662 = vst [vmem:[#allocation105_spill] sm:$0xff] %v5064_v35  ;;  %6663 = vst [vmem:[#allocation106_spill] sm:$0xff] %v5066_v21 }
 0x221   :  { %v5068_v41 = vpop.permute.xlu1 %1571  ;;  %v5070_v42 = vpop.permute.xlu0 %1605 }
 0x222   :  { %6664 = vst [vmem:[#allocation107_spill] sm:$0xff] %v5068_v41  ;;  %6665 = vst [vmem:[#allocation108_spill] sm:$0xff] %v5070_v42 }
 0x225   :  { %v5072_v59 = vpop.permute.xlu1 %1607  ;;  %v5074_v57 = vpop.permute.xlu0 %1609 }
 0x226   :  { %6666 = vst [vmem:[#allocation109_spill] sm:$0xff] %v5072_v59  ;;  %6667 = vst [vmem:[#allocation110_spill] sm:$0xff] %v5074_v57 }
 0x229   :  { %v5076_v56 = vpop.permute.xlu1 %1611  ;;  %v5078_v9 = vpop.permute.xlu0 %1645 }
 0x22a   :  { %6668 = vst [vmem:[#allocation111_spill] sm:$0xff] %v5076_v56  ;;  %6669 = vst [vmem:[#allocation112_spill] sm:$0xff] %v5078_v9 }
 0x22d   :  { %v5080_v47 = vpop.permute.xlu1 %1647  ;;  %v5082_v27 = vpop.permute.xlu0 %1649 }
 0x22e   :  { %6670 = vst [vmem:[#allocation113_spill] sm:$0xff] %v5080_v47  ;;  %6671 = vst [vmem:[#allocation114_spill] sm:$0xff] %v5082_v27 }
 0x231   :  { %v5084_v15 = vpop.permute.xlu1 %1651  ;;  %v5086_v35 = vpop.permute.xlu0 %1685 }
 0x232   :  { %6672 = vst [vmem:[#allocation115_spill] sm:$0xff] %v5084_v15  ;;  %6673 = vst [vmem:[#allocation116_spill] sm:$0xff] %v5086_v35 }
 0x235   :  { %v5088_v21 = vpop.permute.xlu1 %1687  ;;  %v5090_v41 = vpop.permute.xlu0 %1689 }
 0x236   :  { %6674 = vst [vmem:[#allocation117_spill] sm:$0xff] %v5088_v21  ;;  %6675 = vst [vmem:[#allocation118_spill] sm:$0xff] %v5090_v41 }
 0x239   :  { %v5092_v42 = vpop.permute.xlu1 %1691  ;;  %v5094_v59 = vpop.permute.xlu0 %1758 }
 0x23a   :  { %6676 = vst [vmem:[#allocation119_spill] sm:$0xff] %v5092_v42  ;;  %6677 = vst [vmem:[#allocation120_spill] sm:$0xff] %v5094_v59 }
 0x23d   :  { %v5096_v57 = vpop.permute.xlu1 %1760  ;;  %v5098_v56 = vpop.permute.xlu0 %1762 }
 0x23e   :  { %6678 = vst [vmem:[#allocation121_spill] sm:$0xff] %v5096_v57  ;;  %6679 = vst [vmem:[#allocation122_spill] sm:$0xff] %v5098_v56 }
 0x241   :  { %v5100_v9 = vpop.permute.xlu1 %1764  ;;  %v5102_v47 = vpop.permute.xlu0 %1798 }
 0x242   :  { %6680 = vst [vmem:[#allocation123_spill] sm:$0xff] %v5100_v9  ;;  %6681 = vst [vmem:[#allocation124_spill] sm:$0xff] %v5102_v47 }
 0x245   :  { %v5104_v27 = vpop.permute.xlu1 %1800  ;;  %v5106_v15 = vpop.permute.xlu0 %1802 }
 0x246   :  { %6682 = vst [vmem:[#allocation125_spill] sm:$0xff] %v5104_v27  ;;  %6683 = vst [vmem:[#allocation126_spill] sm:$0xff] %v5106_v15 }
 0x249   :  { %v5108_v35 = vpop.permute.xlu1 %1804  ;;  %v5110_v21 = vpop.permute.xlu0 %1838 }
 0x24a   :  { %6684 = vst [vmem:[#allocation127_spill] sm:$0xff] %v5108_v35  ;;  %6685 = vst [vmem:[#allocation128_spill] sm:$0xff] %v5110_v21 }
 0x24d   :  { %v5112_v41 = vpop.permute.xlu1 %1840  ;;  %v5114_v42 = vpop.permute.xlu0 %1842 }
 0x24e   :  { %6686 = vst [vmem:[#allocation129_spill] sm:$0xff] %v5112_v41  ;;  %6687 = vst [vmem:[#allocation130_spill] sm:$0xff] %v5114_v42  ;;  %v2037_v42 = vstv %s3947_s0  ;;  %s5569_s0 = sld [smem:[#allocation6 + $0x44]] }
 0x251   :  { %v5116_v59 = vpop.permute.xlu1 %1844  ;;  %v5118_v57 = vpop.permute.xlu0 %1878 }
 0x252   :  { %6688 = vst [vmem:[#allocation131_spill] sm:$0xff] %v5116_v59  ;;  %6689 = vst [vmem:[#allocation132_spill] sm:$0xff] %v5118_v57 }
 0x255   :  { %v5120_v56 = vpop.permute.xlu1 %1880  ;;  %v5122_v9 = vpop.permute.xlu0 %1882 }
 0x256   :  { %6690 = vst [vmem:[#allocation133_spill] sm:$0xff] %v5120_v56  ;;  %6691 = vst [vmem:[#allocation134_spill] sm:$0xff] %v5122_v9 }
 0x259   :  { %v5124_v47 = vpop.permute.xlu1 %1884  ;;  %v5126_v27 = vpop.permute.xlu0 %1918 }
 0x25a   :  { %6692 = vst [vmem:[#allocation135_spill] sm:$0xff] %v5124_v47  ;;  %6693 = vst [vmem:[#allocation136_spill] sm:$0xff] %v5126_v27 }
 0x25d   :  { %v5128_v15 = vpop.permute.xlu1 %1920  ;;  %v5130_v35 = vpop.permute.xlu0 %1922 }
 0x25e   :  { %6694 = vst [vmem:[#allocation137_spill] sm:$0xff] %v5128_v15  ;;  %6695 = vst [vmem:[#allocation138_spill] sm:$0xff] %v5130_v35 }
 0x261   :  { %v5132_v21 = vpop.permute.xlu1 %1924  ;;  %v5134_v41 = vpop.permute.xlu0 %1958 }
 0x262   :  { %6696 = vst [vmem:[#allocation139_spill] sm:$0xff] %v5132_v21  ;;  %6697 = vst [vmem:[#allocation140_spill] sm:$0xff] %v5134_v41 }
 0x265   :  { %v5136_v59 = vpop.permute.xlu1 %1960  ;;  %v5138_v57 = vpop.permute.xlu0 %1962 }
 0x266   :  { %6698 = vst [vmem:[#allocation141_spill] sm:$0xff] %v5136_v59  ;;  %6699 = vst [vmem:[#allocation142_spill] sm:$0xff] %v5138_v57 }
 0x269   :  { %v5140_v56 = vpop.permute.xlu1 %1964  ;;  %v1997_v9 = vpop.permute.xlu0 %1996 }
 0x26a   :  { %6700 = vst [vmem:[#allocation143_spill] sm:$0xff] %v5140_v56  ;;  %v2014_v47 = vsel %vm157_vm2, 0.0, %v1997_v9 }
 0x26b   :  { %v5144_v27 = vsel %vm164_vm3, %v2014_v47, 0.0 }
 0x26c   :  { %v2038_v35 = vmul.f32 %v2037_v42, %v5144_v27 }
 0x26d   :  { %v1999_v15 = vpop.permute.xlu1 %1998  ;;  %v5147_v21 = vpop.permute.xlu0 %2000 }
 0x26e   :  { %v2015_v41 = vsel %vm157_vm2, 0.0, %v1999_v15  ;;  %2046 = vrot.lane.b32.xlu0 %v2038_v35, %s4122_s29 }
 0x26f   :  { %v5152_v57 = vsel %vm164_vm3, %v2015_v41, 0.0 }
 0x270   :  { %v2039_v56 = vmul.f32 %v2037_v42, %v5152_v57 }
 0x271   :  { %v2003_v59 = vpop.permute.xlu1 %2002  ;;  %v2005_v9 = vpop.permute.xlu0 %2004 }
 0x272   :  { %v2017_v47 = vsel %vm157_vm2, 0.0, %v2003_v59  ;;  %v2018_v34 = vsel %vm157_vm2, 0.0, %v2005_v9  ;;  %2048 = vrot.lane.b32.xlu1 %v2039_v56, %s4122_s29  ;;  %v2064_v59 = vmul.f32 %v2063_v30, %v5144_v27  ;;  %v2065_v56 = vmul.f32 %v2063_v30, %v5152_v57 }
 0x273   :  { %v5159_v0 = vsel %vm164_vm3, %v2017_v47, 0.0  ;;  %v5162_v15 = vsel %vm164_vm3, %v2018_v34, 0.0  ;;  %v2089_v47 = vstv %s3949_s28  ;;  %s5610_s28 = sld [smem:[#allocation6 + $0x45]] }
 0x274   :  { %v2040_v35 = vmul.f32 %v2037_v42, %v5159_v0  ;;  %v2041_v41 = vmul.f32 %v2037_v42, %v5162_v15  ;;  %v2066_v34 = vmul.f32 %v2063_v30, %v5159_v0  ;;  %v2067_v9 = vmul.f32 %v2063_v30, %v5162_v15 }
 0x275   :  { %v2090_v42 = vmul.f32 %v2089_v47, %v5144_v27  ;;  %v2093_v30 = vmul.f32 %v2089_v47, %v5162_v15 }
 0x276   :  { %2050 = vrot.lane.b32.xlu0 %v2040_v35, %s4122_s29  ;;  %2052 = vrot.lane.b32.xlu1 %v2041_v41, %s4122_s29  ;;  %v2091_v35 = vmul.f32 %v2089_v47, %v5152_v57  ;;  %v2092_v41 = vmul.f32 %v2089_v47, %v5159_v0 }
 0x27a   :  { %2072 = vrot.lane.b32.xlu0 %v2064_v59, %s4123_s3  ;;  %2074 = vrot.lane.b32.xlu1 %v2065_v56, %s4123_s3  ;;  %v2115_v59 = vstv %s3950_s30  ;;  %v338_v56 = vstv %s3904_s4  ;;  %s5667_s30 = sld [smem:[#allocation6 + $0x47]]  ;;  %s5708_s4 = sld [smem:[#allocation6 + $0x48]] }
 0x27b   :  { %v2118_v5 = vmul.f32 %v2115_v59, %v5159_v0  ;;  %v2119_v55 = vmul.f32 %v2115_v59, %v5162_v15 }
 0x27e   :  { %2076 = vrot.lane.b32.xlu0 %v2066_v34, %s4123_s3  ;;  %2078 = vrot.lane.b32.xlu1 %v2067_v9, %s4123_s3  ;;  %v172_v34 = vstv %s171_s6  ;;  %v2116_v9 = vmul.f32 %v2115_v59, %v5144_v27  ;;  %s5738_s6 = sld [smem:[#allocation6 + $0x49]] }
 0x27f   :  { %v173_v47 = vmul.f32 %v172_v34, %v4194_v62  ;;  %v174_v44 = vmul.f32 %v172_v34, %v4205_v6  ;;  %v176_v20 = vmul.f32 %v172_v34, %v4212_v11 }
 0x281   :  { %v203_v48 = vadd.f32 %v4387_v18, %v173_v47  ;;  %v206_v43 = vadd.f32 %v4407_v38, %v176_v20  ;;  %v2142_v20 = vmul.f32 %v2141_v46, %v5144_v27 }
 0x282   :  { %2098 = vrot.lane.b32.xlu0 %v2090_v42, %s4124_s5  ;;  %2100 = vrot.lane.b32.xlu1 %v2091_v35, %s4124_s5  ;;  %v2117_v42 = vmul.f32 %v2115_v59, %v5152_v57  ;;  %v5187_v35 = vmul.f32 %v338_v56, %v4194_v62  ;;  %v343_v59 = vmul.f32 %v338_v56, %v4212_v11 }
 0x283   :  { %v229_v18 = vadd.f32 %v4409_v39, %v203_v48  ;;  %v232_v38 = vadd.f32 %v4429_v61, %v206_v43 }
 0x284   :  { %v352_v4 = vrot.slane %v5187_v35, 1  ;;  %v358_v43 = vrot.slane %v343_v59, 1 }
 0x285   :  { %v258_v47 = vadd.f32 %v4451_v23, %v232_v38 }
 0x286   :  { %2102 = vrot.lane.b32.xlu0 %v2092_v41, %s4124_s5  ;;  %2104 = vrot.lane.b32.xlu1 %v2093_v30, %s4124_s5  ;;  %v5193_v41 = vstv %s3911_s8  ;;  %v175_v30 = vmul.f32 %v172_v34, %v4199_v2  ;;  %v5207_v34 = vstv %s3918_s11  ;;  %s5786_s8 = sld [smem:[#allocation6 + $0x4a]]  ;;  %s5861_s11 = sld [smem:[#allocation6 + $0x4c]] }
 0x287   :  { %v284_v23 = vadd.f32 %v4473_v52, %v258_v47 }
 0x288   :  { %v205_v58 = vadd.f32 %v4398_v29, %v175_v30  ;;  %v344_v30 = vmul.f32 %v338_v56, %v4262_v45 }
 0x28a   :  { %2124 = vrot.lane.b32.xlu0 %v2116_v9, %s4125_s7  ;;  %2126 = vrot.lane.b32.xlu1 %v2117_v42, %s4125_s7  ;;  %v204_v9 = vadd.f32 %v4396_v28, %v174_v44  ;;  %v340_v42 = vmul.f32 %v338_v56, %v4205_v6  ;;  %v341_v44 = vmul.f32 %v338_v56, %v4256_v40  ;;  %v360_v52 = vrot.slane %v344_v30, 1 }
 0x28b   :  { %v231_v29 = vadd.f32 %v4420_v51, %v205_v58  ;;  %v2016_v51 = vsel %vm157_vm2, 0.0, %v5147_v21  ;;  %v2007_v58 = vpop.permute.xlu1 %2006  ;;  %v2145_v21 = vmul.f32 %v2141_v46, %v5162_v15 }
 0x28c   :  { %v230_v28 = vadd.f32 %v4418_v50, %v204_v9  ;;  %v353_v48 = vrot.slane %v340_v42, 1  ;;  %v342_v50 = vmul.f32 %v338_v56, %v4199_v2  ;;  %v2144_v56 = vmul.f32 %v2141_v46, %v5159_v0 }
 0x28d   :  { %v257_v35 = vadd.f32 %v4442_v12, %v231_v29 }
 0x28e   :  { %2128 = vrot.lane.b32.xlu0 %v2118_v5, %s4125_s7  ;;  %2130 = vrot.lane.b32.xlu1 %v2119_v55, %s4125_s7  ;;  %v2143_v5 = vmul.f32 %v2141_v46, %v5152_v57  ;;  %v255_v55 = vadd.f32 %v4431_v63, %v229_v18  ;;  %v256_v39 = vadd.f32 %v4440_v10, %v230_v28  ;;  %v355_v10 = vrot.slane %v341_v44, 1 }
 0x28f   :  { %v283_v12 = vadd.f32 %v4464_v37, %v257_v35  ;;  %v310_v37 = vadd.f32 %v4495_v17, %v284_v23  ;;  %v357_v28 = vrot.slane %v342_v50, 1  ;;  %v2225_v44 = vstv %s5215_s14  ;;  %s5904_s14 = sld [smem:[#allocation6 + $0x4e]] }
 0x290   :  { %v281_v61 = vadd.f32 %v4453_v24, %v255_v55  ;;  %v282_v63 = vadd.f32 %v4462_v36, %v256_v39  ;;  %v5240_v24 = vsel %vm164_vm3, %v2016_v51, 0.0  ;;  %v2167_v36 = vstv %s5202_s13  ;;  %s5878_s13 = sld [smem:[#allocation6 + $0x31]] }
 0x291   :  { %v309_v18 = vadd.f32 %v4486_v3, %v283_v12  ;;  %v2168_v59 = vmul.f32 %v2167_v36, %v5144_v27  ;;  %v2169_v3 = vmul.f32 %v2167_v36, %v5152_v57  ;;  %v2227_v17 = vmul.f32 %v2225_v44, %v5152_v57 }
 0x292   :  { %2150 = vrot.lane.b32.xlu0 %v2142_v20, %s4126_s10  ;;  %2152 = vrot.lane.b32.xlu1 %v2143_v5, %s4126_s10  ;;  %v307_v9 = vadd.f32 %v4475_v53, %v281_v61  ;;  %v308_v42 = vadd.f32 %v4484_v1, %v282_v63  ;;  %v2019_v1 = vsel %vm157_vm2, 0.0, %v2007_v58  ;;  %v2228_v29 = vmul.f32 %v2225_v44, %v5240_v24 }
 0x293   :  { %v354_v38 = vsel %vm351_vm4, %v352_v4, %v353_v48  ;;  %v356_v20 = vsel %vm351_vm4, %v353_v48, %v355_v10  ;;  %v336_v5 = vadd.f32 %v4517_v49, %v310_v37  ;;  %v612_v55 = vmul.f32 %v5193_v41, %v4194_v62 }
 0x294   :  { %v333_v46 = vadd.f32 %v4497_v19, %v307_v9  ;;  %v334_v53 = vadd.f32 %v4506_v32, %v308_v42  ;;  %v359_v19 = vsel %vm351_vm4, %v357_v28, %v358_v43  ;;  %v335_v32 = vadd.f32 %v4508_v33, %v309_v18 }
 0x295   :  { %v5265_v39 = vsel %vm164_vm3, %v2019_v1, 0.0  ;;  %v2226_v4 = vmul.f32 %v2225_v44, %v5144_v27  ;;  %v361_v35 = vsel %vm351_vm4, %v358_v43, %v360_v52  ;;  %v5273_v33 = vmul.f32 %v5193_v41, %v4205_v6 }
 0x296   :  { %2154 = vrot.lane.b32.xlu0 %v2144_v56, %s4126_s10  ;;  %2156 = vrot.lane.b32.xlu1 %v2145_v21, %s4126_s10  ;;  %v366_v50 = vadd.f32 %v354_v38, %v333_v46  ;;  %v367_v48 = vadd.f32 %v356_v20, %v334_v53  ;;  %v2170_v49 = vmul.f32 %v2167_v36, %v5159_v0  ;;  %v2239_v30 = vrot.slane %v2227_v17, 1  ;;  %v6702_v17 = vld [vmem:[#allocation12_spill] sm:$0xff]  ;;  %v6703_v38 = vld [vmem:[#allocation13_spill] sm:$0xff] }
 0x297   :  { %v2171_v47 = vmul.f32 %v2167_v36, %v5162_v15  ;;  %v2241_v51 = vrot.slane %v2228_v29, 1  ;;  %v368_v61 = vadd.f32 %v359_v19, %v335_v32  ;;  %v2229_v63 = vmul.f32 %v2225_v44, %v5159_v0  ;;  %v6704_v19 = vld [vmem:[#allocation14_spill] sm:$0xff] }
 0x298   :  { %v2230_v10 = vmul.f32 %v2225_v44, %v5162_v15  ;;  %v2231_v12 = vmul.f32 %v2225_v44, %v5265_v39  ;;  %v369_v23 = vadd.f32 %v361_v35, %v336_v5  ;;  %v625_v43 = vrot.slane %v612_v55, 2 }
 0x299   :  { %v5282_v58 = vmul.f32 %v5193_v41, %v4256_v40  ;;  %v2238_v56 = vrot.slane %v2226_v4, 1  ;;  %v406_v21 = vadd.f32 %v4519_v54, %v366_v50  ;;  %v407_v9 = vadd.f32 %v4528_v7, %v367_v48 }
 0x29a   :  { %2176 = vrot.lane.b32.xlu0 %v2168_v59, %s4127_s12  ;;  %2178 = vrot.lane.b32.xlu1 %v2169_v3, %s4127_s12  ;;  %v408_v42 = vadd.f32 %v4530_v8, %v368_v61  ;;  %v2265_v36 = vstv %s5251_s15  ;;  %v409_v18 = vadd.f32 %v4539_v25, %v369_v23  ;;  %v2242_v28 = vsel %vm351_vm4, %v2239_v30, %v2241_v51  ;;  %v6701_v59 = vld [vmem:[#allocation11_spill] sm:$0xff]  ;;  %s5917_s15 = sld [smem:[#allocation6 + $0x38]] }
 0x29b   :  { %v2240_v37 = vsel %vm351_vm4, %v2238_v56, %v2239_v30  ;;  %v2267_v52 = vmul.f32 %v2265_v36, %v5152_v57  ;;  %v2243_v46 = vrot.slane %v2229_v63, 1  ;;  %v2244_v53 = vrot.slane %v2230_v10, 1  ;;  %v6706_v63 = vld [vmem:[#allocation16_spill] sm:$0xff]  ;;  %v6708_v56 = vld [vmem:[#allocation18_spill] sm:$0xff] }
 0x29c   :  { %v2246_v1 = vrot.slane %v2231_v12, 1  ;;  %v2268_v54 = vmul.f32 %v2265_v36, %v5240_v24  ;;  %v446_v7 = vadd.f32 %v4541_v26, %v406_v21  ;;  %v626_v8 = vrot.slane %v5273_v33, 2  ;;  %v6707_v12 = vld [vmem:[#allocation17_spill] sm:$0xff] }
 0x29d   :  { %v615_v44 = vmul.f32 %v5193_v41, %v4199_v2  ;;  %v2266_v25 = vmul.f32 %v2265_v36, %v5144_v27  ;;  %v447_v3 = vadd.f32 %v6701_v59, %v407_v9  ;;  %v448_v29 = vadd.f32 %v6702_v17, %v408_v42  ;;  %v6709_v42 = vld [vmem:[#allocation19_spill] sm:$0xff]  ;;  %v6711_v59 = vld [vmem:[#allocation21_spill] sm:$0xff]  ;;  %v6712_v17 = vld [vmem:[#allocation22_spill] sm:$0xff] }
 0x29e   :  { %2180 = vrot.lane.b32.xlu0 %v2170_v49, %s4127_s12  ;;  %2182 = vrot.lane.b32.xlu1 %v2171_v47, %s4127_s12  ;;  %v449_v20 = vadd.f32 %v6703_v38, %v409_v18  ;;  %v5309_v26 = vmul.f32 %v5193_v41, %v4212_v11  ;;  %v486_v32 = vadd.f32 %v6704_v19, %v446_v7  ;;  %v2279_v5 = vrot.slane %v2267_v52, 1  ;;  %v6705_v49 = vld [vmem:[#allocation15_spill] sm:$0xff] }
 0x29f   :  { %v2269_v55 = vmul.f32 %v2265_v36, %v5159_v0  ;;  %v2270_v4 = vmul.f32 %v2265_v36, %v5162_v15  ;;  %v2245_v50 = vsel %vm351_vm4, %v2243_v46, %v2244_v53  ;;  %v2247_v48 = vsel %vm351_vm4, %v2244_v53, %v2246_v1  ;;  %v6710_v53 = vld [vmem:[#allocation20_spill] sm:$0xff]  ;;  %v6713_v38 = vld [vmem:[#allocation23_spill] sm:$0xff] }
 0x2a0   :  { %v2281_v35 = vrot.slane %v2268_v54, 1  ;;  %v2271_v33 = vmul.f32 %v2265_v36, %v5265_v39  ;;  %v487_v47 = vadd.f32 %v6705_v49, %v447_v3  ;;  %v627_v30 = vsel %vm624_vm5, %v625_v43, %v626_v8 }
 0x2a1   :  { %v628_v51 = vrot.slane %v5282_v58, 2  ;;  %v2278_v61 = vrot.slane %v2266_v25, 1  ;;  %v488_v10 = vadd.f32 %v6706_v63, %v448_v29  ;;  %v489_v23 = vadd.f32 %v6707_v12, %v449_v20 }
 0x2a2   :  { %2248 = vrot.lane.b32.xlu0 %v2240_v37, %s4122_s29  ;;  %2250 = vrot.lane.b32.xlu1 %v2242_v28, %s4122_s29  ;;  %v526_v21 = vadd.f32 %v6708_v56, %v486_v32  ;;  %v2305_v9 = vstv %s5290_s16  ;;  %v527_v36 = vadd.f32 %v6709_v42, %v487_v47  ;;  %v2283_v37 = vrot.slane %v2269_v55, 1  ;;  %v6714_v32 = vld [vmem:[#allocation24_spill] sm:$0xff]  ;;  %s5936_s16 = sld [smem:[#allocation6 + $0x4f]] }
 0x2a3   :  { %v2280_v18 = vsel %vm351_vm4, %v2278_v61, %v2279_v5  ;;  %v2307_v43 = vmul.f32 %v2305_v9, %v5152_v57  ;;  %v2282_v58 = vsel %vm351_vm4, %v2279_v5, %v2281_v35  ;;  %v2284_v28 = vrot.slane %v2270_v4, 1  ;;  %v6715_v61 = vld [vmem:[#allocation25_spill] sm:$0xff] }
 0x2a4   :  { %v2286_v52 = vrot.slane %v2271_v33, 1  ;;  %v2308_v46 = vmul.f32 %v2305_v9, %v5240_v24  ;;  %v528_v1 = vadd.f32 %v6710_v53, %v488_v10  ;;  %v631_v54 = vrot.slane %v5309_v26, 2  ;;  %v6716_v10 = vld [vmem:[#allocation26_spill] sm:$0xff] }
 0x2a5   :  { %v617_v7 = vmul.f32 %v5193_v41, %v4262_v45  ;;  %v2306_v25 = vmul.f32 %v2305_v9, %v5144_v27  ;;  %v529_v3 = vadd.f32 %v6711_v59, %v489_v23  ;;  %v566_v29 = vadd.f32 %v6712_v17, %v526_v21  ;;  %v6717_v23 = vld [vmem:[#allocation27_spill] sm:$0xff]  ;;  %v6718_v21 = vld [vmem:[#allocation28_spill] sm:$0xff] }
 0x2a6   :  { %2252 = vrot.lane.b32.xlu0 %v2245_v50, %s4122_s29  ;;  %2254 = vrot.lane.b32.xlu1 %v2247_v48, %s4122_s29  ;;  %v567_v20 = vadd.f32 %v6713_v38, %v527_v36  ;;  %v630_v19 = vrot.slane %v615_v44, 2  ;;  %v568_v5 = vadd.f32 %v6714_v32, %v528_v1  ;;  %v2319_v55 = vrot.slane %v2307_v43, 1 }
 0x2a7   :  { %v2309_v26 = vmul.f32 %v2305_v9, %v5159_v0  ;;  %v2310_v41 = vmul.f32 %v2305_v9, %v5162_v15  ;;  %v2285_v4 = vsel %vm351_vm4, %v2283_v37, %v2284_v28  ;;  %v2287_v50 = vsel %vm351_vm4, %v2284_v28, %v2286_v52  ;;  %v6719_v52 = vld [vmem:[#allocation29_spill] sm:$0xff] }
 0x2a8   :  { %v2321_v48 = vrot.slane %v2308_v46, 1  ;;  %v2311_v35 = vmul.f32 %v2305_v9, %v5265_v39  ;;  %v629_v33 = vsel %vm624_vm5, %v626_v8, %v628_v51  ;;  %v632_v49 = vsel %vm624_vm5, %v630_v19, %v631_v54 }
 0x2a9   :  { %v633_v44 = vrot.slane %v617_v7, 2  ;;  %v2318_v47 = vrot.slane %v2306_v25, 1  ;;  %v569_v63 = vadd.f32 %v6715_v61, %v529_v3  ;;  %v606_v12 = vadd.f32 %v6716_v10, %v566_v29 }
 0x2aa   :  { %2288 = vrot.lane.b32.xlu0 %v2280_v18, %s4123_s3  ;;  %2290 = vrot.lane.b32.xlu1 %v2282_v58, %s4123_s3  ;;  %v607_v56 = vadd.f32 %v6717_v23, %v567_v20  ;;  %v608_v42 = vadd.f32 %v6718_v21, %v568_v5  ;;  %v2323_v51 = vrot.slane %v2309_v26, 1  ;;  %v2324_v9 = vrot.slane %v2310_v41, 1  ;;  %v6720_v5 = vld [vmem:[#allocation30_spill] sm:$0xff] }
 0x2ab   :  { %v2320_v8 = vsel %vm351_vm4, %v2318_v47, %v2319_v55  ;;  %v2345_v36 = vstv %s5329_s17  ;;  %v2322_v18 = vsel %vm351_vm4, %v2319_v55, %v2321_v48  ;;  %v2326_v37 = vrot.slane %v2311_v35, 1  ;;  %v6722_v48 = vld [vmem:[#allocation32_spill] sm:$0xff]  ;;  %s5967_s17 = sld [smem:[#allocation6 + $0x3f]] }
 0x2ac   :  { %v2347_v43 = vmul.f32 %v2345_v36, %v5152_v57  ;;  %v2348_v58 = vmul.f32 %v2345_v36, %v5240_v24  ;;  %v634_v28 = vsel %vm624_vm5, %v631_v54, %v633_v44  ;;  %v609_v46 = vadd.f32 %v6719_v52, %v569_v63  ;;  %v6723_v44 = vld [vmem:[#allocation33_spill] sm:$0xff] }
 0x2ad   :  { %v885_v53 = vmul.f32 %v5207_v34, %v4194_v62  ;;  %v639_v1 = vadd.f32 %v627_v30, %v606_v12  ;;  %v640_v7 = vadd.f32 %v629_v33, %v607_v56  ;;  %v5372_v25 = vmul.f32 %v5207_v34, %v4205_v6 }
 0x2ae   :  { %2292 = vrot.lane.b32.xlu0 %v2285_v4, %s4123_s3  ;;  %2294 = vrot.lane.b32.xlu1 %v2287_v50, %s4123_s3  ;;  %v2346_v59 = vmul.f32 %v2345_v36, %v5144_v27  ;;  %v641_v3 = vadd.f32 %v632_v49, %v608_v42  ;;  %v2325_v54 = vsel %vm351_vm4, %v2323_v51, %v2324_v9  ;;  %v2359_v20 = vrot.slane %v2347_v43, 1  ;;  %v6721_v4 = vld [vmem:[#allocation31_spill] sm:$0xff]  ;;  %v6724_v42 = vld [vmem:[#allocation34_spill] sm:$0xff]  ;;  %v6726_v43 = vld [vmem:[#allocation36_spill] sm:$0xff] }
 0x2af   :  { %v2349_v17 = vmul.f32 %v2345_v36, %v5159_v0  ;;  %v2350_v29 = vmul.f32 %v2345_v36, %v5162_v15  ;;  %v2327_v38 = vsel %vm351_vm4, %v2324_v9, %v2326_v37  ;;  %v2361_v19 = vrot.slane %v2348_v58, 1 }
 0x2b0   :  { %v2351_v30 = vmul.f32 %v2345_v36, %v5265_v39  ;;  %v642_v32 = vadd.f32 %v634_v28, %v609_v46  ;;  %v679_v55 = vadd.f32 %v6720_v5, %v639_v1  ;;  %v898_v26 = vrot.slane %v885_v53, 3  ;;  %v6727_v28 = vld [vmem:[#allocation37_spill] sm:$0xff]  ;;  %v6728_v53 = vld [vmem:[#allocation38_spill] sm:$0xff]  ;;  %v6730_v5 = vld [vmem:[#allocation40_spill] sm:$0xff] }
 0x2b1   :  { %v5383_v41 = vmul.f32 %v5207_v34, %v4256_v40  ;;  %v680_v50 = vadd.f32 %v6721_v4, %v640_v7  ;;  %v681_v35 = vadd.f32 %v6722_v48, %v641_v3  ;;  %v2358_v33 = vrot.slane %v2346_v59, 1  ;;  %v6731_v4 = vld [vmem:[#allocation41_spill] sm:$0xff]  ;;  %v6732_v48 = vld [vmem:[#allocation42_spill] sm:$0xff] }
 0x2b2   :  { %2328 = vrot.lane.b32.xlu0 %v2320_v8, %s4124_s5  ;;  %2330 = vrot.lane.b32.xlu1 %v2322_v18, %s4124_s5  ;;  %v2385_v49 = vstv %s5357_s18  ;;  %v682_v47 = vadd.f32 %v6723_v44, %v642_v32  ;;  %v2363_v61 = vrot.slane %v2349_v17, 1  ;;  %v2364_v63 = vrot.slane %v2350_v29, 1  ;;  %v6725_v18 = vld [vmem:[#allocation35_spill] sm:$0xff]  ;;  %s5980_s18 = sld [smem:[#allocation6 + $0x50]] }
 0x2b3   :  { %v2387_v10 = vmul.f32 %v2385_v49, %v5152_v57  ;;  %v2360_v12 = vsel %vm351_vm4, %v2358_v33, %v2359_v20  ;;  %v2362_v23 = vsel %vm351_vm4, %v2359_v20, %v2361_v19  ;;  %v2366_v56 = vrot.slane %v2351_v30, 1 }
 0x2b4   :  { %v2388_v21 = vmul.f32 %v2385_v49, %v5240_v24  ;;  %v719_v8 = vadd.f32 %v6724_v42, %v679_v55  ;;  %v899_v51 = vrot.slane %v5372_v25, 3  ;;  %v5401_v9 = vmul.f32 %v5207_v34, %v4199_v2 }
 0x2b5   :  { %v2386_v36 = vmul.f32 %v2385_v49, %v5144_v27  ;;  %v720_v37 = vadd.f32 %v6725_v18, %v680_v50  ;;  %v721_v58 = vadd.f32 %v6726_v43, %v681_v35  ;;  %v722_v52 = vadd.f32 %v6727_v28, %v682_v47 }
 0x2b6   :  { %2332 = vrot.lane.b32.xlu0 %v2325_v54, %s4124_s5  ;;  %2334 = vrot.lane.b32.xlu1 %v2327_v38, %s4124_s5  ;;  %v5411_v46 = vmul.f32 %v5207_v34, %v4212_v11  ;;  %v759_v1 = vadd.f32 %v6728_v53, %v719_v8  ;;  %v2365_v7 = vsel %vm351_vm4, %v2363_v61, %v2364_v63  ;;  %v2399_v25 = vrot.slane %v2387_v10, 1  ;;  %v6729_v38 = vld [vmem:[#allocation39_spill] sm:$0xff]  ;;  %v6738_v53 = vld [vmem:[#allocation48_spill] sm:$0xff] }
 0x2b7   :  { %v2389_v59 = vmul.f32 %v2385_v49, %v5159_v0  ;;  %v2367_v3 = vsel %vm351_vm4, %v2364_v63, %v2366_v56  ;;  %v2401_v54 = vrot.slane %v2388_v21, 1  ;;  %v2390_v17 = vmul.f32 %v2385_v49, %v5162_v15 }
 0x2b8   :  { %v2391_v29 = vmul.f32 %v2385_v49, %v5265_v39  ;;  %v760_v20 = vadd.f32 %v6729_v38, %v720_v37  ;;  %v900_v19 = vsel %vm897_vm6, %v898_v26, %v899_v51  ;;  %v901_v30 = vrot.slane %v5383_v41, 3  ;;  %v6733_v49 = vld [vmem:[#allocation43_spill] sm:$0xff]  ;;  %v6736_v37 = vld [vmem:[#allocation46_spill] sm:$0xff] }
 0x2b9   :  { %v2398_v32 = vrot.slane %v2386_v36, 1  ;;  %v761_v55 = vadd.f32 %v6730_v5, %v721_v58  ;;  %v762_v50 = vadd.f32 %v6731_v4, %v722_v52  ;;  %v799_v35 = vadd.f32 %v6732_v48, %v759_v1  ;;  %v6735_v36 = vld [vmem:[#allocation45_spill] sm:$0xff]  ;;  %v6737_v58 = vld [vmem:[#allocation47_spill] sm:$0xff]  ;;  %v6740_v5 = vld [vmem:[#allocation50_spill] sm:$0xff] }
 0x2ba   :  { %2368 = vrot.lane.b32.xlu0 %v2360_v12, %s4125_s7  ;;  %2370 = vrot.lane.b32.xlu1 %v2362_v23, %s4125_s7  ;;  %v2425_v33 = vstv %s5390_s19  ;;  %v800_v44 = vadd.f32 %v6733_v49, %v760_v20  ;;  %v2403_v47 = vrot.slane %v2389_v59, 1  ;;  %v2402_v61 = vsel %vm351_vm4, %v2399_v25, %v2401_v54  ;;  %v6734_v23 = vld [vmem:[#allocation44_spill] sm:$0xff]  ;;  %v6739_v20 = vld [vmem:[#allocation49_spill] sm:$0xff]  ;;  %v6741_v4 = vld [vmem:[#allocation51_spill] sm:$0xff]  ;;  %s6011_s19 = sld [smem:[#allocation6 + $0x51]] }
 0x2bb   :  { %v2400_v26 = vsel %vm351_vm4, %v2398_v32, %v2399_v25  ;;  %v2427_v41 = vmul.f32 %v2425_v33, %v5152_v57  ;;  %v2404_v63 = vrot.slane %v2390_v17, 1  ;;  %v2406_v10 = vrot.slane %v2391_v29, 1  ;;  %v6742_v48 = vld [vmem:[#allocation52_spill] sm:$0xff] }
 0x2bc   :  { %v2428_v12 = vmul.f32 %v2425_v33, %v5240_v24  ;;  %v801_v56 = vadd.f32 %v6734_v23, %v761_v55  ;;  %v903_v21 = vrot.slane %v5401_v9, 3  ;;  %v890_v42 = vmul.f32 %v5207_v34, %v4262_v45 }
 0x2bd   :  { %v2426_v8 = vmul.f32 %v2425_v33, %v5144_v27  ;;  %v802_v18 = vadd.f32 %v6735_v36, %v762_v50  ;;  %v839_v43 = vadd.f32 %v6736_v37, %v799_v35  ;;  %v840_v28 = vadd.f32 %v6737_v58, %v800_v44 }
 0x2be   :  { %2372 = vrot.lane.b32.xlu0 %v2365_v7, %s4125_s7  ;;  %2374 = vrot.lane.b32.xlu1 %v2367_v3, %s4125_s7  ;;  %v904_v52 = vrot.slane %v5411_v46, 3  ;;  %v841_v9 = vadd.f32 %v6738_v53, %v801_v56  ;;  %v2439_v1 = vrot.slane %v2427_v41, 1  ;;  %v2429_v34 = vmul.f32 %v2425_v33, %v5159_v0 }
 0x2bf   :  { %v2430_v7 = vmul.f32 %v2425_v33, %v5162_v15  ;;  %v2405_v25 = vsel %vm351_vm4, %v2403_v47, %v2404_v63  ;;  %v2407_v59 = vsel %vm351_vm4, %v2404_v63, %v2406_v10  ;;  %v2441_v3 = vrot.slane %v2428_v12, 1  ;;  %v6743_v63 = vld [vmem:[#allocation53_spill] sm:$0xff] }
 0x2c0   :  { %v2431_v54 = vmul.f32 %v2425_v33, %v5265_v39  ;;  %v902_v17 = vsel %vm897_vm6, %v899_v51, %v901_v30  ;;  %v906_v29 = vrot.slane %v890_v42, 3  ;;  %v5456_v38 = vstv %s5422_s20  ;;  %s6034_s20 = sld [smem:[#allocation6 + $0x52]] }
 0x2c1   :  { %v2438_v46 = vrot.slane %v2426_v8, 1  ;;  %v842_v32 = vadd.f32 %v6739_v20, %v802_v18  ;;  %v879_v55 = vadd.f32 %v6740_v5, %v839_v43  ;;  %v880_v50 = vadd.f32 %v6741_v4, %v840_v28 }
 0x2c2   :  { %2408 = vrot.lane.b32.xlu0 %v2400_v26, %s4126_s10  ;;  %2410 = vrot.lane.b32.xlu1 %v2402_v61, %s4126_s10  ;;  %v881_v35 = vadd.f32 %v6742_v48, %v841_v9  ;;  %v2443_v30 = vrot.slane %v2429_v34, 1  ;;  %v2444_v33 = vrot.slane %v2430_v7, 1  ;;  %v2497_v49 = vstv %s5433_s21  ;;  %v6744_v9 = vld [vmem:[#allocation54_spill] sm:$0xff]  ;;  %v6745_v7 = vld [vmem:[#allocation55_spill] sm:$0xff]  ;;  %s6078_s21 = sld [smem:[#allocation6 + $0x53]] }
 0x2c3   :  { %v2440_v51 = vsel %vm351_vm4, %v2438_v46, %v2439_v1  ;;  %v2442_v44 = vsel %vm351_vm4, %v2439_v1, %v2441_v3  ;;  %v2446_v26 = vrot.slane %v2431_v54, 1  ;;  %v2499_v47 = vmul.f32 %v2497_v49, %v5152_v57 }
 0x2c4   :  { %v2500_v41 = vmul.f32 %v2497_v49, %v5240_v24  ;;  %v905_v61 = vsel %vm897_vm6, %v903_v21, %v904_v52  ;;  %v882_v10 = vadd.f32 %v6743_v63, %v842_v32  ;;  %v1158_v12 = vmul.f32 %v5456_v38, %v4194_v62 }
 0x2c5   :  { %v912_v23 = vadd.f32 %v900_v19, %v879_v55  ;;  %v913_v56 = vadd.f32 %v902_v17, %v880_v50  ;;  %v907_v42 = vsel %vm897_vm6, %v904_v52, %v906_v29  ;;  %v2498_v8 = vmul.f32 %v2497_v49, %v5144_v27  ;;  %v6747_v29 = vld [vmem:[#allocation57_spill] sm:$0xff] }
 0x2c6   :  { %2412 = vrot.lane.b32.xlu0 %v2405_v25, %s4126_s10  ;;  %2414 = vrot.lane.b32.xlu1 %v2407_v59, %s4126_s10  ;;  %v914_v36 = vadd.f32 %v905_v61, %v881_v35  ;;  %v2445_v18 = vsel %vm351_vm4, %v2443_v30, %v2444_v33  ;;  %v2501_v21 = vmul.f32 %v2497_v49, %v5159_v0  ;;  %v2511_v58 = vrot.slane %v2499_v47, 2  ;;  %v6746_v59 = vld [vmem:[#allocation56_spill] sm:$0xff]  ;;  %v6748_v35 = vld [vmem:[#allocation58_spill] sm:$0xff]  ;;  %v6751_v61 = vld [vmem:[#allocation61_spill] sm:$0xff] }
 0x2c7   :  { %v2502_v37 = vmul.f32 %v2497_v49, %v5162_v15  ;;  %v2447_v43 = vsel %vm351_vm4, %v2444_v33, %v2446_v26  ;;  %v2513_v28 = vrot.slane %v2500_v41, 2  ;;  %v2503_v53 = vmul.f32 %v2497_v49, %v5265_v39  ;;  %v6750_v47 = vld [vmem:[#allocation60_spill] sm:$0xff] }
 0x2c8   :  { %v915_v19 = vadd.f32 %v907_v42, %v882_v10  ;;  %v952_v1 = vadd.f32 %v6744_v9, %v912_v23  ;;  %v5487_v52 = vmul.f32 %v5456_v38, %v4205_v6  ;;  %v1171_v34 = vrot.slane %v1158_v12, 4  ;;  %v6752_v12 = vld [vmem:[#allocation62_spill] sm:$0xff]  ;;  %v6754_v9 = vld [vmem:[#allocation64_spill] sm:$0xff] }
 0x2c9   :  { %v953_v25 = vadd.f32 %v6745_v7, %v913_v56  ;;  %v954_v3 = vadd.f32 %v6746_v59, %v914_v36  ;;  %v2510_v54 = vrot.slane %v2498_v8, 2  ;;  %v2537_v17 = vstv %s5464_s23  ;;  %v6755_v7 = vld [vmem:[#allocation65_spill] sm:$0xff]  ;;  %v6756_v59 = vld [vmem:[#allocation66_spill] sm:$0xff]  ;;  %s6103_s23 = sld [smem:[#allocation6 + $0x55]] }
 0x2ca   :  { %2448 = vrot.lane.b32.xlu0 %v2440_v51, %s4127_s12  ;;  %2450 = vrot.lane.b32.xlu1 %v2442_v44, %s4127_s12  ;;  %v955_v46 = vadd.f32 %v6747_v29, %v915_v19  ;;  %v2515_v20 = vrot.slane %v2501_v21, 2  ;;  %v2516_v32 = vrot.slane %v2502_v37, 2  ;;  %v2539_v5 = vmul.f32 %v2537_v17, %v5152_v57  ;;  %v6749_v44 = vld [vmem:[#allocation59_spill] sm:$0xff] }
 0x2cb   :  { %v2512_v55 = vsel %vm624_vm5, %v2510_v54, %v2511_v58  ;;  %v2514_v4 = vsel %vm624_vm5, %v2511_v58, %v2513_v28  ;;  %v2518_v50 = vrot.slane %v2503_v53, 2  ;;  %v2540_v48 = vmul.f32 %v2537_v17, %v5240_v24 }
 0x2cc   :  { %v992_v51 = vadd.f32 %v6748_v35, %v952_v1  ;;  %v1172_v30 = vrot.slane %v5487_v52, 4  ;;  %v5505_v33 = vmul.f32 %v5456_v38, %v4256_v40  ;;  %v2538_v49 = vmul.f32 %v2537_v17, %v5144_v27 }
 0x2cd   :  { %v993_v26 = vadd.f32 %v6749_v44, %v953_v25  ;;  %v994_v41 = vadd.f32 %v6750_v47, %v954_v3  ;;  %v995_v63 = vadd.f32 %v6751_v61, %v955_v46  ;;  %v5515_v10 = vmul.f32 %v5456_v38, %v4199_v2 }
 0x2ce   :  { %2452 = vrot.lane.b32.xlu0 %v2445_v18, %s4127_s12  ;;  %2454 = vrot.lane.b32.xlu1 %v2447_v43, %s4127_s12  ;;  %v1032_v23 = vadd.f32 %v6752_v12, %v992_v51  ;;  %v2517_v56 = vsel %vm624_vm5, %v2515_v20, %v2516_v32  ;;  %v2551_v42 = vrot.slane %v2539_v5, 2  ;;  %v2541_v8 = vmul.f32 %v2537_v17, %v5159_v0  ;;  %v6753_v43 = vld [vmem:[#allocation63_spill] sm:$0xff]  ;;  %v6762_v12 = vld [vmem:[#allocation72_spill] sm:$0xff] }
 0x2cf   :  { %v2519_v36 = vsel %vm624_vm5, %v2516_v32, %v2518_v50  ;;  %v2553_v18 = vrot.slane %v2540_v48, 2  ;;  %v2542_v21 = vmul.f32 %v2537_v17, %v5162_v15  ;;  %v2543_v37 = vmul.f32 %v2537_v17, %v5265_v39  ;;  %v6757_v17 = vld [vmem:[#allocation67_spill] sm:$0xff]  ;;  %v6758_v50 = vld [vmem:[#allocation68_spill] sm:$0xff] }
 0x2d0   :  { %v1033_v58 = vadd.f32 %v6753_v43, %v993_v26  ;;  %v1173_v28 = vsel %vm1170_vm7, %v1171_v34, %v1172_v30  ;;  %v1162_v53 = vmul.f32 %v5456_v38, %v4212_v11  ;;  %v2550_v19 = vrot.slane %v2538_v49, 2  ;;  %v6759_v49 = vld [vmem:[#allocation69_spill] sm:$0xff]  ;;  %v6760_v26 = vld [vmem:[#allocation70_spill] sm:$0xff] }
 0x2d1   :  { %v1034_v1 = vadd.f32 %v6754_v9, %v994_v41  ;;  %v1035_v25 = vadd.f32 %v6755_v7, %v995_v63  ;;  %v1072_v3 = vadd.f32 %v6756_v59, %v1032_v23  ;;  %v2577_v54 = vstv %s5494_s24  ;;  %v6761_v41 = vld [vmem:[#allocation71_spill] sm:$0xff]  ;;  %s6157_s24 = sld [smem:[#allocation6 + $0x56]] }
 0x2d2   :  { %2520 = vrot.lane.b32.xlu0 %v2512_v55, %s4122_s29  ;;  %2522 = vrot.lane.b32.xlu1 %v2514_v4, %s4122_s29  ;;  %v1073_v29 = vadd.f32 %v6757_v17, %v1033_v58  ;;  %v2552_v46 = vsel %vm624_vm5, %v2550_v19, %v2551_v42  ;;  %v2555_v34 = vrot.slane %v2541_v8, 2  ;;  %v2579_v20 = vmul.f32 %v2577_v54, %v5152_v57  ;;  %v6763_v19 = vld [vmem:[#allocation73_spill] sm:$0xff] }
 0x2d3   :  { %v2554_v32 = vsel %vm624_vm5, %v2551_v42, %v2553_v18  ;;  %v2556_v5 = vrot.slane %v2542_v21, 2  ;;  %v2558_v55 = vrot.slane %v2543_v37, 2  ;;  %v2580_v4 = vmul.f32 %v2577_v54, %v5240_v24 }
 0x2d4   :  { %v1074_v48 = vadd.f32 %v6758_v50, %v1034_v1  ;;  %v1163_v35 = vmul.f32 %v5456_v38, %v4262_v45  ;;  %v2578_v51 = vmul.f32 %v2577_v54, %v5144_v27  ;;  %v1075_v44 = vadd.f32 %v6759_v49, %v1035_v25  ;;  %v6764_v1 = vld [vmem:[#allocation74_spill] sm:$0xff]  ;;  %v6765_v25 = vld [vmem:[#allocation75_spill] sm:$0xff] }
 0x2d5   :  { %v1112_v47 = vadd.f32 %v6760_v26, %v1072_v3  ;;  %v1113_v61 = vadd.f32 %v6761_v41, %v1073_v29  ;;  %v1174_v63 = vrot.slane %v5505_v33, 4  ;;  %v2581_v38 = vmul.f32 %v2577_v54, %v5159_v0  ;;  %v6766_v3 = vld [vmem:[#allocation76_spill] sm:$0xff] }
 0x2d6   :  { %2524 = vrot.lane.b32.xlu0 %v2517_v56, %s4122_s29  ;;  %2526 = vrot.lane.b32.xlu1 %v2519_v36, %s4122_s29  ;;  %v1114_v23 = vadd.f32 %v6762_v12, %v1074_v48  ;;  %v2591_v56 = vrot.slane %v2579_v20, 2  ;;  %v2582_v42 = vmul.f32 %v2577_v54, %v5162_v15  ;;  %v2557_v8 = vsel %vm624_vm5, %v2555_v34, %v2556_v5 }
 0x2d7   :  { %v2559_v36 = vsel %vm624_vm5, %v2556_v5, %v2558_v55  ;;  %v2593_v18 = vrot.slane %v2580_v4, 2  ;;  %v2583_v21 = vmul.f32 %v2577_v54, %v5265_v39  ;;  %v1176_v37 = vrot.slane %v5515_v10, 4 }
 0x2d8   :  { %v1177_v43 = vrot.slane %v1162_v53, 4  ;;  %v1179_v58 = vrot.slane %v1163_v35, 4  ;;  %v2590_v33 = vrot.slane %v2578_v51, 2  ;;  %v1115_v9 = vadd.f32 %v6763_v19, %v1075_v44  ;;  %v6767_v51 = vld [vmem:[#allocation77_spill] sm:$0xff] }
 0x2d9   :  { %v1152_v7 = vadd.f32 %v6764_v1, %v1112_v47  ;;  %v1153_v59 = vadd.f32 %v6765_v25, %v1113_v61  ;;  %v1154_v17 = vadd.f32 %v6766_v3, %v1114_v23  ;;  %v2595_v29 = vrot.slane %v2581_v38, 2 }
 0x2da   :  { %2560 = vrot.lane.b32.xlu0 %v2552_v46, %s4123_s3  ;;  %2562 = vrot.lane.b32.xlu1 %v2554_v32, %s4123_s3  ;;  %v2592_v54 = vsel %vm624_vm5, %v2590_v33, %v2591_v56  ;;  %v2596_v10 = vrot.slane %v2582_v42, 2  ;;  %v2617_v53 = vstv %s5538_s25  ;;  %v2594_v46 = vsel %vm624_vm5, %v2591_v56, %v2593_v18  ;;  %v6768_v56 = vld [vmem:[#allocation78_spill] sm:$0xff]  ;;  %v6769_v18 = vld [vmem:[#allocation79_spill] sm:$0xff]  ;;  %s6199_s25 = sld [smem:[#allocation6 + $0x57]] }
 0x2db   :  { %v2598_v34 = vrot.slane %v2583_v21, 2  ;;  %v2619_v20 = vmul.f32 %v2617_v53, %v5152_v57  ;;  %v2620_v32 = vmul.f32 %v2617_v53, %v5240_v24  ;;  %v1175_v5 = vsel %vm1170_vm7, %v1172_v30, %v1174_v63 }
 0x2dc   :  { %v1178_v55 = vsel %vm1170_vm7, %v1176_v37, %v1177_v43  ;;  %v1180_v4 = vsel %vm1170_vm7, %v1177_v43, %v1179_v58  ;;  %v5580_v50 = vstv %s5545_s26  ;;  %v1185_v48 = vadd.f32 %v1173_v28, %v1152_v7  ;;  %v6770_v37 = vld [vmem:[#allocation80_spill] sm:$0xff]  ;;  %s6225_s26 = sld [smem:[#allocation6 + $0x46]] }
 0x2dd   :  { %v1186_v35 = vadd.f32 %v1175_v5, %v1153_v59  ;;  %v1155_v49 = vadd.f32 %v6767_v51, %v1115_v9  ;;  %v2618_v44 = vmul.f32 %v2617_v53, %v5144_v27  ;;  %v1187_v26 = vadd.f32 %v1178_v55, %v1154_v17  ;;  %v6774_v55 = vld [vmem:[#allocation84_spill] sm:$0xff] }
 0x2de   :  { %2564 = vrot.lane.b32.xlu0 %v2557_v8, %s4123_s3  ;;  %2566 = vrot.lane.b32.xlu1 %v2559_v36, %s4123_s3  ;;  %v2621_v47 = vmul.f32 %v2617_v53, %v5159_v0  ;;  %v2622_v41 = vmul.f32 %v2617_v53, %v5162_v15  ;;  %v2623_v61 = vmul.f32 %v2617_v53, %v5265_v39  ;;  %v2631_v12 = vrot.slane %v2619_v20, 2 }
 0x2df   :  { %v2597_v63 = vsel %vm624_vm5, %v2595_v29, %v2596_v10  ;;  %v2599_v28 = vsel %vm624_vm5, %v2596_v10, %v2598_v34  ;;  %v2633_v23 = vrot.slane %v2620_v32, 2  ;;  %v1225_v38 = vadd.f32 %v6768_v56, %v1185_v48  ;;  %v6771_v29 = vld [vmem:[#allocation81_spill] sm:$0xff]  ;;  %v6772_v34 = vld [vmem:[#allocation82_spill] sm:$0xff]  ;;  %v6773_v32 = vld [vmem:[#allocation83_spill] sm:$0xff] }
 0x2e0   :  { %v5586_v52 = vpop.permute.xlu0 %2046  ;;  %v5598_v42 = vmul.f32 %v5580_v50, %v4194_v62  ;;  %v5602_v8 = vmul.f32 %v5580_v50, %v4205_v6  ;;  %v1188_v36 = vadd.f32 %v1180_v4, %v1155_v49  ;;  %v1226_v21 = vadd.f32 %v6769_v18, %v1186_v35  ;;  %v6775_v35 = vld [vmem:[#allocation85_spill] sm:$0xff] }
 0x2e1   :  { %v1227_v43 = vadd.f32 %v6770_v37, %v1187_v26  ;;  %v2630_v58 = vrot.slane %v2618_v44, 2  ;;  %v2635_v9 = vrot.slane %v2621_v47, 2  ;;  %v2636_v1 = vrot.slane %v2622_v41, 2 }
 0x2e2   :  { %2600 = vrot.lane.b32.xlu0 %v2592_v54, %s4124_s5  ;;  %2602 = vrot.lane.b32.xlu1 %v2594_v46, %s4124_s5  ;;  %v2638_v7 = vrot.slane %v2623_v61, 2  ;;  %v2657_v25 = vstv %s5569_s0  ;;  %v2634_v3 = vsel %vm624_vm5, %v2631_v12, %v2633_v23  ;;  %v1228_v10 = vadd.f32 %v6771_v29, %v1188_v36  ;;  %v6776_v23 = vld [vmem:[#allocation86_spill] sm:$0xff]  ;;  %s6249_s0 = sld [smem:[#allocation6 + $0x58]] }
 0x2e3   :  { %v2632_v59 = vsel %vm624_vm5, %v2630_v58, %v2631_v12  ;;  %v2659_v17 = vmul.f32 %v2657_v25, %v5152_v57  ;;  %v2660_v54 = vmul.f32 %v2657_v25, %v5240_v24  ;;  %v5624_v53 = vmul.f32 %v5580_v50, %v4256_v40 }
 0x2e4   :  { %v5588_v30 = vpop.permute.xlu1 %2048  ;;  %v5628_v46 = vmul.f32 %v5580_v50, %v4199_v2  ;;  %v1265_v20 = vadd.f32 %v6772_v34, %v1225_v38  ;;  %v1266_v5 = vadd.f32 %v6773_v32, %v1226_v21  ;;  %v1267_v4 = vadd.f32 %v6774_v55, %v1227_v43 }
 0x2e5   :  { %v2658_v48 = vmul.f32 %v2657_v25, %v5144_v27  ;;  %v1268_v51 = vadd.f32 %v6775_v35, %v1228_v10  ;;  %v2637_v26 = vsel %vm624_vm5, %v2635_v9, %v2636_v1  ;;  %v2639_v47 = vsel %vm624_vm5, %v2636_v1, %v2638_v7 }
 0x2e6   :  { %2604 = vrot.lane.b32.xlu0 %v2597_v63, %s4124_s5  ;;  %2606 = vrot.lane.b32.xlu1 %v2599_v28, %s4124_s5  ;;  %v2661_v41 = vmul.f32 %v2657_v25, %v5159_v0  ;;  %v2671_v61 = vrot.slane %v2659_v17, 2  ;;  %v2673_v63 = vrot.slane %v2660_v54, 2  ;;  %v2662_v28 = vmul.f32 %v2657_v25, %v5162_v15 }
 0x2e7   :  { %v2663_v12 = vmul.f32 %v2657_v25, %v5265_v39  ;;  %v1305_v56 = vadd.f32 %v6776_v23, %v1265_v20  ;;  %v1306_v38 = vadd.f32 %v4989_v14, %v1266_v5  ;;  %v5650_v36 = vmul.f32 %v5580_v50, %v4212_v11  ;;  %v6777_v20 = vld [vmem:[#allocation87_spill] sm:$0xff]  ;;  %v6778_v5 = vld [vmem:[#allocation88_spill] sm:$0xff]  ;;  %v6780_v23 = vld [vmem:[#allocation90_spill] sm:$0xff] }
 0x2e8   :  { %v5612_v33 = vpop.permute.xlu1 %2052  ;;  %v5614_v19 = vpop.permute.xlu0 %2050  ;;  %v5653_v18 = vstv %s5604_s27  ;;  %v1307_v21 = vadd.f32 %v4991_v60, %v1267_v4  ;;  %v1308_v37 = vadd.f32 %v5000_v13, %v1268_v51  ;;  %v2670_v43 = vrot.slane %v2658_v48, 2  ;;  %s6334_s27 = sld [smem:[#allocation6 + $0x59]] }
 0x2e9   :  { %v2697_v58 = vstv %s5610_s28  ;;  %v1345_v9 = vadd.f32 %v5002_v22, %v1305_v56  ;;  %v2675_v7 = vrot.slane %v2661_v41, 2  ;;  %v2674_v60 = vsel %vm624_vm5, %v2671_v61, %v2673_v63  ;;  %s6364_s28 = sld [smem:[#allocation6 + $0x5a]] }
 0x2ea   :  { %2640 = vrot.lane.b32.xlu0 %v2632_v59, %s4125_s7  ;;  %2642 = vrot.lane.b32.xlu1 %v2634_v3, %s4125_s7  ;;  %v2699_v25 = vmul.f32 %v2697_v58, %v5152_v57  ;;  %v2700_v59 = vmul.f32 %v2697_v58, %v5240_v24  ;;  %v2672_v3 = vsel %vm624_vm5, %v2670_v43, %v2671_v61  ;;  %v2676_v13 = vrot.slane %v2662_v28, 2 }
 0x2eb   :  { %v2678_v17 = vrot.slane %v2663_v12, 2  ;;  %v1346_v54 = vadd.f32 %v5011_v16, %v1306_v38  ;;  %v1443_v22 = vrot.slane %v5598_v42, 5  ;;  %v1436_v29 = vmul.f32 %v5580_v50, %v4262_v45  ;;  %v6779_v16 = vld [vmem:[#allocation89_spill] sm:$0xff]  ;;  %v6781_v38 = vld [vmem:[#allocation91_spill] sm:$0xff] }
 0x2ec   :  { %v5637_v49 = vpop.permute.xlu1 %2074  ;;  %v5639_v44 = vpop.permute.xlu0 %2072  ;;  %v2698_v10 = vmul.f32 %v2697_v58, %v5144_v27  ;;  %v1347_v34 = vadd.f32 %v5013_v31, %v1307_v21  ;;  %v1348_v32 = vadd.f32 %v6777_v20, %v1308_v37  ;;  %v1385_v55 = vadd.f32 %v6778_v5, %v1345_v9  ;;  %v6782_v37 = vld [vmem:[#allocation92_spill] sm:$0xff]  ;;  %v6783_v9 = vld [vmem:[#allocation93_spill] sm:$0xff] }
 0x2ed   :  { %v1444_v4 = vrot.slane %v5602_v8, 5  ;;  %v1386_v48 = vadd.f32 %v6779_v16, %v1346_v54  ;;  %v2711_v50 = vrot.slane %v2699_v25, 2  ;;  %v2713_v51 = vrot.slane %v2700_v59, 2  ;;  %v6785_v16 = vld [vmem:[#allocation95_spill] sm:$0xff] }
 0x2ee   :  { %2644 = vrot.lane.b32.xlu0 %v2637_v26, %s4125_s7  ;;  %2646 = vrot.lane.b32.xlu1 %v2639_v47, %s4125_s7  ;;  %v2701_v26 = vmul.f32 %v2697_v58, %v5159_v0  ;;  %v2677_v47 = vsel %vm624_vm5, %v2675_v7, %v2676_v13  ;;  %v2679_v31 = vsel %vm624_vm5, %v2676_v13, %v2678_v17  ;;  %v1446_v8 = vrot.slane %v5624_v53, 5 }
 0x2ef   :  { %v2702_v41 = vmul.f32 %v2697_v58, %v5162_v15  ;;  %v2703_v61 = vmul.f32 %v2697_v58, %v5265_v39  ;;  %v1448_v63 = vrot.slane %v5628_v46, 5  ;;  %v1449_v28 = vrot.slane %v5650_v36, 5 }
 0x2f0   :  { %v5661_v1 = vpop.permute.xlu1 %2078  ;;  %v5663_v14 = vpop.permute.xlu0 %2076  ;;  %v2710_v12 = vrot.slane %v2698_v10, 2  ;;  %v1387_v56 = vadd.f32 %v6780_v23, %v1347_v34  ;;  %v1388_v21 = vadd.f32 %v6781_v38, %v1348_v32  ;;  %v1425_v43 = vadd.f32 %v6782_v37, %v1385_v55  ;;  %v6784_v34 = vld [vmem:[#allocation94_spill] sm:$0xff]  ;;  %v6786_v38 = vld [vmem:[#allocation96_spill] sm:$0xff]  ;;  %v6787_v37 = vld [vmem:[#allocation97_spill] sm:$0xff] }
 0x2f1   :  { %v1426_v58 = vadd.f32 %v6783_v9, %v1386_v48  ;;  %v2714_v36 = vsel %vm624_vm5, %v2711_v50, %v2713_v51  ;;  %v2715_v25 = vrot.slane %v2701_v26, 2  ;;  %v2769_v59 = vstv %s5667_s30  ;;  %s3989_s30 = sld [smem:[#allocation6 + $0x5c]] }
 0x2f2   :  { %2680 = vrot.lane.b32.xlu0 %v2672_v3, %s4126_s10  ;;  %2682 = vrot.lane.b32.xlu1 %v2674_v60, %s4126_s10  ;;  %v2712_v46 = vsel %vm624_vm5, %v2710_v12, %v2711_v50  ;;  %v2716_v3 = vrot.slane %v2702_v41, 2  ;;  %v2718_v60 = vrot.slane %v2703_v61, 2  ;;  %v2771_v13 = vmul.f32 %v2769_v59, %v5152_v57 }
 0x2f3   :  { %v2772_v17 = vmul.f32 %v2769_v59, %v5240_v24  ;;  %v1445_v54 = vsel %vm120_vm1, %v1443_v22, %v1444_v4  ;;  %v1447_v10 = vsel %vm120_vm1, %v1444_v4, %v1446_v8  ;;  %v1427_v20 = vadd.f32 %v6784_v34, %v1387_v56 }
 0x2f4   :  { %v5683_v42 = vpop.permute.xlu1 %2100  ;;  %v5685_v35 = vpop.permute.xlu0 %2098  ;;  %v1451_v32 = vrot.slane %v1436_v29, 5  ;;  %v1457_v5 = vadd.f32 %v1445_v54, %v1425_v43  ;;  %v1450_v55 = vsel %vm120_vm1, %v1448_v63, %v1449_v28  ;;  %v1428_v48 = vadd.f32 %v6785_v16, %v1388_v21  ;;  %v6791_v16 = vld [vmem:[#allocation101_spill] sm:$0xff] }
 0x2f5   :  { %v2770_v50 = vmul.f32 %v2769_v59, %v5144_v27  ;;  %v1458_v51 = vadd.f32 %v1447_v10, %v1426_v58  ;;  %v2773_v4 = vmul.f32 %v2769_v59, %v5159_v0  ;;  %v2774_v29 = vmul.f32 %v2769_v59, %v5162_v15 }
 0x2f6   :  { %2684 = vrot.lane.b32.xlu0 %v2677_v47, %s4126_s10  ;;  %2686 = vrot.lane.b32.xlu1 %v2679_v31, %s4126_s10  ;;  %v2775_v47 = vmul.f32 %v2769_v59, %v5265_v39  ;;  %v2717_v31 = vsel %vm624_vm5, %v2715_v25, %v2716_v3  ;;  %v2719_v41 = vsel %vm624_vm5, %v2716_v3, %v2718_v60  ;;  %v2783_v61 = vrot.slane %v2771_v13, 3 }
 0x2f7   :  { %v2785_v8 = vrot.slane %v2772_v17, 3  ;;  %v1459_v63 = vadd.f32 %v1450_v55, %v1427_v20  ;;  %v1452_v12 = vsel %vm120_vm1, %v1449_v28, %v1451_v32  ;;  %v5732_v23 = vmul.f32 %v5653_v18, %v4194_v62  ;;  %v6788_v17 = vld [vmem:[#allocation98_spill] sm:$0xff]  ;;  %v6789_v20 = vld [vmem:[#allocation99_spill] sm:$0xff] }
 0x2f8   :  { %v5701_v7 = vpop.permute.xlu1 %2104  ;;  %v5703_v53 = vpop.permute.xlu0 %2102  ;;  %v1460_v56 = vadd.f32 %v1452_v12, %v1428_v48  ;;  %v1497_v21 = vadd.f32 %v6786_v38, %v1457_v5  ;;  %v1498_v43 = vadd.f32 %v6787_v37, %v1458_v51  ;;  %v2782_v9 = vrot.slane %v2770_v50, 3  ;;  %v6790_v5 = vld [vmem:[#allocation100_spill] sm:$0xff]  ;;  %v6792_v51 = vld [vmem:[#allocation102_spill] sm:$0xff]  ;;  %v6793_v12 = vld [vmem:[#allocation103_spill] sm:$0xff] }
 0x2f9   :  { %v2787_v28 = vrot.slane %v2773_v4, 3  ;;  %v2790_v62 = vrot.slane %v2775_v47, 3  ;;  %v2809_v25 = vstv %s5708_s4  ;;  %v2786_v3 = vsel %vm897_vm6, %v2783_v61, %v2785_v8  ;;  %v6794_v38 = vld [vmem:[#allocation104_spill] sm:$0xff]  ;;  %s3990_s4 = sld [smem:[#allocation6 + $0x5d]] }
 0x2fa   :  { %2720 = vrot.lane.b32.xlu0 %v2712_v46, %s4127_s12  ;;  %2722 = vrot.lane.b32.xlu1 %v2714_v36, %s4127_s12  ;;  %v2788_v36 = vrot.slane %v2774_v29, 3  ;;  %v2784_v59 = vsel %vm897_vm6, %v2782_v9, %v2783_v61  ;;  %v2811_v60 = vmul.f32 %v2809_v25, %v5152_v57  ;;  %v2812_v13 = vmul.f32 %v2809_v25, %v5240_v24  ;;  %v6795_v9 = vld [vmem:[#allocation105_spill] sm:$0xff] }
 0x2fb   :  { %v1499_v54 = vadd.f32 %v6788_v17, %v1459_v63  ;;  %v5752_v10 = vmul.f32 %v5653_v18, %v4205_v6  ;;  %v5756_v34 = vmul.f32 %v5653_v18, %v4256_v40  ;;  %v1500_v32 = vadd.f32 %v6789_v20, %v1460_v56 }
 0x2fc   :  { %v5720_v26 = vpop.permute.xlu1 %2126  ;;  %v5722_v22 = vpop.permute.xlu0 %2124  ;;  %v1537_v55 = vadd.f32 %v6790_v5, %v1497_v21  ;;  %v1538_v48 = vadd.f32 %v6791_v16, %v1498_v43  ;;  %v2810_v50 = vmul.f32 %v2809_v25, %v5144_v27  ;;  %v2789_v40 = vsel %vm897_vm6, %v2787_v28, %v2788_v36  ;;  %v6798_v16 = vld [vmem:[#allocation108_spill] sm:$0xff] }
 0x2fd   :  { %v1539_v4 = vadd.f32 %v6792_v51, %v1499_v54  ;;  %v2813_v47 = vmul.f32 %v2809_v25, %v5159_v0  ;;  %v2823_v61 = vrot.slane %v2811_v60, 3  ;;  %v2825_v8 = vrot.slane %v2812_v13, 3 }
 0x2fe   :  { %2724 = vrot.lane.b32.xlu0 %v2717_v31, %s4127_s12  ;;  %2726 = vrot.lane.b32.xlu1 %v2719_v41, %s4127_s12  ;;  %v2814_v31 = vmul.f32 %v2809_v25, %v5162_v15  ;;  %v2791_v41 = vsel %vm897_vm6, %v2788_v36, %v2790_v62  ;;  %v2815_v63 = vmul.f32 %v2809_v25, %v5265_v39  ;;  %v1716_v37 = vrot.slane %v5732_v23, 6  ;;  %v6796_v36 = vld [vmem:[#allocation106_spill] sm:$0xff] }
 0x2ff   :  { %v1540_v56 = vadd.f32 %v6793_v12, %v1500_v32  ;;  %v1577_v21 = vadd.f32 %v6794_v38, %v1537_v55  ;;  %v5779_v43 = vmul.f32 %v5653_v18, %v4199_v2  ;;  %v1578_v28 = vadd.f32 %v6795_v9, %v1538_v48  ;;  %v6802_v12 = vld [vmem:[#allocation112_spill] sm:$0xff] }
 0x300   :  { %v5740_v58 = vpop.permute.xlu1 %2130  ;;  %v5742_v46 = vpop.permute.xlu0 %2128  ;;  %v1579_v62 = vadd.f32 %v6796_v36, %v1539_v4  ;;  %v2849_v25 = vstv %s5738_s6  ;;  %v2827_v2 = vrot.slane %v2813_v47, 3  ;;  %v2828_v17 = vrot.slane %v2814_v31, 3  ;;  %v6800_v31 = vld [vmem:[#allocation110_spill] sm:$0xff]  ;;  %s6405_s6 = sld [smem:[#allocation6 + $0x5e]] }
 0x301   :  { %v2851_v54 = vmul.f32 %v2849_v25, %v5152_v57  ;;  %v2826_v32 = vsel %vm897_vm6, %v2823_v61, %v2825_v8  ;;  %v2830_v5 = vrot.slane %v2815_v63, 3  ;;  %v2852_v55 = vmul.f32 %v2849_v25, %v5240_v24 }
 0x302   :  { %2792 = vrot.lane.b32.xlu0 %v2784_v59, %s4122_s29  ;;  %2794 = vrot.lane.b32.xlu1 %v2786_v3, %s4122_s29  ;;  %v2822_v59 = vrot.slane %v2810_v50, 3  ;;  %v6797_v3 = vld [vmem:[#allocation107_spill] sm:$0xff]  ;;  %v1617_v48 = vadd.f32 %v6798_v16, %v1577_v21  ;;  %v1717_v50 = vrot.slane %v5752_v10, 6  ;;  %v1719_v51 = vrot.slane %v5756_v34, 6 }
 0x303   :  { %v1580_v60 = vadd.f32 %v6797_v3, %v1540_v56  ;;  %v2850_v4 = vmul.f32 %v2849_v25, %v5144_v27  ;;  %v1707_v63 = vmul.f32 %v5653_v18, %v4212_v11  ;;  %v2829_v38 = vsel %vm897_vm6, %v2827_v2, %v2828_v17  ;;  %v6804_v11 = vld [vmem:[#allocation113_spill] sm:$0xff] }
 0x304   :  { %v5765_v6 = vpop.permute.xlu1 %2152  ;;  %v5767_v29 = vpop.permute.xlu0 %2150  ;;  %v2824_v20 = vsel %vm897_vm6, %v2822_v59, %v2823_v61  ;;  %v6801_v61 = vld [vmem:[#allocation111_spill] sm:$0xff]  ;;  %v1657_v56 = vadd.f32 %v6802_v12, %v1617_v48  ;;  %v2863_v21 = vrot.slane %v2851_v54, 3  ;;  %v2853_v9 = vmul.f32 %v2849_v25, %v5159_v0  ;;  %v6805_v54 = vld [vmem:[#allocation114_spill] sm:$0xff] }
 0x305   :  { %v1620_v8 = vadd.f32 %v6801_v61, %v1580_v60  ;;  %v2865_v36 = vrot.slane %v2852_v55, 3  ;;  %v2855_v59 = vmul.f32 %v2849_v25, %v5265_v39  ;;  %v1721_v60 = vrot.slane %v5779_v43, 6  ;;  %v6807_v55 = vld [vmem:[#allocation116_spill] sm:$0xff] }
 0x306   :  { %2796 = vrot.lane.b32.xlu0 %v2789_v40, %s4122_s29  ;;  %2798 = vrot.lane.b32.xlu1 %v2791_v41, %s4122_s29  ;;  %v6799_v40 = vld [vmem:[#allocation109_spill] sm:$0xff]  ;;  %v1619_v41 = vadd.f32 %v6800_v31, %v1579_v62  ;;  %v2854_v62 = vmul.f32 %v2849_v25, %v5162_v15  ;;  %v2862_v2 = vrot.slane %v2850_v4, 3  ;;  %v1697_v16 = vadd.f32 %v6807_v55, %v1657_v56 }
 0x307   :  { %v1618_v47 = vadd.f32 %v6799_v40, %v1578_v28  ;;  %v2831_v28 = vsel %vm897_vm6, %v2828_v17, %v2830_v5  ;;  %v6806_v17 = vld [vmem:[#allocation115_spill] sm:$0xff]  ;;  %v2889_v48 = vstv %s5786_s8  ;;  %v6808_v25 = vld [vmem:[#allocation117_spill] sm:$0xff]  ;;  %v2866_v4 = vsel %vm897_vm6, %v2863_v21, %v2865_v36  ;;  %s6412_s8 = sld [smem:[#allocation6 + $0x4d]] }
 0x308   :  { %v5789_v13 = vpop.permute.xlu1 %2156  ;;  %v5791_v23 = vpop.permute.xlu0 %2154  ;;  %v1660_v5 = vadd.f32 %v6806_v17, %v1620_v8  ;;  %v2891_v31 = vmul.f32 %v2889_v48, %v5152_v57  ;;  %v2870_v61 = vrot.slane %v2855_v59, 3  ;;  %v2892_v8 = vmul.f32 %v2889_v48, %v5240_v24 }
 0x309   :  { %v1658_v3 = vadd.f32 %v6804_v11, %v1618_v47  ;;  %v1718_v12 = vsel %vm1715_vm8, %v1716_v37, %v1717_v50  ;;  %v1722_v56 = vrot.slane %v1707_v63, 6  ;;  %v1720_v11 = vsel %vm1715_vm8, %v1717_v50, %v1719_v51 }
 0x30a   :  { %2832 = vrot.lane.b32.xlu0 %v2824_v20, %s4123_s3  ;;  %2834 = vrot.lane.b32.xlu1 %v2826_v32, %s4123_s3  ;;  %v1708_v20 = vmul.f32 %v5653_v18, %v4262_v45  ;;  %v1659_v32 = vadd.f32 %v6805_v54, %v1619_v41  ;;  %v2864_v45 = vsel %vm897_vm6, %v2862_v2, %v2863_v21  ;;  %v2867_v18 = vrot.slane %v2853_v9, 3  ;;  %v6810_v21 = vld [vmem:[#allocation119_spill] sm:$0xff] }
 0x30b   :  { %v1698_v40 = vadd.f32 %v6808_v25, %v1658_v3  ;;  %v2868_v41 = vrot.slane %v2854_v62, 3  ;;  %v2890_v9 = vmul.f32 %v2889_v48, %v5144_v27  ;;  %v6809_v3 = vld [vmem:[#allocation118_spill] sm:$0xff]  ;;  %v1700_v36 = vadd.f32 %v6810_v21, %v1660_v5 }
 0x30c   :  { %v5809_v10 = vpop.permute.xlu1 %2178  ;;  %v5811_v34 = vpop.permute.xlu0 %2176  ;;  %v1699_v2 = vadd.f32 %v6809_v3, %v1659_v32  ;;  %v2903_v37 = vrot.slane %v2891_v31, 3  ;;  %v2893_v63 = vmul.f32 %v2889_v48, %v5159_v0  ;;  %v2895_v50 = vmul.f32 %v2889_v48, %v5265_v39 }
 0x30d   :  { %6803 = vst [vmem:[#allocation11_spill] sm:$0xff] %v5811_v34  ;;  %v1731_v62 = vadd.f32 %v1720_v11, %v1698_v40  ;;  %v2869_v17 = vsel %vm897_vm6, %v2867_v18, %v2868_v41  ;;  %v2871_v55 = vsel %vm897_vm6, %v2868_v41, %v2870_v61  ;;  %v1723_v51 = vsel %vm1715_vm8, %v1721_v60, %v1722_v56  ;;  %v6814_v18 = vld [vmem:[#allocation121_spill] sm:$0xff]  ;;  %v6817_v11 = vld [vmem:[#allocation122_spill] sm:$0xff] }
 0x30e   :  { %2836 = vrot.lane.b32.xlu0 %v2829_v38, %s4123_s3  ;;  %2838 = vrot.lane.b32.xlu1 %v2831_v28, %s4123_s3  ;;  %v1724_v38 = vrot.slane %v1708_v20, 6  ;;  %v1730_v28 = vadd.f32 %v1718_v12, %v1697_v16  ;;  %v2894_v20 = vmul.f32 %v2889_v48, %v5162_v15  ;;  %v2905_v16 = vrot.slane %v2892_v8, 3 }
 0x30f   :  { %v2902_v5 = vrot.slane %v2890_v9, 3  ;;  %v1732_v25 = vadd.f32 %v1723_v51, %v1699_v2  ;;  %v2907_v61 = vrot.slane %v2893_v63, 3  ;;  %v2929_v12 = vstv %s5835_s9  ;;  %v6818_v2 = vld [vmem:[#allocation123_spill] sm:$0xff]  ;;  %v6820_v63 = vld [vmem:[#allocation125_spill] sm:$0xff]  ;;  %s6431_s9 = sld [smem:[#allocation6 + $0x5f]] }
 0x310   :  { %v5829_v47 = vpop.permute.xlu1 %2182  ;;  %v5831_v43 = vpop.permute.xlu0 %2180  ;;  %v1725_v32 = vsel %vm1715_vm8, %v1722_v56, %v1724_v38  ;;  %v2908_v8 = vrot.slane %v2894_v20, 3  ;;  %v2906_v56 = vsel %vm897_vm6, %v2903_v37, %v2905_v16  ;;  %v2910_v38 = vrot.slane %v2895_v50, 3 }
 0x311   :  { %v1733_v40 = vadd.f32 %v1725_v32, %v1700_v36  ;;  %v2904_v60 = vsel %vm897_vm6, %v2902_v5, %v2903_v37  ;;  %v2931_v9 = vmul.f32 %v2929_v12, %v5152_v57  ;;  %v1772_v3 = vadd.f32 %v6817_v11, %v1732_v25  ;;  %v6819_v36 = vld [vmem:[#allocation124_spill] sm:$0xff]  ;;  %v6826_v11 = vld [vmem:[#allocation129_spill] sm:$0xff] }
 0x312   :  { %2872 = vrot.lane.b32.xlu0 %v2864_v45, %s4124_s5  ;;  %2874 = vrot.lane.b32.xlu1 %v2866_v4, %s4124_s5  ;;  %v6813_v45 = vld [vmem:[#allocation120_spill] sm:$0xff]  ;;  %v1771_v4 = vadd.f32 %v6814_v18, %v1731_v62  ;;  %v2930_v37 = vmul.f32 %v2929_v12, %v5144_v27  ;;  %v2909_v51 = vsel %vm897_vm6, %v2907_v61, %v2908_v8  ;;  %v6824_v18 = vld [vmem:[#allocation127_spill] sm:$0xff] }
 0x313   :  { %v1770_v31 = vadd.f32 %v6813_v45, %v1730_v28  ;;  %v2932_v28 = vmul.f32 %v2929_v12, %v5240_v24  ;;  %v1773_v21 = vadd.f32 %v6818_v2, %v1733_v40  ;;  %v2933_v32 = vmul.f32 %v2929_v12, %v5159_v0 }
 0x314   :  { %v5846_v59 = vpop.permute.xlu1 %2250  ;;  %v5848_v54 = vpop.permute.xlu0 %2248  ;;  %v1811_v20 = vadd.f32 %v6820_v63, %v1771_v4  ;;  %v2934_v5 = vmul.f32 %v2929_v12, %v5162_v15  ;;  %v2911_v25 = vsel %vm897_vm6, %v2908_v8, %v2910_v38  ;;  %v2943_v40 = vrot.slane %v2931_v9, 3 }
 0x315   :  { %6811 = vst [vmem:[#allocation12_spill] sm:$0xff] %v5846_v59  ;;  %6812 = vst [vmem:[#allocation13_spill] sm:$0xff] %v5848_v54  ;;  %v1810_v62 = vadd.f32 %v6819_v36, %v1770_v31  ;;  %v2945_v45 = vrot.slane %v2932_v28, 3  ;;  %v2935_v31 = vmul.f32 %v2929_v12, %v5265_v39  ;;  %v1813_v4 = vadd.f32 %v6824_v18, %v1773_v21 }
 0x316   :  { %2876 = vrot.lane.b32.xlu0 %v2869_v17, %s4124_s5  ;;  %2878 = vrot.lane.b32.xlu1 %v2871_v55, %s4124_s5  ;;  %v6821_v17 = vld [vmem:[#allocation126_spill] sm:$0xff]  ;;  %v1851_v61 = vadd.f32 %v6826_v11, %v1811_v20  ;;  %v2942_v36 = vrot.slane %v2930_v37, 3  ;;  %v2969_v63 = vstv %s5861_s11  ;;  %v2947_v12 = vrot.slane %v2933_v32, 3  ;;  %v6834_v11 = vld [vmem:[#allocation135_spill] sm:$0xff] }
 0x317   :  { %v1812_v55 = vadd.f32 %v6821_v17, %v1772_v3  ;;  %v6827_v3 = vld [vmem:[#allocation130_spill] sm:$0xff]  ;;  %v6828_v17 = vld [vmem:[#allocation131_spill] sm:$0xff]  ;;  %v2948_v28 = vrot.slane %v2934_v5, 3  ;;  %v2971_v21 = vmul.f32 %v2969_v63, %v5152_v57  ;;  %v2946_v20 = vsel %vm897_vm6, %v2943_v40, %v2945_v45  ;;  %v6832_v5 = vld [vmem:[#allocation133_spill] sm:$0xff] }
 0x318   :  { %v5863_v41 = vpop.permute.xlu1 %2254  ;;  %v5865_v48 = vpop.permute.xlu0 %2252  ;;  %v1853_v8 = vadd.f32 %v6828_v17, %v1813_v4  ;;  %v2972_v37 = vmul.f32 %v2969_v63, %v5240_v24  ;;  %v2970_v32 = vmul.f32 %v2969_v63, %v5144_v27  ;;  %v1891_v18 = vadd.f32 %v6832_v5, %v1851_v61  ;;  %v6833_v4 = vld [vmem:[#allocation134_spill] sm:$0xff]  ;;  %v6838_v5 = vld [vmem:[#allocation137_spill] sm:$0xff] }
 0x319   :  { %6815 = vst [vmem:[#allocation14_spill] sm:$0xff] %v5863_v41  ;;  %6816 = vst [vmem:[#allocation15_spill] sm:$0xff] %v5865_v48  ;;  %v1852_v2 = vadd.f32 %v6827_v3, %v1812_v55  ;;  %v2950_v55 = vrot.slane %v2935_v31, 3  ;;  %v2983_v17 = vrot.slane %v2971_v21, 3  ;;  %v2949_v61 = vsel %vm897_vm6, %v2947_v12, %v2948_v28  ;;  %v6839_v21 = vld [vmem:[#allocation138_spill] sm:$0xff] }
 0x31a   :  { %2912 = vrot.lane.b32.xlu0 %v2904_v60, %s4125_s7  ;;  %2914 = vrot.lane.b32.xlu1 %v2906_v56, %s4125_s7  ;;  %v6825_v60 = vld [vmem:[#allocation128_spill] sm:$0xff]  ;;  %v1893_v3 = vadd.f32 %v6834_v11, %v1853_v8  ;;  %v2975_v8 = vmul.f32 %v2969_v63, %v5265_v39 }
 0x31b   :  { %v1850_v56 = vadd.f32 %v6825_v60, %v1810_v62  ;;  %v2944_v62 = vsel %vm897_vm6, %v2942_v36, %v2943_v40  ;;  %v1892_v60 = vadd.f32 %v6833_v4, %v1852_v2  ;;  %v2027_v36 = vstv %s5878_s13  ;;  %v6835_v40 = vld [vmem:[#allocation136_spill] sm:$0xff] }
 0x31c   :  { %v5882_v16 = vpop.permute.xlu1 %2290  ;;  %v5884_v50 = vpop.permute.xlu0 %2288  ;;  %v2951_v2 = vsel %vm897_vm6, %v2948_v28, %v2950_v55  ;;  %v1931_v4 = vadd.f32 %v6838_v5, %v1891_v18  ;;  %v2028_v12 = vmul.f32 %v2027_v36, %v5144_v27  ;;  %v6845_v5 = vld [vmem:[#allocation142_spill] sm:$0xff] }
 0x31d   :  { %6822 = vst [vmem:[#allocation16_spill] sm:$0xff] %v5882_v16  ;;  %6823 = vst [vmem:[#allocation17_spill] sm:$0xff] %v5884_v50  ;;  %v1932_v11 = vadd.f32 %v6839_v21, %v1892_v60 }
 0x31e   :  { %2916 = vrot.lane.b32.xlu0 %v2909_v51, %s4125_s7  ;;  %2918 = vrot.lane.b32.xlu1 %v2911_v25, %s4125_s7  ;;  %v6831_v51 = vld [vmem:[#allocation132_spill] sm:$0xff] }
 0x31f   :  { %v1890_v25 = vadd.f32 %v6831_v51, %v1850_v56  ;;  %v2985_v51 = vrot.slane %v2972_v37, 3  ;;  %v1972_v21 = vadd.f32 %v6845_v5, %v1932_v11 }
 0x320   :  { %v5899_v38 = vpop.permute.xlu1 %2294  ;;  %v5901_v9 = vpop.permute.xlu0 %2292 }
 0x321   :  { %6829 = vst [vmem:[#allocation18_spill] sm:$0xff] %v5899_v38  ;;  %6830 = vst [vmem:[#allocation19_spill] sm:$0xff] %v5901_v9  ;;  %v1930_v45 = vadd.f32 %v6835_v40, %v1890_v25  ;;  %v2982_v25 = vrot.slane %v2970_v32, 3  ;;  %v6840_v40 = vld [vmem:[#allocation139_spill] sm:$0xff]  ;;  %v3041_v32 = vstv %s5904_s14  ;;  %v2986_v60 = vsel %vm897_vm6, %v2983_v17, %v2985_v51 }
 0x322   :  { %2952 = vrot.lane.b32.xlu0 %v2944_v62, %s4126_s10  ;;  %2954 = vrot.lane.b32.xlu1 %v2946_v20, %s4126_s10  ;;  %v2973_v62 = vmul.f32 %v2969_v63, %v5159_v0  ;;  %v2974_v20 = vmul.f32 %v2969_v63, %v5162_v15  ;;  %v3042_v51 = vmul.f32 %v3041_v32, %v5144_v27 }
 0x323   :  { %v2984_v55 = vsel %vm897_vm6, %v2982_v25, %v2983_v17  ;;  %v2193_v17 = vstv %s5917_s15 }
 0x324   :  { %v5920_v31 = vpop.permute.xlu1 %2330  ;;  %v5922_v56 = vpop.permute.xlu0 %2328  ;;  %v2987_v37 = vrot.slane %v2973_v62, 3  ;;  %v2988_v18 = vrot.slane %v2974_v20, 3  ;;  %v6846_v62 = vld [vmem:[#allocation143_spill] sm:$0xff]  ;;  %v2198_v9 = vmul.f32 %v2193_v17, %v5162_v15 }
 0x325   :  { %6836 = vst [vmem:[#allocation20_spill] sm:$0xff] %v5920_v31  ;;  %6837 = vst [vmem:[#allocation21_spill] sm:$0xff] %v5922_v56  ;;  %v1933_v56 = vadd.f32 %v6840_v40, %v1893_v3  ;;  %v6841_v31 = vld [vmem:[#allocation140_spill] sm:$0xff]  ;;  %v3043_v3 = vmul.f32 %v3041_v32, %v5152_v57  ;;  %v2029_v40 = vmul.f32 %v2027_v36, %v5152_v57 }
 0x326   :  { %2956 = vrot.lane.b32.xlu0 %v2949_v61, %s4126_s10  ;;  %2958 = vrot.lane.b32.xlu1 %v2951_v2, %s4126_s10  ;;  %v1970_v50 = vadd.f32 %v6841_v31, %v1930_v45  ;;  %v2990_v61 = vrot.slane %v2975_v8, 3  ;;  %v3044_v45 = vmul.f32 %v3041_v32, %v5240_v24  ;;  %v6844_v31 = vld [vmem:[#allocation141_spill] sm:$0xff]  ;;  %v5958_v8 = vmul.f32 %v2193_v17, %v5152_v57 }
 0x327   :  { %v1971_v2 = vadd.f32 %v6844_v31, %v1931_v4  ;;  %v1973_v20 = vadd.f32 %v6846_v62, %v1933_v56  ;;  %v2989_v11 = vsel %vm897_vm6, %v2987_v37, %v2988_v18  ;;  %v3055_v56 = vrot.slane %v3043_v3, 4 }
 0x328   :  { %v5938_v28 = vpop.permute.xlu1 %2334  ;;  %v5940_v63 = vpop.permute.xlu0 %2332  ;;  %v5953_v25 = vadd.f32 %v2028_v12, %v1970_v50  ;;  %v2991_v50 = vsel %vm897_vm6, %v2988_v18, %v2990_v61  ;;  %v3057_v12 = vrot.slane %v3044_v45, 4  ;;  %v3045_v31 = vmul.f32 %v3041_v32, %v5159_v0 }
 0x329   :  { %6842 = vst [vmem:[#allocation22_spill] sm:$0xff] %v5938_v28  ;;  %6843 = vst [vmem:[#allocation23_spill] sm:$0xff] %v5940_v63  ;;  %v5971_v5 = vadd.f32 %v2029_v40, %v1971_v2  ;;  %v2030_v62 = vmul.f32 %v2027_v36, %v5159_v0  ;;  %v2031_v37 = vmul.f32 %v2027_v36, %v5162_v15  ;;  %v3054_v28 = vrot.slane %v3042_v51, 4 }
 0x32a   :  { %2992 = vrot.lane.b32.xlu0 %v2984_v55, %s4127_s12  ;;  %2994 = vrot.lane.b32.xlu1 %v2986_v60, %s4127_s12  ;;  %v3046_v55 = vmul.f32 %v3041_v32, %v5162_v15  ;;  %v3047_v60 = vmul.f32 %v3041_v32, %v5265_v39  ;;  %v3081_v18 = vstv %s5936_s16  ;;  %v2207_v32 = vrot.slane %v5958_v8, 1 }
 0x32b   :  { %v3083_v2 = vmul.f32 %v3081_v18, %v5152_v57  ;;  %v3084_v40 = vmul.f32 %v3081_v18, %v5240_v24  ;;  %v3058_v36 = vsel %vm1170_vm7, %v3055_v56, %v3057_v12  ;;  %v3059_v51 = vrot.slane %v3045_v31, 4 }
 0x32c   :  { %v5960_v63 = vpop.permute.xlu1 %2370  ;;  %v5962_v4 = vpop.permute.xlu0 %2368  ;;  %v3062_v45 = vrot.slane %v3047_v60, 4  ;;  %v2199_v8 = vmul.f32 %v2193_v17, %v5265_v39  ;;  %v5996_v60 = vadd.f32 %v2030_v62, %v1972_v21  ;;  %v3086_v21 = vmul.f32 %v3081_v18, %v5162_v15 }
 0x32d   :  { %6847 = vst [vmem:[#allocation24_spill] sm:$0xff] %v5960_v63  ;;  %6848 = vst [vmem:[#allocation25_spill] sm:$0xff] %v5962_v4  ;;  %v2196_v4 = vmul.f32 %v2193_v17, %v5240_v24  ;;  %v2194_v63 = vmul.f32 %v2193_v17, %v5144_v27  ;;  %v3095_v31 = vrot.slane %v3083_v2, 4  ;;  %v3097_v38 = vrot.slane %v3084_v40, 4 }
 0x32e   :  { %2996 = vrot.lane.b32.xlu0 %v2989_v11, %s4127_s12  ;;  %2998 = vrot.lane.b32.xlu1 %v2991_v50, %s4127_s12  ;;  %v3056_v11 = vsel %vm1170_vm7, %v3054_v28, %v3055_v56  ;;  %v3060_v50 = vrot.slane %v3046_v55, 4  ;;  %v3082_v55 = vmul.f32 %v3081_v18, %v5144_v27 }
 0x32f   :  { %v2209_v16 = vrot.slane %v2196_v4, 1  ;;  %v2206_v28 = vrot.slane %v2194_v63, 1  ;;  %v3085_v63 = vmul.f32 %v3081_v18, %v5159_v0 }
 0x330   :  { %v5983_v61 = vpop.permute.xlu1 %2374  ;;  %v5985_v3 = vpop.permute.xlu0 %2372  ;;  %v3063_v12 = vsel %vm1170_vm7, %v3060_v50, %v3062_v45  ;;  %v3094_v2 = vrot.slane %v3082_v55, 4 }
 0x331   :  { %6849 = vst [vmem:[#allocation26_spill] sm:$0xff] %v5983_v61  ;;  %6850 = vst [vmem:[#allocation27_spill] sm:$0xff] %v5985_v3  ;;  %v2197_v61 = vmul.f32 %v2193_v17, %v5159_v0  ;;  %v5998_v3 = vadd.f32 %v2031_v37, %v1973_v20  ;;  %v2465_v17 = vstv %s5967_s17  ;;  %v3087_v20 = vmul.f32 %v3081_v18, %v5265_v39 }
 0x332   :  { %3064 = vrot.lane.b32.xlu0 %v3056_v11, %s4122_s29  ;;  %3066 = vrot.lane.b32.xlu1 %v3058_v36, %s4122_s29  ;;  %v3061_v11 = vsel %vm1170_vm7, %v3059_v51, %v3060_v50  ;;  %v6014_v62 = vsel %vm351_vm4, %v2207_v32, %v2209_v16  ;;  %v2212_v37 = vrot.slane %v2198_v9, 1  ;;  %v2214_v36 = vrot.slane %v2199_v8, 1 }
 0x333   :  { %6853 = vst [vmem:[#allocation30_spill] sm:$0xff] %v6014_v62  ;;  %v2211_v45 = vrot.slane %v2197_v61, 1  ;;  %v6019_v40 = vmul.f32 %v2465_v17, %v5152_v57  ;;  %v2468_v50 = vmul.f32 %v2465_v17, %v5240_v24  ;;  %v3121_v51 = vstv %s5980_s18 }
 0x334   :  { %v6001_v56 = vpop.permute.xlu1 %2410  ;;  %v6003_v4 = vpop.permute.xlu0 %2408  ;;  %v3098_v16 = vsel %vm1170_vm7, %v3095_v31, %v3097_v38  ;;  %v6029_v9 = vmul.f32 %v2465_v17, %v5144_v27  ;;  %v3123_v61 = vmul.f32 %v3121_v51, %v5152_v57  ;;  %v3124_v8 = vmul.f32 %v3121_v51, %v5240_v24 }
 0x335   :  { %6851 = vst [vmem:[#allocation28_spill] sm:$0xff] %v6001_v56  ;;  %6852 = vst [vmem:[#allocation29_spill] sm:$0xff] %v6003_v4  ;;  %v3096_v55 = vsel %vm1170_vm7, %v3094_v2, %v3095_v31  ;;  %v3099_v56 = vrot.slane %v3085_v63, 4  ;;  %v3122_v38 = vmul.f32 %v3121_v51, %v5144_v27  ;;  %v6046_v31 = vsel %vm351_vm4, %v2211_v45, %v2212_v37 }
 0x336   :  { %3070 = vrot.lane.b32.xlu1 %v3063_v12, %s4122_s29  ;;  %3068 = vrot.lane.b32.xlu0 %v3061_v11, %s4122_s29  ;;  %v3100_v12 = vrot.slane %v3086_v21, 4  ;;  %v3102_v11 = vrot.slane %v3087_v20, 4  ;;  %6858 = vst [vmem:[#allocation35_spill] sm:$0xff] %v6046_v31  ;;  %v2479_v21 = vrot.slane %v6019_v40, 2  ;;  %v3126_v20 = vmul.f32 %v3121_v51, %v5162_v15 }
 0x337   :  { %v3125_v45 = vmul.f32 %v3121_v51, %v5159_v0  ;;  %v3161_v40 = vstv %s6011_s19 }
 0x338   :  { %v6023_v18 = vpop.permute.xlu1 %2414  ;;  %v6025_v4 = vpop.permute.xlu0 %2412  ;;  %v3103_v54 = vsel %vm1170_vm7, %v3100_v12, %v3102_v11  ;;  %v3163_v11 = vmul.f32 %v3161_v40, %v5152_v57  ;;  %v3162_v59 = vmul.f32 %v3161_v40, %v5144_v27  ;;  %v3167_v48 = vmul.f32 %v3161_v40, %v5265_v39 }
 0x339   :  { %6854 = vst [vmem:[#allocation31_spill] sm:$0xff] %v6023_v18  ;;  %6855 = vst [vmem:[#allocation32_spill] sm:$0xff] %v6025_v4  ;;  %v6037_v18 = vsel %vm351_vm4, %v2206_v28, %v2207_v32  ;;  %v6040_v4 = vsel %vm351_vm4, %v2212_v37, %v2214_v36  ;;  %v3127_v32 = vmul.f32 %v3121_v51, %v5265_v39  ;;  %v2481_v28 = vrot.slane %v2468_v50, 2 }
 0x33a   :  { %6856 = vst [vmem:[#allocation33_spill] sm:$0xff] %v6037_v18  ;;  %6857 = vst [vmem:[#allocation34_spill] sm:$0xff] %v6040_v4  ;;  %3106 = vrot.lane.b32.xlu1 %v3098_v16, %s4123_s3  ;;  %3104 = vrot.lane.b32.xlu0 %v3096_v55, %s4123_s3  ;;  %v2478_v36 = vrot.slane %v6029_v9, 2  ;;  %v3135_v16 = vrot.slane %v3123_v61, 4  ;;  %v3137_v55 = vrot.slane %v3124_v8, 4  ;;  %v3101_v37 = vsel %vm1170_vm7, %v3099_v56, %v3100_v12 }
 0x33b   :  { %v2470_v50 = vmul.f32 %v2465_v17, %v5162_v15  ;;  %v2469_v9 = vmul.f32 %v2465_v17, %v5159_v0  ;;  %v3134_v61 = vrot.slane %v3122_v38, 4  ;;  %v3140_v8 = vrot.slane %v3126_v20, 4 }
 0x33c   :  { %v6051_v63 = vpop.permute.xlu1 %2450  ;;  %v6054_v2 = vpop.permute.xlu0 %2448  ;;  %v3164_v56 = vmul.f32 %v3161_v40, %v5240_v24  ;;  %v3166_v38 = vmul.f32 %v3161_v40, %v5162_v15  ;;  %v3165_v20 = vmul.f32 %v3161_v40, %v5159_v0  ;;  %v3175_v41 = vrot.slane %v3163_v11, 4 }
 0x33d   :  { %6859 = vst [vmem:[#allocation36_spill] sm:$0xff] %v6051_v63  ;;  %6860 = vst [vmem:[#allocation37_spill] sm:$0xff] %v6054_v2  ;;  %v2471_v63 = vmul.f32 %v2465_v17, %v5265_v39  ;;  %v3142_v2 = vrot.slane %v3127_v32, 4  ;;  %v3139_v17 = vrot.slane %v3125_v45, 4  ;;  %v3201_v32 = vstv %s6034_s20 }
 0x33e   :  { %3110 = vrot.lane.b32.xlu1 %v3103_v54, %s4123_s3  ;;  %3108 = vrot.lane.b32.xlu0 %v3101_v37, %s4123_s3  ;;  %v3138_v54 = vsel %vm1170_vm7, %v3135_v16, %v3137_v55  ;;  %v3136_v37 = vsel %vm1170_vm7, %v3134_v61, %v3135_v16  ;;  %v3203_v16 = vmul.f32 %v3201_v32, %v5152_v57  ;;  %v2483_v61 = vrot.slane %v2469_v9, 2 }
 0x33f   :  { %v3204_v55 = vmul.f32 %v3201_v32, %v5240_v24  ;;  %v2486_v45 = vrot.slane %v2471_v63, 2  ;;  %v3177_v18 = vrot.slane %v3164_v56, 4  ;;  %v3174_v31 = vrot.slane %v3162_v59, 4 }
 0x340   :  { %v6067_v51 = vpop.permute.xlu1 %2454  ;;  %v6069_v12 = vpop.permute.xlu0 %2452  ;;  %v3180_v4 = vrot.slane %v3166_v38, 4  ;;  %v3179_v34 = vrot.slane %v3165_v20, 4  ;;  %v3215_v63 = vrot.slane %v3203_v16, 4  ;;  %v6098_v11 = vmul.f32 %v3201_v32, %v5162_v15 }
 0x341   :  { %6861 = vst [vmem:[#allocation38_spill] sm:$0xff] %v6067_v51  ;;  %6862 = vst [vmem:[#allocation39_spill] sm:$0xff] %v6069_v12  ;;  %v6081_v51 = vsel %vm624_vm5, %v2479_v21, %v2481_v28  ;;  %v2484_v12 = vrot.slane %v2470_v50, 2  ;;  %v3143_v28 = vsel %vm1170_vm7, %v3140_v8, %v3142_v2  ;;  %v3202_v50 = vmul.f32 %v3201_v32, %v5144_v27 }
 0x342   :  { %6863 = vst [vmem:[#allocation40_spill] sm:$0xff] %v6081_v51  ;;  %3146 = vrot.lane.b32.xlu1 %v3138_v54, %s4124_s5  ;;  %3144 = vrot.lane.b32.xlu0 %v3136_v37, %s4124_s5  ;;  %v3182_v51 = vrot.slane %v3167_v48, 4  ;;  %v3207_v54 = vmul.f32 %v3201_v32, %v5265_v39  ;;  %v3141_v37 = vsel %vm1170_vm7, %v3139_v17, %v3140_v8  ;;  %v3217_v9 = vrot.slane %v3204_v55, 4 }
 0x343   :  { %v6101_v48 = vmul.f32 %v3201_v32, %v5159_v0  ;;  %v6106_v2 = vsel %vm624_vm5, %v2478_v36, %v2479_v21  ;;  %v6109_v59 = vsel %vm624_vm5, %v2484_v12, %v2486_v45  ;;  %v6112_v8 = vsel %vm624_vm5, %v2483_v61, %v2484_v12 }
 0x344   :  { %v6087_v40 = vpop.permute.xlu1 %2522  ;;  %v6089_v62 = vpop.permute.xlu0 %2520  ;;  %v3178_v56 = vsel %vm1170_vm7, %v3175_v41, %v3177_v18  ;;  %v3176_v20 = vsel %vm1170_vm7, %v3174_v31, %v3175_v41  ;;  %v3183_v32 = vsel %vm1170_vm7, %v3180_v4, %v3182_v51  ;;  %v3214_v16 = vrot.slane %v3202_v50, 4 }
 0x345   :  { %v3222_v55 = vrot.slane %v3207_v54, 4  ;;  %v2061_v21 = vadd.f32 %v5612_v33, %v5998_v3  ;;  %v2060_v36 = vadd.f32 %v5614_v19, %v5996_v60  ;;  %v3181_v12 = vsel %vm1170_vm7, %v3179_v34, %v3180_v4 }
 0x346   :  { %3150 = vrot.lane.b32.xlu1 %v3143_v28, %s4124_s5  ;;  %3148 = vrot.lane.b32.xlu0 %v3141_v37, %s4124_s5  ;;  %v3241_v45 = vstv %s6078_s21  ;;  %v3218_v18 = vsel %vm1170_vm7, %v3215_v63, %v3217_v9  ;;  %v3216_v41 = vsel %vm1170_vm7, %v3214_v16, %v3215_v63  ;;  %v3220_v31 = vrot.slane %v6098_v11, 4 }
 0x347   :  { %v3219_v51 = vrot.slane %v6101_v48, 4  ;;  %v2058_v33 = vadd.f32 %v5586_v52, %v5953_v25  ;;  %v2059_v19 = vadd.f32 %v5588_v30, %v5971_v5  ;;  %v2087_v34 = vadd.f32 %v5661_v1, %v2061_v21 }
 0x348   :  { %v6115_v17 = vpop.permute.xlu1 %2526  ;;  %v6117_v38 = vpop.permute.xlu0 %2524  ;;  %v2086_v3 = vadd.f32 %v5663_v14, %v2060_v36  ;;  %v3223_v61 = vsel %vm1170_vm7, %v3220_v31, %v3222_v55  ;;  %v3243_v28 = vmul.f32 %v3241_v45, %v5152_v57  ;;  %v3244_v50 = vmul.f32 %v3241_v45, %v5240_v24 }
 0x349   :  { %v3242_v52 = vmul.f32 %v3241_v45, %v5144_v27  ;;  %v2085_v25 = vadd.f32 %v5637_v49, %v2059_v19  ;;  %v2084_v30 = vadd.f32 %v5639_v44, %v2058_v33  ;;  %v2113_v1 = vadd.f32 %v5701_v7, %v2087_v34 }
 0x34a   :  { %3186 = vrot.lane.b32.xlu1 %v3178_v56, %s4125_s7  ;;  %3184 = vrot.lane.b32.xlu0 %v3176_v20, %s4125_s7  ;;  %v2112_v14 = vadd.f32 %v5703_v53, %v2086_v3  ;;  %v3246_v5 = vmul.f32 %v3241_v45, %v5162_v15  ;;  %v3247_v54 = vmul.f32 %v3241_v45, %v5265_v39  ;;  %v3313_v63 = vstv %s6103_s23 }
 0x34b   :  { %v3245_v37 = vmul.f32 %v3241_v45, %v5159_v0  ;;  %v2111_v49 = vadd.f32 %v5683_v42, %v2085_v25  ;;  %v2110_v44 = vadd.f32 %v5685_v35, %v2084_v30  ;;  %v2139_v7 = vadd.f32 %v5740_v58, %v2113_v1 }
 0x34c   :  { %v6139_v60 = vpop.permute.xlu1 %2562  ;;  %v6141_v4 = vpop.permute.xlu0 %2560  ;;  %v2138_v53 = vadd.f32 %v5742_v46, %v2112_v14  ;;  %v3255_v48 = vrot.slane %v3243_v28, 4  ;;  %v3257_v56 = vrot.slane %v3244_v50, 4  ;;  %v3315_v20 = vmul.f32 %v3313_v63, %v5152_v57 }
 0x34d   :  { %v2137_v16 = vadd.f32 %v5720_v26, %v2111_v49  ;;  %v2136_v42 = vadd.f32 %v5722_v22, %v2110_v44  ;;  %v2165_v35 = vadd.f32 %v5789_v13, %v2139_v7  ;;  %v3254_v46 = vrot.slane %v3242_v52, 4  ;;  %v6866_v52 = vld [vmem:[#allocation35_spill] sm:$0xff]  ;;  %v6867_v49 = vld [vmem:[#allocation30_spill] sm:$0xff]  ;;  %v6868_v7 = vld [vmem:[#allocation33_spill] sm:$0xff] }
 0x34e   :  { %3190 = vrot.lane.b32.xlu1 %v3183_v32, %s4125_s7  ;;  %3188 = vrot.lane.b32.xlu0 %v3181_v12, %s4125_s7  ;;  %v3316_v32 = vmul.f32 %v3313_v63, %v5240_v24  ;;  %v2164_v58 = vadd.f32 %v5791_v23, %v2138_v53  ;;  %v3260_v55 = vrot.slane %v3246_v5, 4  ;;  %v3262_v21 = vrot.slane %v3247_v54, 4 }
 0x34f   :  { %v3259_v36 = vrot.slane %v3245_v37, 4  ;;  %v2163_v12 = vadd.f32 %v5765_v6, %v2137_v16  ;;  %v2162_v45 = vadd.f32 %v5767_v29, %v2136_v42  ;;  %v2191_v26 = vadd.f32 %v5829_v47, %v2165_v35  ;;  %v6864_v6 = vld [vmem:[#allocation11_spill] sm:$0xff] }
 0x350   :  { %v6163_v9 = vpop.permute.xlu1 %2566  ;;  %v6165_v11 = vpop.permute.xlu0 %2564  ;;  %v2190_v22 = vadd.f32 %v5831_v43, %v2164_v58  ;;  %v3329_v33 = vrot.slane %v3316_v32, 5  ;;  %v3314_v19 = vmul.f32 %v3313_v63, %v5144_v27  ;;  %v3258_v29 = vsel %vm1170_vm7, %v3255_v48, %v3257_v56 }
 0x351   :  { %v2189_v34 = vadd.f32 %v5809_v10, %v2163_v12  ;;  %v2188_v3 = vadd.f32 %v6864_v6, %v2162_v45  ;;  %v3256_v47 = vsel %vm1170_vm7, %v3254_v46, %v3255_v48  ;;  %v6192_v43 = vmul.f32 %v3313_v63, %v5162_v15  ;;  %v6865_v10 = vld [vmem:[#allocation34_spill] sm:$0xff]  ;;  %v6871_v46 = vld [vmem:[#allocation12_spill] sm:$0xff] }
 0x352   :  { %3226 = vrot.lane.b32.xlu1 %v3218_v18, %s4126_s10  ;;  %3224 = vrot.lane.b32.xlu0 %v3216_v41, %s4126_s10  ;;  %v3221_v18 = vsel %vm1170_vm7, %v3219_v51, %v3220_v31  ;;  %v3327_v41 = vrot.slane %v3315_v20, 5  ;;  %v3319_v31 = vmul.f32 %v3313_v63, %v5265_v39  ;;  %v6196_v51 = vmul.f32 %v3313_v63, %v5159_v0  ;;  %v6869_v48 = vld [vmem:[#allocation14_spill] sm:$0xff]  ;;  %v6870_v20 = vld [vmem:[#allocation15_spill] sm:$0xff] }
 0x353   :  { %v3353_v28 = vstv %s6157_s24  ;;  %v2223_v50 = vadd.f32 %v6865_v10, %v2191_v26  ;;  %v2222_v25 = vadd.f32 %v6866_v52, %v2190_v22  ;;  %v3263_v30 = vsel %vm1170_vm7, %v3260_v55, %v3262_v21  ;;  %v6872_v21 = vld [vmem:[#allocation13_spill] sm:$0xff]  ;;  %v6873_v12 = vld [vmem:[#allocation18_spill] sm:$0xff]  ;;  %v6874_v26 = vld [vmem:[#allocation19_spill] sm:$0xff] }
 0x354   :  { %v6179_v13 = vpop.permute.xlu1 %2602  ;;  %v6181_v23 = vpop.permute.xlu0 %2600  ;;  %v3330_v5 = vsel %vm120_vm1, %v3327_v41, %v3329_v33  ;;  %v3326_v54 = vrot.slane %v3314_v19, 5  ;;  %v6211_v37 = vmul.f32 %v3353_v28, %v5152_v57  ;;  %v6214_v63 = vmul.f32 %v3353_v28, %v5240_v24  ;;  %v6878_v10 = vld [vmem:[#allocation23_spill] sm:$0xff] }
 0x355   :  { %v2221_v44 = vadd.f32 %v6867_v49, %v2189_v34  ;;  %v2220_v53 = vadd.f32 %v6868_v7, %v2188_v3  ;;  %v2263_v56 = vadd.f32 %v6869_v48, %v2223_v50  ;;  %v2262_v32 = vadd.f32 %v6870_v20, %v2222_v25  ;;  %v6875_v3 = vld [vmem:[#allocation16_spill] sm:$0xff] }
 0x356   :  { %3230 = vrot.lane.b32.xlu1 %v3223_v61, %s4126_s10  ;;  %3228 = vrot.lane.b32.xlu0 %v3221_v18, %s4126_s10  ;;  %v3261_v61 = vsel %vm1170_vm7, %v3259_v36, %v3260_v55  ;;  %v3328_v16 = vsel %vm120_vm1, %v3326_v54, %v3327_v41  ;;  %v3332_v42 = vrot.slane %v6192_v43, 5  ;;  %v3334_v35 = vrot.slane %v3319_v31, 5  ;;  %v6877_v31 = vld [vmem:[#allocation22_spill] sm:$0xff] }
 0x357   :  { %v3331_v58 = vrot.slane %v6196_v51, 5  ;;  %v2261_v55 = vadd.f32 %v6871_v46, %v2221_v44  ;;  %v2260_v36 = vadd.f32 %v6872_v21, %v2220_v53  ;;  %v2303_v45 = vadd.f32 %v6873_v12, %v2263_v56  ;;  %v6880_v44 = vld [vmem:[#allocation21_spill] sm:$0xff]  ;;  %v6881_v53 = vld [vmem:[#allocation26_spill] sm:$0xff]  ;;  %v6882_v56 = vld [vmem:[#allocation27_spill] sm:$0xff] }
 0x358   :  { %v6205_v1 = vpop.permute.xlu1 %2606  ;;  %v6207_v14 = vpop.permute.xlu0 %2604  ;;  %v2302_v22 = vadd.f32 %v6874_v26, %v2262_v32  ;;  %v3367_v41 = vrot.slane %v6211_v37, 5  ;;  %v3369_v19 = vrot.slane %v6214_v63, 5  ;;  %v3354_v34 = vmul.f32 %v3353_v28, %v5144_v27  ;;  %v6879_v63 = vld [vmem:[#allocation20_spill] sm:$0xff] }
 0x359   :  { %v3358_v6 = vmul.f32 %v3353_v28, %v5162_v15  ;;  %v2343_v51 = vadd.f32 %v6877_v31, %v2303_v45  ;;  %v3335_v52 = vsel %vm120_vm1, %v3332_v42, %v3334_v35  ;;  %v3359_v25 = vmul.f32 %v3353_v28, %v5265_v39  ;;  %v6885_v45 = vld [vmem:[#allocation31_spill] sm:$0xff] }
 0x35a   :  { %3266 = vrot.lane.b32.xlu1 %v3258_v29, %s4127_s12  ;;  %3264 = vrot.lane.b32.xlu0 %v3256_v47, %s4127_s12  ;;  %v2301_v29 = vadd.f32 %v6875_v3, %v2261_v55  ;;  %v6876_v47 = vld [vmem:[#allocation17_spill] sm:$0xff]  ;;  %v2342_v50 = vadd.f32 %v6878_v10, %v2302_v22  ;;  %v3357_v54 = vmul.f32 %v3353_v28, %v5159_v0  ;;  %v3393_v37 = vstv %s6199_s25  ;;  %v6883_v55 = vld [vmem:[#allocation24_spill] sm:$0xff] }
 0x35b   :  { %v2300_v43 = vadd.f32 %v6876_v47, %v2260_v36  ;;  %v2383_v48 = vadd.f32 %v6881_v53, %v2343_v51  ;;  %v3366_v32 = vrot.slane %v3354_v34, 5  ;;  %v3372_v35 = vrot.slane %v3358_v6, 5  ;;  %v6884_v36 = vld [vmem:[#allocation25_spill] sm:$0xff]  ;;  %v6886_v22 = vld [vmem:[#allocation32_spill] sm:$0xff] }
 0x35c   :  { %v6231_v18 = vpop.permute.xlu1 %2642  ;;  %v6233_v33 = vpop.permute.xlu0 %2640  ;;  %v2341_v49 = vadd.f32 %v6879_v63, %v2301_v29  ;;  %v2382_v20 = vadd.f32 %v6882_v56, %v2342_v50  ;;  %v3395_v28 = vmul.f32 %v3393_v37, %v5152_v57  ;;  %v3396_v46 = vmul.f32 %v3393_v37, %v5240_v24  ;;  %v6888_v51 = vld [vmem:[#allocation29_spill] sm:$0xff]  ;;  %v6889_v50 = vld [vmem:[#allocation38_spill] sm:$0xff] }
 0x35d   :  { %v2340_v7 = vadd.f32 %v6880_v44, %v2300_v43  ;;  %v2423_v26 = vadd.f32 %v6885_v45, %v2383_v48  ;;  %v3374_v29 = vrot.slane %v3359_v25, 5  ;;  %v3371_v47 = vrot.slane %v3357_v54, 5  ;;  %v6887_v43 = vld [vmem:[#allocation28_spill] sm:$0xff] }
 0x35e   :  { %3270 = vrot.lane.b32.xlu1 %v3263_v30, %s4127_s12  ;;  %3268 = vrot.lane.b32.xlu0 %v3261_v61, %s4127_s12  ;;  %v2381_v21 = vadd.f32 %v6883_v55, %v2341_v49  ;;  %v2422_v3 = vadd.f32 %v6886_v22, %v2382_v20  ;;  %v3394_v34 = vmul.f32 %v3393_v37, %v5144_v27  ;;  %v2737_v6 = vstv %s6225_s26  ;;  %v6890_v49 = vld [vmem:[#allocation39_spill] sm:$0xff]  ;;  %v6891_v48 = vld [vmem:[#allocation36_spill] sm:$0xff]  ;;  %v6892_v20 = vld [vmem:[#allocation37_spill] sm:$0xff] }
 0x35f   :  { %v2380_v12 = vadd.f32 %v6884_v36, %v2340_v7  ;;  %v2463_v63 = vadd.f32 %v6889_v50, %v2423_v26  ;;  %v6278_v25 = vmul.f32 %v2737_v6, %v5152_v57  ;;  %v6281_v54 = vmul.f32 %v2737_v6, %v5240_v24 }
 0x360   :  { %v6255_v30 = vpop.permute.xlu1 %2646  ;;  %v6257_v61 = vpop.permute.xlu0 %2644  ;;  %v2421_v31 = vadd.f32 %v6887_v43, %v2381_v21  ;;  %v2462_v44 = vadd.f32 %v6890_v49, %v2422_v3  ;;  %v3333_v21 = vsel %vm120_vm1, %v3331_v58, %v3332_v42  ;;  %v3370_v36 = vsel %vm120_vm1, %v3367_v41, %v3369_v19  ;;  %v6893_v43 = vld [vmem:[#allocation40_spill] sm:$0xff] }
 0x361   :  { %v2420_v10 = vadd.f32 %v6888_v51, %v2380_v12  ;;  %v6292_v12 = vmul.f32 %v2737_v6, %v5144_v27  ;;  %v6295_v45 = vstv %s6249_s0  ;;  %v2495_v26 = vadd.f32 %v6109_v59, %v2463_v63 }
 0x362   :  { %3338 = vrot.lane.b32.xlu1 %v3330_v5, %s4122_s29  ;;  %3336 = vrot.lane.b32.xlu0 %v3328_v16, %s4122_s29  ;;  %v3407_v5 = vrot.slane %v3395_v28, 5  ;;  %v3409_v16 = vrot.slane %v3396_v46, 5  ;;  %v2461_v56 = vadd.f32 %v6891_v48, %v2421_v31  ;;  %v3368_v28 = vsel %vm120_vm1, %v3366_v32, %v3367_v41 }
 0x363   :  { %v2460_v55 = vadd.f32 %v6892_v20, %v2420_v10  ;;  %v3375_v46 = vsel %vm120_vm1, %v3372_v35, %v3374_v29  ;;  %v2494_v22 = vadd.f32 %v6112_v8, %v2462_v44  ;;  %v3373_v42 = vsel %vm120_vm1, %v3371_v47, %v3372_v35 }
 0x364   :  { %v6273_v7 = vpop.permute.xlu1 %2682  ;;  %v6275_v53 = vpop.permute.xlu0 %2680  ;;  %v3406_v58 = vrot.slane %v3394_v34, 5  ;;  %v3410_v3 = vsel %vm120_vm1, %v3407_v5, %v3409_v16  ;;  %v2751_v41 = vrot.slane %v6278_v25, 3  ;;  %v2753_v32 = vrot.slane %v6281_v54, 3 }
 0x365   :  { %v6304_v29 = vmul.f32 %v3393_v37, %v5162_v15  ;;  %v2493_v31 = vadd.f32 %v6893_v43, %v2461_v56  ;;  %v2492_v59 = vadd.f32 %v6106_v2, %v2460_v55  ;;  %v2535_v8 = vadd.f32 %v6115_v17, %v2495_v26 }
 0x366   :  { %3342 = vrot.lane.b32.xlu1 %v3335_v52, %s4122_s29  ;;  %3340 = vrot.lane.b32.xlu0 %v3333_v21, %s4122_s29  ;;  %v2534_v35 = vadd.f32 %v6117_v38, %v2494_v22  ;;  %v3408_v47 = vsel %vm120_vm1, %v3406_v58, %v3407_v5  ;;  %v2750_v34 = vrot.slane %v6292_v12, 3  ;;  %v3399_v51 = vmul.f32 %v3393_v37, %v5265_v39 }
 0x367   :  { %v3397_v10 = vmul.f32 %v3393_v37, %v5159_v0  ;;  %v2533_v50 = vadd.f32 %v6087_v40, %v2493_v31  ;;  %v2532_v2 = vadd.f32 %v6089_v62, %v2492_v59  ;;  %v2575_v17 = vadd.f32 %v6163_v9, %v2535_v8 }
 0x368   :  { %v2687_v19 = vpop.permute.xlu1 %2686  ;;  %v2685_v52 = vpop.permute.xlu0 %2684  ;;  %v2574_v38 = vadd.f32 %v6165_v11, %v2534_v35  ;;  %v2742_v44 = vmul.f32 %v2737_v6, %v5162_v15  ;;  %v2743_v5 = vmul.f32 %v2737_v6, %v5265_v39  ;;  %v2741_v16 = vmul.f32 %v2737_v6, %v5159_v0 }
 0x369   :  { %v3435_v25 = vmul.f32 %v6295_v45, %v5152_v57  ;;  %v2573_v37 = vadd.f32 %v6139_v60, %v2533_v50  ;;  %v2572_v40 = vadd.f32 %v6141_v4, %v2532_v2  ;;  %v2615_v62 = vadd.f32 %v6205_v1, %v2575_v17 }
 0x36a   :  { %3378 = vrot.lane.b32.xlu1 %v3370_v36, %s4123_s3  ;;  %3376 = vrot.lane.b32.xlu0 %v3368_v28, %s4123_s3  ;;  %v2614_v9 = vadd.f32 %v6207_v14, %v2574_v38  ;;  %v3412_v11 = vrot.slane %v6304_v29, 5  ;;  %v3414_v54 = vrot.slane %v3399_v51, 5  ;;  %v3411_v48 = vrot.slane %v3397_v10, 5 }
 0x36b   :  { %v3436_v6 = vmul.f32 %v6295_v45, %v5240_v24  ;;  %v2613_v60 = vadd.f32 %v6179_v13, %v2573_v37  ;;  %v2612_v4 = vadd.f32 %v6181_v23, %v2572_v40  ;;  %v2655_v1 = vadd.f32 %v6255_v30, %v2615_v62 }
 0x36c   :  { %v2723_v63 = vpop.permute.xlu1 %2722  ;;  %v2721_v49 = vpop.permute.xlu0 %2720  ;;  %v2654_v14 = vadd.f32 %v6257_v61, %v2614_v9  ;;  %v2756_v55 = vrot.slane %v2742_v44, 3  ;;  %v2758_v21 = vrot.slane %v2743_v5, 3  ;;  %v2755_v36 = vrot.slane %v2741_v16, 3 }
 0x36d   :  { %v3447_v28 = vrot.slane %v3435_v25, 5  ;;  %v2652_v12 = vadd.f32 %v6233_v33, %v2612_v4  ;;  %v2695_v26 = vadd.f32 %v2687_v19, %v2655_v1  ;;  %v3449_v13 = vrot.slane %v3436_v6, 5 }
 0x36e   :  { %3382 = vrot.lane.b32.xlu1 %v3375_v46, %s4123_s3  ;;  %3380 = vrot.lane.b32.xlu0 %v3373_v42, %s4123_s3  ;;  %v2653_v46 = vadd.f32 %v6231_v18, %v2613_v60  ;;  %v2694_v22 = vadd.f32 %v2685_v52, %v2654_v14  ;;  %v3434_v23 = vmul.f32 %v6295_v45, %v5144_v27 }
 0x36f   :  { %v3438_v30 = vmul.f32 %v6295_v45, %v5162_v15  ;;  %v3439_v61 = vmul.f32 %v6295_v45, %v5265_v39  ;;  %v2692_v33 = vadd.f32 %v6275_v53, %v2652_v12  ;;  %v2754_v19 = vsel %vm897_vm6, %v2751_v41, %v2753_v32 }
 0x370   :  { %v2727_v56 = vpop.permute.xlu1 %2726  ;;  %v2725_v20 = vpop.permute.xlu0 %2724  ;;  %v2693_v18 = vadd.f32 %v6273_v7, %v2653_v46  ;;  %v3415_v43 = vsel %vm120_vm1, %v3412_v11, %v3414_v54  ;;  %v3437_v31 = vmul.f32 %v6295_v45, %v5159_v0  ;;  %v3413_v7 = vsel %vm120_vm1, %v3411_v48, %v3412_v11 }
 0x371   :  { %v2735_v42 = vadd.f32 %v2727_v56, %v2695_v26  ;;  %v2734_v58 = vadd.f32 %v2725_v20, %v2694_v22  ;;  %v2732_v8 = vadd.f32 %v2721_v49, %v2692_v33  ;;  %v2759_v53 = vsel %vm897_vm6, %v2756_v55, %v2758_v21 }
 0x372   :  { %3418 = vrot.lane.b32.xlu1 %v3410_v3, %s4124_s5  ;;  %3416 = vrot.lane.b32.xlu0 %v3408_v47, %s4124_s5  ;;  %v2752_v3 = vsel %vm897_vm6, %v2750_v34, %v2751_v41  ;;  %v2733_v59 = vadd.f32 %v2723_v63, %v2693_v18  ;;  %v2757_v32 = vsel %vm897_vm6, %v2755_v36, %v2756_v55  ;;  %v3446_v35 = vrot.slane %v3434_v23, 5 }
 0x373   :  { %v3450_v41 = vsel %vm120_vm1, %v3447_v28, %v3449_v13  ;;  %v3473_v47 = vstv %s6334_s27  ;;  %v2767_v34 = vadd.f32 %v2759_v53, %v2735_v42  ;;  %v2766_v51 = vadd.f32 %v2757_v32, %v2734_v58 }
 0x374   :  { %v2795_v52 = vpop.permute.xlu1 %2794  ;;  %v2793_v29 = vpop.permute.xlu0 %2792  ;;  %v3452_v10 = vrot.slane %v3438_v30, 5  ;;  %v3454_v45 = vrot.slane %v3439_v61, 5  ;;  %v3448_v17 = vsel %vm120_vm1, %v3446_v35, %v3447_v28  ;;  %v3451_v38 = vrot.slane %v3437_v31, 5 }
 0x375   :  { %v3475_v63 = vmul.f32 %v3473_v47, %v5152_v57  ;;  %v3476_v49 = vmul.f32 %v3473_v47, %v5240_v24  ;;  %v2765_v44 = vadd.f32 %v2754_v19, %v2733_v59  ;;  %v2764_v5 = vadd.f32 %v2752_v3, %v2732_v8 }
 0x376   :  { %3422 = vrot.lane.b32.xlu1 %v3415_v43, %s4124_s5  ;;  %3420 = vrot.lane.b32.xlu0 %v3413_v7, %s4124_s5  ;;  %v3474_v62 = vmul.f32 %v3473_v47, %v5144_v27  ;;  %v3478_v9 = vmul.f32 %v3473_v47, %v5162_v15  ;;  %v3455_v48 = vsel %vm120_vm1, %v3452_v10, %v3454_v45  ;;  %v3513_v36 = vstv %s6364_s28 }
 0x377   :  { %v2805_v37 = vadd.f32 %v2795_v52, %v2765_v44  ;;  %v2804_v40 = vadd.f32 %v2793_v29, %v2764_v5  ;;  %v3487_v6 = vrot.slane %v3475_v63, 5  ;;  %v3489_v60 = vrot.slane %v3476_v49, 5 }
 0x378   :  { %v2799_v50 = vpop.permute.xlu1 %2798  ;;  %v2797_v2 = vpop.permute.xlu0 %2796  ;;  %v3479_v4 = vmul.f32 %v3473_v47, %v5265_v39  ;;  %v3453_v56 = vsel %vm120_vm1, %v3451_v38, %v3452_v10  ;;  %v3477_v20 = vmul.f32 %v3473_v47, %v5159_v0  ;;  %v3486_v55 = vrot.slane %v3474_v62, 5 }
 0x379   :  { %v2807_v16 = vadd.f32 %v2799_v50, %v2767_v34  ;;  %v2806_v25 = vadd.f32 %v2797_v2, %v2766_v51  ;;  %v3492_v21 = vrot.slane %v3478_v9, 5  ;;  %v3490_v12 = vsel %vm120_vm1, %v3487_v6, %v3489_v60 }
 0x37a   :  { %3458 = vrot.lane.b32.xlu1 %v3450_v41, %s4125_s7  ;;  %3456 = vrot.lane.b32.xlu0 %v3448_v17, %s4125_s7  ;;  %v3494_v26 = vrot.slane %v3479_v4, 5  ;;  %v3515_v22 = vmul.f32 %v3513_v36, %v5152_v57  ;;  %v3516_v13 = vmul.f32 %v3513_v36, %v5240_v24  ;;  %v3488_v61 = vsel %vm120_vm1, %v3486_v55, %v3487_v6 }
 0x37b   :  { %v3491_v18 = vrot.slane %v3477_v20, 5  ;;  %v3514_v33 = vmul.f32 %v3513_v36, %v5144_v27  ;;  %v3519_v42 = vmul.f32 %v3513_v36, %v5265_v39  ;;  %v3518_v43 = vmul.f32 %v3513_v36, %v5162_v15 }
 0x37c   :  { %v2835_v11 = vpop.permute.xlu1 %2834  ;;  %v2833_v54 = vpop.permute.xlu0 %2832  ;;  %v3495_v52 = vsel %vm120_vm1, %v3492_v21, %v3494_v26  ;;  %v3527_v3 = vrot.slane %v3515_v22, 5  ;;  %v3529_v29 = vrot.slane %v3516_v13, 5  ;;  %v3517_v7 = vmul.f32 %v3513_v36, %v5159_v0 }
 0x37d   :  { %v2845_v1 = vadd.f32 %v2835_v11, %v2805_v37  ;;  %v2844_v14 = vadd.f32 %v2833_v54, %v2804_v40  ;;  %v3493_v8 = vsel %vm120_vm1, %v3491_v18, %v3492_v21  ;;  %v3526_v53 = vrot.slane %v3514_v33, 5 }
 0x37e   :  { %3462 = vrot.lane.b32.xlu1 %v3455_v48, %s4125_s7  ;;  %3460 = vrot.lane.b32.xlu0 %v3453_v56, %s4125_s7  ;;  %v3534_v32 = vrot.slane %v3519_v42, 5  ;;  %v3585_v41 = vstv %s3989_s30  ;;  %v3530_v34 = vsel %vm120_vm1, %v3527_v3, %v3529_v29  ;;  %v3532_v10 = vrot.slane %v3518_v43, 5 }
 0x37f   :  { %v3528_v51 = vsel %vm120_vm1, %v3526_v53, %v3527_v3  ;;  %v3587_v45 = vmul.f32 %v3585_v41, %v5152_v57  ;;  %v3531_v17 = vrot.slane %v3517_v7, 5  ;;  %v3588_v38 = vmul.f32 %v3585_v41, %v5240_v24 }
 0x380   :  { %v2839_v28 = vpop.permute.xlu1 %2838  ;;  %v2837_v46 = vpop.permute.xlu0 %2836  ;;  %v3535_v63 = vsel %vm120_vm1, %v3532_v10, %v3534_v32  ;;  %v3586_v49 = vmul.f32 %v3585_v41, %v5144_v27  ;;  %v3625_v44 = vstv %s3990_s4  ;;  %v3590_v37 = vmul.f32 %v3585_v41, %v5162_v15 }
 0x381   :  { %v2847_v23 = vadd.f32 %v2839_v28, %v2807_v16  ;;  %v2846_v30 = vadd.f32 %v2837_v46, %v2806_v25  ;;  %v3599_v25 = vrot.slane %v3587_v45, 6  ;;  %v3591_v40 = vmul.f32 %v3585_v41, %v5265_v39 }
 0x382   :  { %3498 = vrot.lane.b32.xlu1 %v3490_v12, %s4126_s10  ;;  %3496 = vrot.lane.b32.xlu0 %v3488_v61, %s4126_s10  ;;  %v3589_v62 = vmul.f32 %v3585_v41, %v5159_v0  ;;  %v3533_v54 = vsel %vm120_vm1, %v3531_v17, %v3532_v10  ;;  %v3601_v48 = vrot.slane %v3588_v38, 6  ;;  %v3627_v6 = vmul.f32 %v3625_v44, %v5152_v57 }
 0x383   :  { %v3628_v60 = vmul.f32 %v3625_v44, %v5240_v24  ;;  %v3598_v4 = vrot.slane %v3586_v49, 6  ;;  %v3604_v56 = vrot.slane %v3590_v37, 6  ;;  %v3606_v20 = vrot.slane %v3591_v40, 6 }
 0x384   :  { %v2875_v58 = vpop.permute.xlu1 %2874  ;;  %v2873_v19 = vpop.permute.xlu0 %2872  ;;  %v3603_v55 = vrot.slane %v3589_v62, 6  ;;  %v3602_v28 = vsel %vm1715_vm8, %v3599_v25, %v3601_v48  ;;  %v3639_v12 = vrot.slane %v3627_v6, 6  ;;  %v3626_v22 = vmul.f32 %v3625_v44, %v5144_v27 }
 0x385   :  { %v2885_v31 = vadd.f32 %v2875_v58, %v2845_v1  ;;  %v2884_v59 = vadd.f32 %v2873_v19, %v2844_v14  ;;  %v3600_v46 = vsel %vm1715_vm8, %v3598_v4, %v3599_v25  ;;  %v3641_v26 = vrot.slane %v3628_v60, 6 }
 0x386   :  { %3502 = vrot.lane.b32.xlu1 %v3495_v52, %s4126_s10  ;;  %3500 = vrot.lane.b32.xlu0 %v3493_v8, %s4126_s10  ;;  %v3630_v13 = vmul.f32 %v3625_v44, %v5162_v15  ;;  %v3607_v33 = vsel %vm1715_vm8, %v3604_v56, %v3606_v20  ;;  %v3605_v42 = vsel %vm1715_vm8, %v3603_v55, %v3604_v56  ;;  %v3665_v58 = vstv %s6405_s6 }
 0x387   :  { %v3667_v3 = vmul.f32 %v3665_v58, %v5152_v57  ;;  %v3668_v29 = vmul.f32 %v3665_v58, %v5240_v24  ;;  %v3642_v43 = vsel %vm1715_vm8, %v3639_v12, %v3641_v26  ;;  %v3009_v53 = vstv %s6412_s8 }
 0x388   :  { %v2879_v35 = vpop.permute.xlu1 %2878  ;;  %v2877_v47 = vpop.permute.xlu0 %2876  ;;  %v3671_v49 = vmul.f32 %v3665_v58, %v5265_v39  ;;  %v3670_v40 = vmul.f32 %v3665_v58, %v5162_v15  ;;  %v3014_v48 = vmul.f32 %v3009_v53, %v5162_v15  ;;  %v3015_v6 = vmul.f32 %v3009_v53, %v5265_v39 }
 0x389   :  { %v2887_v50 = vadd.f32 %v2879_v35, %v2847_v23  ;;  %v2886_v2 = vadd.f32 %v2877_v47, %v2846_v30  ;;  %v3631_v23 = vmul.f32 %v3625_v44, %v5265_v39  ;;  %v3629_v30 = vmul.f32 %v3625_v44, %v5159_v0 }
 0x38a   :  { %3538 = vrot.lane.b32.xlu1 %v3530_v34, %s4127_s12  ;;  %3536 = vrot.lane.b32.xlu0 %v3528_v51, %s4127_s12  ;;  %v3666_v47 = vmul.f32 %v3665_v58, %v5144_v27  ;;  %v3011_v34 = vmul.f32 %v3009_v53, %v5152_v57  ;;  %v3012_v51 = vmul.f32 %v3009_v53, %v5240_v24  ;;  %v3705_v56 = vstv %s6431_s9 }
 0x38b   :  { %v3646_v8 = vrot.slane %v3631_v23, 6  ;;  %v3643_v7 = vrot.slane %v3629_v30, 6  ;;  %v3013_v60 = vmul.f32 %v3009_v53, %v5159_v0  ;;  %v3028_v23 = vrot.slane %v3014_v48, 4 }
 0x38c   :  { %v2915_v5 = vpop.permute.xlu1 %2914  ;;  %v2913_v16 = vpop.permute.xlu0 %2912  ;;  %v3023_v25 = vrot.slane %v3011_v34, 4  ;;  %v3025_v37 = vrot.slane %v3012_v51, 4  ;;  %v3030_v30 = vrot.slane %v3015_v6, 4 }
 0x38d   :  { %v2925_v9 = vadd.f32 %v2915_v5, %v2885_v31  ;;  %v2924_v11 = vadd.f32 %v2913_v16, %v2884_v59  ;;  %v3638_v31 = vrot.slane %v3626_v22, 6  ;;  %v3644_v59 = vrot.slane %v3630_v13, 6 }
 0x38e   :  { %3542 = vrot.lane.b32.xlu1 %v3535_v63, %s4127_s12  ;;  %3540 = vrot.lane.b32.xlu0 %v3533_v54, %s4127_s12  ;;  %v3010_v63 = vmul.f32 %v3009_v53, %v5144_v27  ;;  %v3678_v16 = vrot.slane %v3666_v47, 6  ;;  %v3669_v54 = vmul.f32 %v3665_v58, %v5159_v0  ;;  %v3709_v53 = vmul.f32 %v3705_v56, %v5159_v0 }
 0x38f   :  { %v3640_v35 = vsel %vm1715_vm8, %v3638_v31, %v3639_v12  ;;  %v3647_v17 = vsel %vm1715_vm8, %v3644_v59, %v3646_v8  ;;  %v3645_v38 = vsel %vm1715_vm8, %v3643_v7, %v3644_v59  ;;  %v3711_v31 = vmul.f32 %v3705_v56, %v5265_v39 }
 0x390   :  { %v2919_v1 = vpop.permute.xlu1 %2918  ;;  %v2917_v14 = vpop.permute.xlu0 %2916  ;;  %v3683_v13 = vrot.slane %v3669_v54, 6 }
 0x391   :  { %v2927_v21 = vadd.f32 %v2919_v1, %v2887_v50  ;;  %v2926_v36 = vadd.f32 %v2917_v14, %v2886_v2  ;;  %v3679_v50 = vrot.slane %v3667_v3, 6  ;;  %v3681_v2 = vrot.slane %v3668_v29, 6 }
 0x392   :  { %3610 = vrot.lane.b32.xlu1 %v3602_v28, %s4122_s29  ;;  %3608 = vrot.lane.b32.xlu0 %v3600_v46, %s4122_s29  ;;  %v3022_v1 = vrot.slane %v3010_v63, 4  ;;  %v3686_v14 = vrot.slane %v3671_v49, 6  ;;  %v3707_v28 = vmul.f32 %v3705_v56, %v5152_v57  ;;  %v3708_v46 = vmul.f32 %v3705_v56, %v5240_v24 }
 0x393   :  { %v3680_v4 = vsel %vm1715_vm8, %v3678_v16, %v3679_v50  ;;  %v3726_v63 = vrot.slane %v3711_v31, 6  ;;  %v3723_v16 = vrot.slane %v3709_v53, 6 }
 0x394   :  { %v2955_v61 = vpop.permute.xlu1 %2954  ;;  %v2953_v18 = vpop.permute.xlu0 %2952  ;;  %v3024_v22 = vsel %vm1170_vm7, %v3022_v1, %v3023_v25  ;;  %v3719_v3 = vrot.slane %v3707_v28, 6  ;;  %v3721_v29 = vrot.slane %v3708_v46, 6 }
 0x395   :  { %v2965_v19 = vadd.f32 %v2955_v61, %v2925_v9  ;;  %v2964_v52 = vadd.f32 %v2953_v18, %v2924_v11  ;;  %v3682_v11 = vsel %vm1715_vm8, %v3679_v50, %v3681_v2  ;;  %v3027_v61 = vrot.slane %v3013_v60, 4 }
 0x396   :  { %3614 = vrot.lane.b32.xlu1 %v3607_v33, %s4122_s29  ;;  %3612 = vrot.lane.b32.xlu0 %v3605_v42, %s4122_s29  ;;  %s6451_s29 = sld [smem:[#allocation6 + $0x60]]  ;;  %v3706_v18 = vmul.f32 %v3705_v56, %v5144_v27 }
 0x398   :  { %v2959_v32 = vpop.permute.xlu1 %2958  ;;  %v2957_v41 = vpop.permute.xlu0 %2956 }
 0x399   :  { %v2967_v10 = vadd.f32 %v2959_v32, %v2927_v21  ;;  %v2966_v45 = vadd.f32 %v2957_v41, %v2926_v36  ;;  %v3026_v21 = vsel %vm1170_vm7, %v3023_v25, %v3025_v37  ;;  %v3684_v36 = vrot.slane %v3670_v40, 6 }
 0x39a   :  { %3650 = vrot.lane.b32.xlu1 %v3642_v43, %s4123_s3  ;;  %3648 = vrot.lane.b32.xlu0 %v3640_v35, %s4123_s3  ;;  %v3710_v43 = vmul.f32 %v3705_v56, %v5162_v15  ;;  %v3031_v32 = vsel %vm1170_vm7, %v3028_v23, %v3030_v30  ;;  %v3029_v41 = vsel %vm1170_vm7, %v3027_v61, %v3028_v23  ;;  %v3718_v35 = vrot.slane %v3706_v18, 6 }
 0x39b   :  { %v3687_v58 = vsel %vm1715_vm8, %v3684_v36, %v3686_v14  ;;  %v3685_v7 = vsel %vm1715_vm8, %v3683_v13, %v3684_v36 }
 0x39c   :  { %v2995_v44 = vpop.permute.xlu1 %2994  ;;  %v2993_v5 = vpop.permute.xlu0 %2992  ;;  %v3745_v47 = vstv %s6451_s29 }
 0x39d   :  { %v3005_v62 = vadd.f32 %v2995_v44, %v2965_v19  ;;  %v3004_v9 = vadd.f32 %v2993_v5, %v2964_v52  ;;  %v3720_v5 = vsel %vm1715_vm8, %v3718_v35, %v3719_v3  ;;  %v3746_v40 = vmul.f32 %v3745_v47, %v5144_v27 }
 0x39e   :  { %3654 = vrot.lane.b32.xlu1 %v3647_v17, %s4123_s3  ;;  %3652 = vrot.lane.b32.xlu0 %v3645_v38, %s4123_s3  ;;  %s3994_s3 = sld [smem:[#allocation6 + $0x61]]  ;;  %v3722_v17 = vsel %vm1715_vm8, %v3719_v3, %v3721_v29  ;;  %v3724_v38 = vrot.slane %v3710_v43, 6  ;;  %v3750_v54 = vmul.f32 %v3745_v47, %v5162_v15  ;;  %v3751_v48 = vmul.f32 %v3745_v47, %v5265_v39 }
 0x39f   :  { %v3037_v33 = vadd.f32 %v3026_v21, %v3005_v62  ;;  %v3036_v42 = vadd.f32 %v3024_v22, %v3004_v9  ;;  %v3749_v1 = vmul.f32 %v3745_v47, %v5159_v0  ;;  %v3758_v56 = vrot.slane %v3746_v40, 6 }
 0x3a0   :  { %v2999_v20 = vpop.permute.xlu1 %2998  ;;  %v2997_v55 = vpop.permute.xlu0 %2996  ;;  %v3764_v36 = vrot.slane %v3750_v54, 6  ;;  %v3766_v28 = vrot.slane %v3751_v48, 6 }
 0x3a1   :  { %v3007_v12 = vadd.f32 %v2999_v20, %v2967_v10  ;;  %v3006_v26 = vadd.f32 %v2997_v55, %v2966_v45  ;;  %v3747_v10 = vmul.f32 %v3745_v47, %v5152_v57  ;;  %v3748_v45 = vmul.f32 %v3745_v47, %v5240_v24 }
 0x3a2   :  { %3690 = vrot.lane.b32.xlu1 %v3682_v11, %s4124_s5  ;;  %3688 = vrot.lane.b32.xlu0 %v3680_v4, %s4124_s5  ;;  %v3727_v11 = vsel %vm1715_vm8, %v3724_v38, %v3726_v63  ;;  %v3725_v4 = vsel %vm1715_vm8, %v3723_v16, %v3724_v38  ;;  %v3763_v23 = vrot.slane %v3749_v1, 6 }
 0x3a3   :  { %v3039_v34 = vadd.f32 %v3031_v32, %v3007_v12  ;;  %v3038_v51 = vadd.f32 %v3029_v41, %v3006_v26  ;;  %v3759_v25 = vrot.slane %v3747_v10, 6  ;;  %v3761_v37 = vrot.slane %v3748_v45, 6 }
 0x3a4   :  { %v3067_v19 = vpop.permute.xlu1 %3066  ;;  %v3065_v52 = vpop.permute.xlu0 %3064  ;;  %v3785_v20 = vstv %s3994_s3  ;;  %v3765_v43 = vsel %vm1715_vm8, %v3763_v23, %v3764_v36 }
 0x3a5   :  { %v3077_v59 = vadd.f32 %v3067_v19, %v3037_v33  ;;  %v3076_v8 = vadd.f32 %v3065_v52, %v3036_v42  ;;  %v3762_v14 = vsel %vm1715_vm8, %v3759_v25, %v3761_v37  ;;  %v3787_v46 = vmul.f32 %v3785_v20, %v5152_v57 }
 0x3a6   :  { %3694 = vrot.lane.b32.xlu1 %v3687_v58, %s4124_s5  ;;  %3692 = vrot.lane.b32.xlu0 %v3685_v7, %s4124_s5  ;;  %v3788_v12 = vmul.f32 %v3785_v20, %v5240_v24  ;;  %v3760_v13 = vsel %vm1715_vm8, %v3758_v56, %v3759_v25  ;;  %v3786_v30 = vmul.f32 %v3785_v20, %v5144_v27  ;;  %s3981_s5 = sld [smem:[#allocation6 + $0x54]] }
 0x3a7   :  { %v3790_v61 = vmul.f32 %v3785_v20, %v5162_v15  ;;  %v3767_v42 = vsel %vm1715_vm8, %v3764_v36, %v3766_v28  ;;  %v3799_v58 = vrot.slane %v3787_v46, 6  ;;  %v3791_v52 = vmul.f32 %v3785_v20, %v5265_v39 }
 0x3a8   :  { %v3071_v50 = vpop.permute.xlu1 %3070  ;;  %v3069_v2 = vpop.permute.xlu0 %3068  ;;  %v3801_v19 = vrot.slane %v3788_v12, 6  ;;  %v3789_v31 = vmul.f32 %v3785_v20, %v5159_v0 }
 0x3a9   :  { %v3079_v49 = vadd.f32 %v3071_v50, %v3039_v34  ;;  %v3078_v44 = vadd.f32 %v3069_v2, %v3038_v51  ;;  %v3804_v32 = vrot.slane %v3790_v61, 6  ;;  %v3806_v41 = vrot.slane %v3791_v52, 6 }
 0x3aa   :  { %3730 = vrot.lane.b32.xlu1 %v3722_v17, %s4125_s7  ;;  %3728 = vrot.lane.b32.xlu0 %v3720_v5, %s4125_s7  ;;  %v3802_v53 = vsel %vm1715_vm8, %v3799_v58, %v3801_v19  ;;  %v3803_v51 = vrot.slane %v3789_v31, 6 }
 0x3ab   :  { %v3807_v17 = vsel %vm1715_vm8, %v3804_v32, %v3806_v41 }
 0x3ac   :  { %v3107_v62 = vpop.permute.xlu1 %3106  ;;  %v3105_v9 = vpop.permute.xlu0 %3104  ;;  %v3805_v38 = vsel %vm1715_vm8, %v3803_v51, %v3804_v32  ;;  %v3281_v48 = vstv %s3981_s5 }
 0x3ad   :  { %v3117_v6 = vadd.f32 %v3107_v62, %v3077_v59  ;;  %v3116_v60 = vadd.f32 %v3105_v9, %v3076_v8  ;;  %v3798_v59 = vrot.slane %v3786_v30, 6  ;;  %v3287_v28 = vmul.f32 %v3281_v48, %v5265_v39 }
 0x3ae   :  { %3734 = vrot.lane.b32.xlu1 %v3727_v11, %s4125_s7  ;;  %3732 = vrot.lane.b32.xlu0 %v3725_v4, %s4125_s7  ;;  %v3285_v46 = vmul.f32 %v3281_v48, %v5159_v0  ;;  %s3988_s7 = sld [smem:[#allocation6 + $0x5b]] }
 0x3af   :  { %v3800_v34 = vsel %vm1715_vm8, %v3798_v59, %v3799_v58 }
 0x3b0   :  { %v3111_v55 = vpop.permute.xlu1 %3110  ;;  %v3109_v21 = vpop.permute.xlu0 %3108 }
 0x3b1   :  { %v3119_v26 = vadd.f32 %v3111_v55, %v3079_v49  ;;  %v3118_v22 = vadd.f32 %v3109_v21, %v3078_v44  ;;  %v3286_v55 = vmul.f32 %v3281_v48, %v5162_v15 }
 0x3b2   :  { %3770 = vrot.lane.b32.xlu1 %v3762_v14, %s4126_s10  ;;  %3768 = vrot.lane.b32.xlu0 %v3760_v13, %s4126_s10  ;;  %v3282_v14 = vmul.f32 %v3281_v48, %v5144_v27 }
 0x3b3   :  { %v3300_v30 = vrot.slane %v3286_v55, 5 }
 0x3b4   :  { %v3147_v18 = vpop.permute.xlu1 %3146  ;;  %v3145_v33 = vpop.permute.xlu0 %3144 }
 0x3b5   :  { %v3157_v3 = vadd.f32 %v3147_v18, %v3117_v6  ;;  %v3156_v29 = vadd.f32 %v3145_v33, %v3116_v60  ;;  %v3283_v6 = vmul.f32 %v3281_v48, %v5152_v57  ;;  %v3284_v60 = vmul.f32 %v3281_v48, %v5240_v24 }
 0x3b6   :  { %3774 = vrot.lane.b32.xlu1 %v3767_v42, %s4126_s10  ;;  %3772 = vrot.lane.b32.xlu0 %v3765_v43, %s4126_s10  ;;  %v3302_v33 = vrot.slane %v3287_v28, 5  ;;  %v3299_v42 = vrot.slane %v3285_v46, 5  ;;  %v3553_v28 = vstv %s3988_s7  ;;  %s4128_s10 = smov [#allocation7]  }
 0x3b7   :  { %v3295_v21 = vrot.slane %v3283_v6, 5  ;;  %v3297_v36 = vrot.slane %v3284_v60, 5  ;;  %v3555_v46 = vmul.f32 %v3553_v28, %v5152_v57  ;;  %v3558_v57 = vmul.f32 %v3553_v28, %v5162_v15 }
 0x3b8   :  { %v3151_v8 = vpop.permute.xlu1 %3150  ;;  %v3149_v7 = vpop.permute.xlu0 %3148  ;;  %v3303_v31 = vsel %vm120_vm1, %v3300_v30, %v3302_v33  ;;  %v3301_v59 = vsel %vm120_vm1, %v3299_v42, %v3300_v30 }
 0x3b9   :  { %v3159_v35 = vadd.f32 %v3151_v8, %v3119_v26  ;;  %v3158_v47 = vadd.f32 %v3149_v7, %v3118_v22  ;;  %v3294_v22 = vrot.slane %v3282_v14, 5  ;;  %v3298_v61 = vsel %vm120_vm1, %v3295_v21, %v3297_v36 }
 0x3ba   :  { %3810 = vrot.lane.b32.xlu1 %v3802_v53, %s4127_s12  ;;  %3808 = vrot.lane.b32.xlu0 %v3800_v34, %s4127_s12  ;;  %v3567_v42 = vrot.slane %v3555_v46, 6 }
 0x3bb   :  { %v3296_v18 = vsel %vm120_vm1, %v3294_v22, %v3295_v21 }
 0x3bc   :  { %v3187_v10 = vpop.permute.xlu1 %3186  ;;  %v3185_v45 = vpop.permute.xlu0 %3184 }
 0x3bd   :  { %v3197_v50 = vadd.f32 %v3187_v10, %v3157_v3  ;;  %v3196_v2 = vadd.f32 %v3185_v45, %v3156_v29 }
 0x3be   :  { %3814 = vrot.lane.b32.xlu1 %v3807_v17, %s4127_s12  ;;  %3812 = vrot.lane.b32.xlu0 %v3805_v38, %s4127_s12  ;;  %s3885_s12 = sshll.u32 %s4128_s10, 4  ;;  %s3886_s12 = int_to_ptr.vmem [resolvable:$true] %s3885_s12 }
 0x3bf   :  { %s4089_s11 = scalar_lea.vmem %s3886_s12, 2048  ;;  %p4094_p0 = scmp.lt.s32.totalorder %s3886_s12, %s3886_s12 }
 0x3c0   :  { %v3191_v63 = vpop.permute.xlu1 %3190  ;;  %v3189_v49 = vpop.permute.xlu0 %3188  ;;  %p4090_p13 = scmp.ne.s32.totalorder %s3886_s12, %s4089_s11  ;;  %p4095_p1 = scmp.lt.s32.totalorder %s4089_s11, %s4089_s11 }
 0x3c1   :  { %v3199_v44 = vadd.f32 %v3191_v63, %v3159_v35  ;;  %v3198_v5 = vadd.f32 %v3189_v49, %v3158_v47 }
 0x3c2   :  { %p4096_p2 = por %p4095_p1, %p4094_p0 }
 0x3c4   :  { %v3227_v16 = vpop.permute.xlu1 %3226  ;;  %v3225_v25 = vpop.permute.xlu0 %3224  ;;  %p4097_p3 = pnand %p4096_p2, %p4090_p13 }
 0x3c5   :  { %v3237_v37 = vadd.f32 %v3227_v16, %v3197_v50  ;;  %v3236_v40 = vadd.f32 %v3225_v25, %v3196_v2 }
 0x3c8   :  { %v3231_v62 = vpop.permute.xlu1 %3230  ;;  %v3229_v9 = vpop.permute.xlu0 %3228 }
 0x3c9   :  { %v3239_v11 = vadd.f32 %v3231_v62, %v3199_v44  ;;  %v3238_v54 = vadd.f32 %v3229_v9, %v3198_v5 }
 0x3cc   :  { %v3267_v4 = vpop.permute.xlu1 %3266  ;;  %v3265_v1 = vpop.permute.xlu0 %3264 }
 0x3cd   :  { %v3277_v56 = vadd.f32 %v3267_v4, %v3237_v37  ;;  %v3276_v20 = vadd.f32 %v3265_v1, %v3236_v40 }
 0x3cf   :  { %v3309_v58 = vadd.f32 %v3298_v61, %v3277_v56  ;;  %v3308_v19 = vadd.f32 %v3296_v18, %v3276_v20 }
 0x3d0   :  { %v3271_v12 = vpop.permute.xlu1 %3270  ;;  %v3269_v26 = vpop.permute.xlu0 %3268 }
 0x3d1   :  { %v3279_v13 = vadd.f32 %v3271_v12, %v3239_v11  ;;  %v3278_v23 = vadd.f32 %v3269_v26, %v3238_v54  ;;  %v3556_v12 = vmul.f32 %v3553_v28, %v5240_v24  ;;  %v3559_v24 = vmul.f32 %v3553_v28, %v5265_v39 }
 0x3d3   :  { %v3311_v8 = vadd.f32 %v3303_v31, %v3279_v13  ;;  %v3310_v7 = vadd.f32 %v3301_v59, %v3278_v23  ;;  %v3557_v31 = vmul.f32 %v3553_v28, %v5159_v0 }
 0x3d4   :  { %v3339_v52 = vpop.permute.xlu1 %3338  ;;  %v3337_v3 = vpop.permute.xlu0 %3336 }
 0x3d5   :  { %v3349_v29 = vadd.f32 %v3339_v52, %v3309_v58  ;;  %v3348_v43 = vadd.f32 %v3337_v3, %v3308_v19  ;;  %v3569_v58 = vrot.slane %v3556_v12, 6  ;;  %v3554_v19 = vmul.f32 %v3553_v28, %v5144_v27 }
 0x3d6   :  { %v3571_v15 = vrot.slane %v3557_v31, 6 }
 0x3d7   :  { %v3570_v27 = vsel %vm1715_vm8, %v3567_v42, %v3569_v58 }
 0x3d8   :  { %v3343_v53 = vpop.permute.xlu1 %3342  ;;  %v3341_v32 = vpop.permute.xlu0 %3340 }
 0x3d9   :  { %v3351_v41 = vadd.f32 %v3343_v53, %v3311_v8  ;;  %v3350_v35 = vadd.f32 %v3341_v32, %v3310_v7 }
 0x3dc   :  { %v3379_v47 = vpop.permute.xlu1 %3378  ;;  %v3377_v34 = vpop.permute.xlu0 %3376 }
 0x3dd   :  { %v3389_v21 = vadd.f32 %v3379_v47, %v3349_v29  ;;  %v3388_v36 = vadd.f32 %v3377_v34, %v3348_v43 }
 0x3e0   :  { %v3383_v51 = vpop.permute.xlu1 %3382  ;;  %v3381_v10 = vpop.permute.xlu0 %3380 }
 0x3e1   :  { %v3391_v30 = vadd.f32 %v3383_v51, %v3351_v41  ;;  %v3390_v61 = vadd.f32 %v3381_v10, %v3350_v35  ;;  %v3566_v35 = vrot.slane %v3554_v19, 6  ;;  %v3572_v10 = vrot.slane %v3558_v57, 6 }
 0x3e3   :  { %v3568_v51 = vsel %vm1715_vm8, %v3566_v35, %v3567_v42 }
 0x3e4   :  { %v3419_v45 = vpop.permute.xlu1 %3418  ;;  %v3417_v50 = vpop.permute.xlu0 %3416 }
 0x3e5   :  { %v3429_v26 = vadd.f32 %v3419_v45, %v3389_v21  ;;  %v3428_v22 = vadd.f32 %v3417_v50, %v3388_v36  ;;  %v3574_v45 = vrot.slane %v3559_v24, 6 }
 0x3e8   :  { %v3423_v2 = vpop.permute.xlu1 %3422  ;;  %v3421_v17 = vpop.permute.xlu0 %3420 }
 0x3e9   :  { %v3431_v52 = vadd.f32 %v3423_v2, %v3391_v30  ;;  %v3430_v3 = vadd.f32 %v3421_v17, %v3390_v61 }
 0x3ec   :  { %v3459_v38 = vpop.permute.xlu1 %3458  ;;  %v3457_v63 = vpop.permute.xlu0 %3456 }
 0x3ed   :  { %v3469_v18 = vadd.f32 %v3459_v38, %v3429_v26  ;;  %v3468_v33 = vadd.f32 %v3457_v63, %v3428_v22 }
 0x3f0   :  { %v3463_v49 = vpop.permute.xlu1 %3462  ;;  %v3461_v44 = vpop.permute.xlu0 %3460 }
 0x3f1   :  { %v3471_v7 = vadd.f32 %v3463_v49, %v3431_v52  ;;  %v3470_v53 = vadd.f32 %v3461_v44, %v3430_v3  ;;  %v3575_v44 = vsel %vm1715_vm8, %v3572_v10, %v3574_v45  ;;  %v4040_v45 = vld [vmem:[#allocation2 + $0x18] sm:$0xff] }
 0x3f4   :  { %v3499_v5 = vpop.permute.xlu1 %3498  ;;  %v3497_v16 = vpop.permute.xlu0 %3496 }
 0x3f5   :  { %v3509_v29 = vadd.f32 %v3499_v5, %v3469_v18  ;;  %v3508_v43 = vadd.f32 %v3497_v16, %v3468_v33  ;;  %v3573_v5 = vsel %vm1715_vm8, %v3571_v15, %v3572_v10 }
 0x3f8   :  { %v3503_v25 = vpop.permute.xlu1 %3502  ;;  %v3501_v37 = vpop.permute.xlu0 %3500 }
 0x3f9   :  { %v3511_v47 = vadd.f32 %v3503_v25, %v3471_v7  ;;  %v3510_v34 = vadd.f32 %v3501_v37, %v3470_v53 }
 0x3fc   :  { %v3539_v40 = vpop.permute.xlu1 %3538  ;;  %v3537_v62 = vpop.permute.xlu0 %3536 }
 0x3fd   :  { %v3549_v32 = vadd.f32 %v3539_v40, %v3509_v29  ;;  %v3548_v41 = vadd.f32 %v3537_v62, %v3508_v43 }
 0x3ff   :  { %v3581_v17 = vadd.f32 %v3570_v27, %v3549_v32  ;;  %v3580_v38 = vadd.f32 %v3568_v51, %v3548_v41  ;;  %v4039_v51 = vld [vmem:[#allocation2 + $0x8] sm:$0xff] }
 0x400   :  { %v3543_v9 = vpop.permute.xlu1 %3542  ;;  %v3541_v11 = vpop.permute.xlu0 %3540 }
 0x401   :  { %v3551_v2 = vadd.f32 %v3543_v9, %v3511_v47  ;;  %v3550_v0 = vadd.f32 %v3541_v11, %v3510_v34 }
 0x403   :  { %v3583_v37 = vadd.f32 %v3575_v44, %v3551_v2  ;;  %v3582_v40 = vadd.f32 %v3573_v5, %v3550_v0  ;;  %v4042_v2 = vld [vmem:[#allocation2 + $0x38] sm:$0xff]  ;;  %v4045_v44 = vld [vmem:[#allocation2 + $0x20] sm:$0xff] }
 0x404   :  { %v3611_v54 = vpop.permute.xlu1 %3610  ;;  %v3609_v48 = vpop.permute.xlu0 %3608 }
 0x405   :  { %v3621_v63 = vadd.f32 %v3611_v54, %v3581_v17  ;;  %v3620_v49 = vadd.f32 %v3609_v48, %v3580_v38  ;;  %v4043_v17 = vld [vmem:[#allocation2] sm:$0xff] }
 0x408   :  { %v3615_v6 = vpop.permute.xlu1 %3614  ;;  %v3613_v60 = vpop.permute.xlu0 %3612 }
 0x409   :  { %v3623_v36 = vadd.f32 %v3615_v6, %v3583_v37  ;;  %v3622_v28 = vadd.f32 %v3613_v60, %v3582_v40 }
 0x40c   :  { %v3651_v4 = vpop.permute.xlu1 %3650  ;;  %v3649_v1 = vpop.permute.xlu0 %3648 }
 0x40d   :  { %v3661_v62 = vadd.f32 %v3651_v4, %v3621_v63  ;;  %v3660_v21 = vadd.f32 %v3649_v1, %v3620_v49  ;;  %v4044_v63 = vld [vmem:[#allocation2 + $0x10] sm:$0xff] }
 0x410   :  { %v6518_v14 = vpop.permute.xlu1 %3654  ;;  %v6520_v56 = vpop.permute.xlu0 %3652 }
 0x411   :  { %v3663_v26 = vadd.f32 %v6518_v14, %v3623_v36  ;;  %v3662_v54 = vadd.f32 %v6520_v56, %v3622_v28  ;;  %v4048_v36 = vld [vmem:[#allocation2 + $0x58] sm:$0xff] }
 0x414   :  { %v3691_v20 = vpop.permute.xlu1 %3690  ;;  %v3689_v55 = vpop.permute.xlu0 %3688 }
 0x415   :  { %v3701_v46 = vadd.f32 %v3691_v20, %v3661_v62  ;;  %v3700_v12 = vadd.f32 %v3689_v55, %v3660_v21  ;;  %v4047_v62 = vld [vmem:[#allocation2 + $0x48] sm:$0xff] }
 0x418   :  { %v3695_v13 = vpop.permute.xlu1 %3694  ;;  %v3693_v23 = vpop.permute.xlu0 %3692 }
 0x419   :  { %v3703_v30 = vadd.f32 %v3695_v13, %v3663_v26  ;;  %v3702_v61 = vadd.f32 %v3693_v23, %v3662_v54  ;;  %v4051_v26 = vld [vmem:[#allocation2 + $0x40] sm:$0xff] }
 0x41c   :  { %v3731_v59 = vpop.permute.xlu1 %3730  ;;  %v3729_v8 = vpop.permute.xlu0 %3728 }
 0x41d   :  { %v3741_v48 = vadd.f32 %v3731_v59, %v3701_v46  ;;  %v3740_v22 = vadd.f32 %v3729_v8, %v3700_v12  ;;  %v4049_v46 = vld [vmem:[#allocation2 + $0x68] sm:$0xff] }
 0x420   :  { %v3735_v50 = vpop.permute.xlu1 %3734  ;;  %v3733_v39 = vpop.permute.xlu0 %3732 }
 0x421   :  { %v3743_v4 = vadd.f32 %v3735_v50, %v3703_v30  ;;  %v3742_v1 = vadd.f32 %v3733_v39, %v3702_v61  ;;  %v4041_v50 = vld [vmem:[#allocation2 + $0x28] sm:$0xff]  ;;  %v4053_v30 = vld [vmem:[#allocation2 + $0x60] sm:$0xff] }
 0x424   :  { %v3771_v16 = vpop.permute.xlu1 %3770  ;;  %v3769_v25 = vpop.permute.xlu0 %3768 }
 0x425   :  { %v3781_v18 = vadd.f32 %v3771_v16, %v3741_v48  ;;  %v3780_v33 = vadd.f32 %v3769_v25, %v3740_v22  ;;  %v4046_v16 = vld [vmem:[#allocation2 + $0x30] sm:$0xff] }
 0x426   :  { %v4052_v48 = vld [vmem:[#allocation2 + $0x50] sm:$0xff] }
 0x428   :  { %v3775_v9 = vpop.permute.xlu1 %3774  ;;  %v3773_v11 = vpop.permute.xlu0 %3772 }
 0x429   :  { %v3783_v20 = vadd.f32 %v3775_v9, %v3743_v4  ;;  %v3782_v55 = vadd.f32 %v3773_v11, %v3742_v1  ;;  %v4050_v9 = vld [vmem:[#allocation2 + $0x78] sm:$0xff] }
 0x42c   :  { %v3811_v42 = vpop.permute.xlu1 %3810  ;;  %v3809_v58 = vpop.permute.xlu0 %3808 }
 0x42d   :  { %v3821_v6 = vadd.f32 %v3811_v42, %v3781_v18  ;;  %v3820_v60 = vadd.f32 %v3809_v58, %v3780_v33  ;;  %v4054_v18 = vld [vmem:[#allocation2 + $0x70] sm:$0xff] }
 0x42f   :  { %v3825_v19 = vsub.f32 0.0, %v3821_v6  ;;  %v3824_v52 = vsub.f32 0.0, %v3820_v60 }
 0x430   :  { %v3815_v3 = vpop.permute.xlu1 %3814  ;;  %v3813_v14 = vpop.permute.xlu0 %3812 }
 0x431   :  { %v3830_v29 = vmul.f32 1.442695, %v3825_v19  ;;  %v3828_v56 = vmul.f32 1.442695, %v3824_v52  ;;  %v3823_v43 = vadd.f32 %v3815_v3, %v3783_v20  ;;  %v3822_v57 = vadd.f32 %v3813_v14, %v3782_v55 }
 0x433   :  { %4007 = vpow2.f32 %v3830_v29  ;;  %v3827_v13 = vsub.f32 0.0, %v3823_v43  ;;  %v3826_v23 = vsub.f32 0.0, %v3822_v57 }
 0x434   :  { %4009 = vpow2.f32 %v3828_v56 }
 0x435   :  { %v3834_v24 = vmul.f32 1.442695, %v3827_v13  ;;  %v3832_v31 = vmul.f32 1.442695, %v3826_v23 }
 0x437   :  { %4011 = vpow2.f32 %v3834_v24 }
 0x438   :  { %4013 = vpow2.f32 %v3832_v31 }
 0x43d   :  { %v4008_v59 = vpop.eup %4007 }
 0x43e   :  { %v4010_v8 = vpop.eup %4009  ;;  %v3837_v7 = vadd.f32 1.0, %v4008_v59 }
 0x43f   :  { %v3836_v53 = vadd.f32 1.0, %v4010_v8 }
 0x440   :  { %4015 = vrcp.f32 %v3837_v7 }
 0x441   :  { %v4012_v32 = vpop.eup %4011  ;;  %4017 = vrcp.f32 %v3836_v53 }
 0x442   :  { %v4014_v41 = vpop.eup %4013  ;;  %v3839_v35 = vadd.f32 1.0, %v4012_v32 }
 0x443   :  { %v3838_v47 = vadd.f32 1.0, %v4014_v41 }
 0x444   :  { %4019 = vrcp.f32 %v3839_v35 }
 0x445   :  { %4021 = vrcp.f32 %v3838_v47 }
 0x44a   :  { %v4016_v34 = vpop.eup %4015 }
 0x44b   :  { %v4018_v27 = vpop.eup %4017  ;;  %v3849_v10 = vmul.f32 %v4039_v51, %v4016_v34  ;;  %v3851_v15 = vmul.f32 %v4040_v45, %v4016_v34  ;;  %v3853_v39 = vmul.f32 %v4041_v50, %v4016_v34  ;;  %v3855_v0 = vmul.f32 %v4042_v2, %v4016_v34 }
 0x44c   :  { %v3848_v38 = vmul.f32 %v4043_v17, %v4018_v27  ;;  %v3850_v49 = vmul.f32 %v4044_v63, %v4018_v27  ;;  %v3852_v5 = vmul.f32 %v4045_v44, %v4018_v27  ;;  %v3854_v25 = vmul.f32 %v4046_v16, %v4018_v27 }
 0x44d   :  { %3865 = vst.msk [vmem:[#allocation7 + $0x8] sm:$0xff] %vm55_vm0, %v3849_v10  ;;  %3867 = vst.msk [vmem:[#allocation7 + $0x18] sm:$0xff] %vm55_vm0, %v3851_v15 }
 0x44e   :  { %3869 = vst.msk [vmem:[#allocation7 + $0x28] sm:$0xff] %vm55_vm0, %v3853_v39  ;;  %3871 = vst.msk [vmem:[#allocation7 + $0x38] sm:$0xff] %vm55_vm0, %v3855_v0  ;;  %v4020_v37 = vpop.eup %4019 }
 0x44f   :  { %3864 = vst.msk [vmem:[#allocation7] sm:$0xff] %vm55_vm0, %v3848_v38  ;;  %3866 = vst.msk [vmem:[#allocation7 + $0x10] sm:$0xff] %vm55_vm0, %v3850_v49  ;;  %v4022_v40 = vpop.eup %4021  ;;  %v3857_v21 = vmul.f32 %v4047_v62, %v4020_v37  ;;  %v3859_v28 = vmul.f32 %v4048_v36, %v4020_v37  ;;  %v3861_v12 = vmul.f32 %v4049_v46, %v4020_v37 }
 0x450   :  { %3868 = vst.msk [vmem:[#allocation7 + $0x20] sm:$0xff] %vm55_vm0, %v3852_v5  ;;  %3870 = vst.msk [vmem:[#allocation7 + $0x30] sm:$0xff] %vm55_vm0, %v3854_v25  ;;  %v3863_v11 = vmul.f32 %v4050_v9, %v4020_v37  ;;  %v3856_v54 = vmul.f32 %v4051_v26, %v4022_v40  ;;  %v3858_v22 = vmul.f32 %v4052_v48, %v4022_v40 }
 0x451   :  { %v3860_v61 = vmul.f32 %v4053_v30, %v4022_v40  ;;  %v3862_v33 = vmul.f32 %v4054_v18, %v4022_v40  ;;  %3873 = vst.msk [vmem:[#allocation7 + $0x48] sm:$0xff] %vm55_vm0, %v3857_v21  ;;  %3875 = vst.msk [vmem:[#allocation7 + $0x58] sm:$0xff] %vm55_vm0, %v3859_v28 }
 0x452   :  { %3877 = vst.msk [vmem:[#allocation7 + $0x68] sm:$0xff] %vm55_vm0, %v3861_v12  ;;  %3879 = vst.msk [vmem:[#allocation7 + $0x78] sm:$0xff] %vm55_vm0, %v3863_v11 }
 0x453   :  { %3872 = vst.msk [vmem:[#allocation7 + $0x40] sm:$0xff] %vm55_vm0, %v3856_v54  ;;  %3874 = vst.msk [vmem:[#allocation7 + $0x50] sm:$0xff] %vm55_vm0, %v3858_v22 }
 0x454   :  { %3876 = vst.msk [vmem:[#allocation7 + $0x60] sm:$0xff] %vm55_vm0, %v3860_v61  ;;  %3878 = vst.msk [vmem:[#allocation7 + $0x70] sm:$0xff] %vm55_vm0, %v3862_v33 }
 0x455   :  { %4100 = shalt.err (!%p4097_p3)
}
 0x456   :  { %s4101_s15 = scalar_lea.hbm %s6567_s2, 2048 }
 0x457   :  { %p4102_p4 = scmp.ne.s32.totalorder %s6567_s2, %s4101_s15  ;;  %p4105_p5 = scmp.lt.u32.totalorder %s4101_s15, %s6567_s2 }
 0x459   :  { %p4107_p6 = pnand %p4105_p5, %p4102_p4 }
 0x45b   :  { %4110 = shalt.err (!%p4107_p6)
}
 0x45c   :  { %3891 = dma.vmem_to_hbm [thread:$0]  %s3886_s12, 2048, %s6567_s2, [#allocation4], %s4118_s1, %s4118_s1, %s4119_s22  }
 0x45d   :  { %4115 = dma.done.wait [#allocation4], 2048  }
 0x45e   :  { %4116 = vsyncadd [#allocation4], 4294965248 }
 0x45f   :  { %3895 = vsyncpa [#allocation3], 1 }
 0x460   :  { %3896 = vsyncpa [#allocation4], 1 }
 0x461   :  { %3897 = vsyncpa [#allocation5], 1 }

</bundles_post_ra>
